<compile_context>
chip_gen: v7x
topology: tpu7x:2x2x1
jax: 0.10.0
libtpu: 0.0.40
codegen_flags: <defaults>
</compile_context>

<pallas_src>
import numpy as np

import jax
import jax.numpy as jnp
from jax import lax
from jax.experimental import pallas as pl
from jax.experimental.pallas import tpu as pltpu


# ----------------------------------------------------------------------------
# Fused whole-network kernel (one grid step == BB images)
# ----------------------------------------------------------------------------
def _cnn_mnist_kernel(x_ref, w1_ref, b1_ref, w2_ref, b2_ref, w3_ref, b3_ref,
                      p1e_ref, p1o_ref, p2e_ref, p2o_ref, p3e_ref, p3o_ref,
                      f1w_ref, f1b_ref, f2w_ref, f2b_ref, o_ref):
    f32 = jnp.float32

    # Load all (small) weights / selection matrices once per grid step; they are
    # reused across the BB images handled by this step.
    w1 = [[w1_ref[q, dh] for dh in range(3)] for q in range(2)]
    w2 = [[w2_ref[q, dh] for dh in range(3)] for q in range(2)]
    w3 = [[w3_ref[q, dh] for dh in range(3)] for q in range(2)]
    b1, b2, b3 = b1_ref[...], b2_ref[...], b3_ref[...]
    p1 = (p1e_ref[...], p1o_ref[...])
    p2 = (p2e_ref[...], p2o_ref[...])
    p3 = (p3e_ref[...], p3o_ref[...])
    f1w = [f1w_ref[h] for h in range(3)]
    f1b = f1b_ref[...]
    f2w = f2w_ref[...]
    f2b = f2b_ref[...]

    def conv_relu_pool(xp, wq, bias, psel):
        """xp: (Hp, Win*Cin) H-padded activation value.

        wq[q][dh]: (Win*Cin, Wpool*Cout) banded weights; output-column parity q
        encodes the W half of the 2x2 max-pool (W-padding is baked in).
        psel = (P_even, P_odd): 0/1 row-selection matrices of shape
        (Hpool + 2*pad_next, Ho).  They perform the H half of the pool AND emit
        the result already H-padded (zero rows) for the NEXT conv layer.
        """
        hp = xp.shape[0]
        ho = hp - 2
        pe, po = psel
        pooled = None
        for q in range(2):
            acc = jnp.dot(xp[0:ho, :], wq[q][0], preferred_element_type=f32)
            for dh in (1, 2):
                acc = acc + jnp.dot(xp[dh:dh + ho, :], wq[q][dh],
                                    preferred_element_type=f32)
            y = jnp.maximum(acc + bias, 0.0)                  # conv + bias + ReLU
            cand = jnp.maximum(jnp.dot(pe, y, preferred_element_type=f32),
                               jnp.dot(po, y, preferred_element_type=f32))
            pooled = cand if pooled is None else jnp.maximum(pooled, cand)
        return pooled                                          # (Hpool+2*pad_next, Wpool*Cout)

    nb = x_ref.shape[0]
    for b in range(nb):
        # conv1 (valid): (28, 28*1) -> pooled+padded (15, 13*16)
        a1 = conv_relu_pool(x_ref[b].astype(f32), w1, b1, p1)
        # conv2 (pad=1): (15, 13*16) -> pooled+padded (8, 6*32)
        a2 = conv_relu_pool(a1, w2, b2, p2)
        # conv3 (pad=1): (8, 6*32) -> pooled (3, 3*32)
        a3 = conv_relu_pool(a2, w3, b3, p3)

        # fc1 + ReLU (PyTorch's NCHW flatten order is folded into the (3, 96, 32) weights)
        acc = jnp.dot(a3[0:1, :], f1w[0], preferred_element_type=f32)
        for hh in (1, 2):
            acc = acc + jnp.dot(a3[hh:hh + 1, :], f1w[hh],
                                preferred_element_type=f32)
        h1 = jnp.maximum(acc + f1b, 0.0)                       # (1, 32)

        # fc2 + log-softmax
        logits = jnp.dot(h1, f2w, preferred_element_type=f32) + f2b
        m = jnp.max(logits, axis=-1, keepdims=True)
        z = logits - m
        lse = jnp.log(jnp.sum(jnp.exp(z), axis=-1, keepdims=True))
        o_ref[b] = z - lse                                     # (1, 10)


# ----------------------------------------------------------------------------
# Host wrapper
# ----------------------------------------------------------------------------
@jax.jit
def cnn_mnist_forward(x_nchw, kp):
    N = x_nchw.shape[0]
    # NCHW with C=1 -> per-image 2D tile (H, W*C); pure metadata reshape.
    x2d = x_nchw.astype(jnp.float32).reshape(N, 28, 28)
    # Images processed per grid step (amortizes per-step overhead, gives the
    # scheduler independent matmuls to overlap).
    BB = next(bb for bb in (8, 4, 2, 1) if N % bb == 0)

    def bcast(arr):
        zeros = (0,) * arr.ndim
        return pl.BlockSpec(arr.shape, lambda n, z=zeros: z)

    out = pl.pallas_call(
        _cnn_mnist_kernel,
        out_shape=jax.ShapeDtypeStruct((N, 1, 10), jnp.float32),
        grid_spec=pltpu.PrefetchScalarGridSpec(
            num_scalar_prefetch=0,
            grid=(N // BB,),
            in_specs=[
                pl.BlockSpec((BB, 28, 28), lambda n: (n, 0, 0)),
                bcast(kp["w1"]), bcast(kp["b1"]),
                bcast(kp["w2"]), bcast(kp["b2"]),
                bcast(kp["w3"]), bcast(kp["b3"]),
                bcast(kp["p1e"]), bcast(kp["p1o"]),
                bcast(kp["p2e"]), bcast(kp["p2o"]),
                bcast(kp["p3e"]), bcast(kp["p3o"]),
                bcast(kp["f1w"]), bcast(kp["f1b"]),
                bcast(kp["f2w"]), bcast(kp["f2b"]),
            ],
            out_specs=pl.BlockSpec((BB, 1, 10), lambda n: (n, 0, 0)),
        ),
        compiler_params=pltpu.CompilerParams(
            dimension_semantics=("parallel",)),
    )(x2d,
      kp["w1"], kp["b1"], kp["w2"], kp["b2"], kp["w3"], kp["b3"],
      kp["p1e"], kp["p1o"], kp["p2e"], kp["p2o"], kp["p3e"], kp["p3o"],
      kp["f1w"], kp["f1b"], kp["f2w"], kp["f2b"])
    return out.reshape(N, 10)


# ----------------------------------------------------------------------------
# One-time parameter repacking (PyTorch layout -> kernel-ready banded matrices)
# ----------------------------------------------------------------------------
def prepare_params(p):
    def conv_pool_pack(w, b, w_in, pad_w):
        w = np.asarray(w, np.float32)            # (Cout, Cin, 3, 3)
        b = np.asarray(b, np.float32)
        cout, cin = w.shape[0], w.shape[1]
        wo = w_in + 2 * pad_w - 2
        wpool = wo // 2
        # E[q, dw, wi, wp] = 1  iff  wi == 2*wp + q + dw - pad_w  (implicit W-padding)
        E = np.zeros((2, 3, w_in, wpool), np.float32)
        for q in range(2):
            for dw in range(3):
                for wp in range(wpool):
                    wi = 2 * wp + q + dw - pad_w
                    if 0 <= wi < w_in:
                        E[q, dw, wi, wp] = 1.0
        big = np.einsum('oiyx,qxab->qyaibo', w, E).reshape(
            2, 3, w_in * cin, wpool * cout)
        bias = np.tile(b, wpool).reshape(1, wpool * cout)
        return jnp.asarray(big), jnp.asarray(bias)

    def pool_select(ho, pad_next):
        # 0/1 H-pool selection matrices whose output rows are already H-padded
        # (zero rows at top/bottom) for the next conv layer.
        hq = ho // 2
        pe = np.zeros((hq + 2 * pad_next, ho), np.float32)
        po = np.zeros((hq + 2 * pad_next, ho), np.float32)
        for h in range(hq):
            pe[pad_next + h, 2 * h] = 1.0
            po[pad_next + h, 2 * h + 1] = 1.0
        return jnp.asarray(pe), jnp.asarray(po)

    w1, b1 = conv_pool_pack(p["c1w"], p["c1b"], 28, 0)
    w2, b2 = conv_pool_pack(p["c2w"], p["c2b"], 13, 1)
    w3, b3 = conv_pool_pack(p["c3w"], p["c3b"], 6, 1)
    p1e, p1o = pool_select(26, 1)   # conv1 out H=26 -> pooled 13, padded to 15
    p2e, p2o = pool_select(13, 1)   # conv2 out H=13 -> pooled 6,  padded to 8
    p3e, p3o = pool_select(6, 0)    # conv3 out H=6  -> pooled 3

    # fc1: PyTorch flattens (C, H, W); kernel activation layout is rows=h, cols=w*C+c.
    f1 = np.asarray(p["f1w"], np.float32).reshape(32, 32, 3, 3)   # (out, c, h, w)
    f1 = np.transpose(f1, (2, 3, 1, 0)).reshape(3, 3 * 32, 32)    # (h, w*C+c, out)
    f2 = np.transpose(np.asarray(p["f2w"], np.float32), (1, 0))   # (32, 10)
    return {
        "w1": w1, "b1": b1, "w2": w2, "b2": b2, "w3": w3, "b3": b3,
        "p1e": p1e, "p1o": p1o, "p2e": p2e, "p2o": p2o, "p3e": p3e, "p3o": p3o,
        "f1w": jnp.asarray(f1),
        "f1b": jnp.asarray(np.asarray(p["f1b"], np.float32).reshape(1, 32)),
        "f2w": jnp.asarray(f2),
        "f2b": jnp.asarray(np.asarray(p["f2b"], np.float32).reshape(1, 10)),
    }


def init_params(key):
    ks = jax.random.split(key, 10)
    s = 0.15
    return {
        "c1w": jax.random.normal(ks[0], (16, 1, 3, 3), jnp.float32) * s,
        "c1b": jax.random.normal(ks[1], (16,), jnp.float32) * s,
        "c2w": jax.random.normal(ks[2], (32, 16, 3, 3), jnp.float32) * s,
        "c2b": jax.random.normal(ks[3], (32,), jnp.float32) * s,
        "c3w": jax.random.normal(ks[4], (32, 32, 3, 3), jnp.float32) * s,
        "c3b": jax.random.normal(ks[5], (32,), jnp.float32) * s,
        "f1w": jax.random.normal(ks[6], (32, 32 * 3 * 3), jnp.float32) * s,
        "f1b": jax.random.normal(ks[7], (32,), jnp.float32) * s,
        "f2w": jax.random.normal(ks[8], (10, 32), jnp.float32) * s,
        "f2b": jax.random.normal(ks[9], (10,), jnp.float32) * s,
    }


# ----------------------------------------------------------------------------
# Plain-XLA reference of the PyTorch module (for a correctness cross-check)
# ----------------------------------------------------------------------------
def reference_forward(x_nchw, p):
    x = x_nchw.astype(jnp.float32)

    def conv_relu(x, w, b, pad):
        y = lax.conv_general_dilated(
            x, w, window_strides=(1, 1), padding=[(pad, pad), (pad, pad)],
            dimension_numbers=("NCHW", "OIHW", "NCHW"))
        return jax.nn.relu(y + b.reshape(1, -1, 1, 1))

    def pool(x):
        return lax.reduce_window(x, -jnp.inf, lax.max,
                                 (1, 1, 2, 2), (1, 1, 2, 2), "VALID")

    x = pool(conv_relu(x, p["c1w"], p["c1b"], 0))
    x = pool(conv_relu(x, p["c2w"], p["c2b"], 1))
    x = pool(conv_relu(x, p["c3w"], p["c3b"], 1))
    x = x.reshape(x.shape[0], -1)
    x = jax.nn.relu(x @ p["f1w"].T + p["f1b"])
    x = x @ p["f2w"].T + p["f2b"]
    return jax.nn.log_softmax(x, axis=-1)


if __name__ == "__main__":
    key = jax.random.PRNGKey(0)
    k_in, k_par = jax.random.split(key)
    # MNIST geometry is fixed by the module (fc1 expects 32*3*3): 28x28 input.
    x = jax.random.normal(k_in, (2, 1, 28, 28), jnp.float32)
    params = init_params(k_par)
    kparams = prepare_params(params)

    out = jax.block_until_ready(cnn_mnist_forward(x, kparams))
    assert out.shape == (2, 10)
    # rows are valid log-probabilities
    assert jnp.allclose(jnp.sum(jnp.exp(out), axis=1), 1.0, atol=1e-4)
    # cross-check against the plain-XLA reference of the PyTorch module
    ref = jax.block_until_ready(reference_forward(x, params))
    assert float(jnp.max(jnp.abs(out - ref))) < 2e-2
    print("KERNEL_OK")
</pallas_src>

<mosaic_0001>
module attributes {stable_mosaic.version = 11 : i64} {
  func.func @_cnn_mnist_kernel(%arg0: i32, %arg1: memref<2x28x28xf32, #tpu.memory_space<vmem>>, %arg2: memref<2x3x28x208xf32, #tpu.memory_space<vmem>>, %arg3: memref<1x208xf32, #tpu.memory_space<vmem>>, %arg4: memref<2x3x208x192xf32, #tpu.memory_space<vmem>>, %arg5: memref<1x192xf32, #tpu.memory_space<vmem>>, %arg6: memref<2x3x192x96xf32, #tpu.memory_space<vmem>>, %arg7: memref<1x96xf32, #tpu.memory_space<vmem>>, %arg8: memref<15x26xf32, #tpu.memory_space<vmem>>, %arg9: memref<15x26xf32, #tpu.memory_space<vmem>>, %arg10: memref<8x13xf32, #tpu.memory_space<vmem>>, %arg11: memref<8x13xf32, #tpu.memory_space<vmem>>, %arg12: memref<3x6xf32, #tpu.memory_space<vmem>>, %arg13: memref<3x6xf32, #tpu.memory_space<vmem>>, %arg14: memref<3x96x32xf32, #tpu.memory_space<vmem>>, %arg15: memref<1x32xf32, #tpu.memory_space<vmem>>, %arg16: memref<32x10xf32, #tpu.memory_space<vmem>>, %arg17: memref<1x10xf32, #tpu.memory_space<vmem>>, %arg18: memref<2x1x10xf32, #tpu.memory_space<vmem>>) attributes {dimension_semantics = [#tpu.dimension_semantics<parallel>], iteration_bounds = array<i64: 1>, scalar_prefetch = 0 : i64, scratch_operands = 0 : i64, tpu.core_type = #tpu.core_type<tc>, window_params = [{transform_indices = @transform_0, window_bounds = array<i64: 2, 28, 28>}, {pipeline_mode = #tpu.pipeline_mode<synchronous>, transform_indices = @transform_1, window_bounds = array<i64: 2, 3, 28, 208>}, {pipeline_mode = #tpu.pipeline_mode<synchronous>, transform_indices = @transform_2, window_bounds = array<i64: 1, 208>}, {pipeline_mode = #tpu.pipeline_mode<synchronous>, transform_indices = @transform_3, window_bounds = array<i64: 2, 3, 208, 192>}, {pipeline_mode = #tpu.pipeline_mode<synchronous>, transform_indices = @transform_4, window_bounds = array<i64: 1, 192>}, {pipeline_mode = #tpu.pipeline_mode<synchronous>, transform_indices = @transform_5, window_bounds = array<i64: 2, 3, 192, 96>}, {pipeline_mode = #tpu.pipeline_mode<synchronous>, transform_indices = @transform_6, window_bounds = array<i64: 1, 96>}, {pipeline_mode = #tpu.pipeline_mode<synchronous>, transform_indices = @transform_7, window_bounds = array<i64: 15, 26>}, {pipeline_mode = #tpu.pipeline_mode<synchronous>, transform_indices = @transform_8, window_bounds = array<i64: 15, 26>}, {pipeline_mode = #tpu.pipeline_mode<synchronous>, transform_indices = @transform_9, window_bounds = array<i64: 8, 13>}, {pipeline_mode = #tpu.pipeline_mode<synchronous>, transform_indices = @transform_10, window_bounds = array<i64: 8, 13>}, {pipeline_mode = #tpu.pipeline_mode<synchronous>, transform_indices = @transform_11, window_bounds = array<i64: 3, 6>}, {pipeline_mode = #tpu.pipeline_mode<synchronous>, transform_indices = @transform_12, window_bounds = array<i64: 3, 6>}, {pipeline_mode = #tpu.pipeline_mode<synchronous>, transform_indices = @transform_13, window_bounds = array<i64: 3, 96, 32>}, {pipeline_mode = #tpu.pipeline_mode<synchronous>, transform_indices = @transform_14, window_bounds = array<i64: 1, 32>}, {pipeline_mode = #tpu.pipeline_mode<synchronous>, transform_indices = @transform_15, window_bounds = array<i64: 32, 10>}, {pipeline_mode = #tpu.pipeline_mode<synchronous>, transform_indices = @transform_16, window_bounds = array<i64: 1, 10>}, {transform_indices = @transform_17, window_bounds = array<i64: 2, 1, 10>}]} {
    %c0 = arith.constant 0 : index
    %c0_0 = arith.constant 0 : index
    %c0_1 = arith.constant 0 : index
    %c0_2 = arith.constant 0 : index
    %0 = vector.load %arg2[%c0, %c0_0, %c0_1, %c0_2] : memref<2x3x28x208xf32, #tpu.memory_space<vmem>>, vector<1x1x28x208xf32>
    %1 = vector.shape_cast %0 : vector<1x1x28x208xf32> to vector<28x208xf32>
    %c0_3 = arith.constant 0 : index
    %c1 = arith.constant 1 : index
    %c0_4 = arith.constant 0 : index
    %c0_5 = arith.constant 0 : index
    %2 = vector.load %arg2[%c0_3, %c1, %c0_4, %c0_5] : memref<2x3x28x208xf32, #tpu.memory_space<vmem>>, vector<1x1x28x208xf32>
    %3 = vector.shape_cast %2 : vector<1x1x28x208xf32> to vector<28x208xf32>
    %c0_6 = arith.constant 0 : index
    %c2 = arith.constant 2 : index
    %c0_7 = arith.constant 0 : index
    %c0_8 = arith.constant 0 : index
    %4 = vector.load %arg2[%c0_6, %c2, %c0_7, %c0_8] : memref<2x3x28x208xf32, #tpu.memory_space<vmem>>, vector<1x1x28x208xf32>
    %5 = vector.shape_cast %4 : vector<1x1x28x208xf32> to vector<28x208xf32>
    %c1_9 = arith.constant 1 : index
    %c0_10 = arith.constant 0 : index
    %c0_11 = arith.constant 0 : index
    %c0_12 = arith.constant 0 : index
    %6 = vector.load %arg2[%c1_9, %c0_10, %c0_11, %c0_12] : memref<2x3x28x208xf32, #tpu.memory_space<vmem>>, vector<1x1x28x208xf32>
    %7 = vector.shape_cast %6 : vector<1x1x28x208xf32> to vector<28x208xf32>
    %c1_13 = arith.constant 1 : index
    %c1_14 = arith.constant 1 : index
    %c0_15 = arith.constant 0 : index
    %c0_16 = arith.constant 0 : index
    %8 = vector.load %arg2[%c1_13, %c1_14, %c0_15, %c0_16] : memref<2x3x28x208xf32, #tpu.memory_space<vmem>>, vector<1x1x28x208xf32>
    %9 = vector.shape_cast %8 : vector<1x1x28x208xf32> to vector<28x208xf32>
    %c1_17 = arith.constant 1 : index
    %c2_18 = arith.constant 2 : index
    %c0_19 = arith.constant 0 : index
    %c0_20 = arith.constant 0 : index
    %10 = vector.load %arg2[%c1_17, %c2_18, %c0_19, %c0_20] : memref<2x3x28x208xf32, #tpu.memory_space<vmem>>, vector<1x1x28x208xf32>
    %11 = vector.shape_cast %10 : vector<1x1x28x208xf32> to vector<28x208xf32>
    %c0_21 = arith.constant 0 : index
    %c0_22 = arith.constant 0 : index
    %c0_23 = arith.constant 0 : index
    %c0_24 = arith.constant 0 : index
    %12 = vector.load %arg4[%c0_21, %c0_22, %c0_23, %c0_24] : memref<2x3x208x192xf32, #tpu.memory_space<vmem>>, vector<1x1x208x192xf32>
    %13 = vector.shape_cast %12 : vector<1x1x208x192xf32> to vector<208x192xf32>
    %c0_25 = arith.constant 0 : index
    %c1_26 = arith.constant 1 : index
    %c0_27 = arith.constant 0 : index
    %c0_28 = arith.constant 0 : index
    %14 = vector.load %arg4[%c0_25, %c1_26, %c0_27, %c0_28] : memref<2x3x208x192xf32, #tpu.memory_space<vmem>>, vector<1x1x208x192xf32>
    %15 = vector.shape_cast %14 : vector<1x1x208x192xf32> to vector<208x192xf32>
    %c0_29 = arith.constant 0 : index
    %c2_30 = arith.constant 2 : index
    %c0_31 = arith.constant 0 : index
    %c0_32 = arith.constant 0 : index
    %16 = vector.load %arg4[%c0_29, %c2_30, %c0_31, %c0_32] : memref<2x3x208x192xf32, #tpu.memory_space<vmem>>, vector<1x1x208x192xf32>
    %17 = vector.shape_cast %16 : vector<1x1x208x192xf32> to vector<208x192xf32>
    %c1_33 = arith.constant 1 : index
    %c0_34 = arith.constant 0 : index
    %c0_35 = arith.constant 0 : index
    %c0_36 = arith.constant 0 : index
    %18 = vector.load %arg4[%c1_33, %c0_34, %c0_35, %c0_36] : memref<2x3x208x192xf32, #tpu.memory_space<vmem>>, vector<1x1x208x192xf32>
    %19 = vector.shape_cast %18 : vector<1x1x208x192xf32> to vector<208x192xf32>
    %c1_37 = arith.constant 1 : index
    %c1_38 = arith.constant 1 : index
    %c0_39 = arith.constant 0 : index
    %c0_40 = arith.constant 0 : index
    %20 = vector.load %arg4[%c1_37, %c1_38, %c0_39, %c0_40] : memref<2x3x208x192xf32, #tpu.memory_space<vmem>>, vector<1x1x208x192xf32>
    %21 = vector.shape_cast %20 : vector<1x1x208x192xf32> to vector<208x192xf32>
    %c1_41 = arith.constant 1 : index
    %c2_42 = arith.constant 2 : index
    %c0_43 = arith.constant 0 : index
    %c0_44 = arith.constant 0 : index
    %22 = vector.load %arg4[%c1_41, %c2_42, %c0_43, %c0_44] : memref<2x3x208x192xf32, #tpu.memory_space<vmem>>, vector<1x1x208x192xf32>
    %23 = vector.shape_cast %22 : vector<1x1x208x192xf32> to vector<208x192xf32>
    %c0_45 = arith.constant 0 : index
    %c0_46 = arith.constant 0 : index
    %c0_47 = arith.constant 0 : index
    %c0_48 = arith.constant 0 : index
    %24 = vector.load %arg6[%c0_45, %c0_46, %c0_47, %c0_48] : memref<2x3x192x96xf32, #tpu.memory_space<vmem>>, vector<1x1x192x96xf32>
    %25 = vector.shape_cast %24 : vector<1x1x192x96xf32> to vector<192x96xf32>
    %c0_49 = arith.constant 0 : index
    %c1_50 = arith.constant 1 : index
    %c0_51 = arith.constant 0 : index
    %c0_52 = arith.constant 0 : index
    %26 = vector.load %arg6[%c0_49, %c1_50, %c0_51, %c0_52] : memref<2x3x192x96xf32, #tpu.memory_space<vmem>>, vector<1x1x192x96xf32>
    %27 = vector.shape_cast %26 : vector<1x1x192x96xf32> to vector<192x96xf32>
    %c0_53 = arith.constant 0 : index
    %c2_54 = arith.constant 2 : index
    %c0_55 = arith.constant 0 : index
    %c0_56 = arith.constant 0 : index
    %28 = vector.load %arg6[%c0_53, %c2_54, %c0_55, %c0_56] : memref<2x3x192x96xf32, #tpu.memory_space<vmem>>, vector<1x1x192x96xf32>
    %29 = vector.shape_cast %28 : vector<1x1x192x96xf32> to vector<192x96xf32>
    %c1_57 = arith.constant 1 : index
    %c0_58 = arith.constant 0 : index
    %c0_59 = arith.constant 0 : index
    %c0_60 = arith.constant 0 : index
    %30 = vector.load %arg6[%c1_57, %c0_58, %c0_59, %c0_60] : memref<2x3x192x96xf32, #tpu.memory_space<vmem>>, vector<1x1x192x96xf32>
    %31 = vector.shape_cast %30 : vector<1x1x192x96xf32> to vector<192x96xf32>
    %c1_61 = arith.constant 1 : index
    %c1_62 = arith.constant 1 : index
    %c0_63 = arith.constant 0 : index
    %c0_64 = arith.constant 0 : index
    %32 = vector.load %arg6[%c1_61, %c1_62, %c0_63, %c0_64] : memref<2x3x192x96xf32, #tpu.memory_space<vmem>>, vector<1x1x192x96xf32>
    %33 = vector.shape_cast %32 : vector<1x1x192x96xf32> to vector<192x96xf32>
    %c1_65 = arith.constant 1 : index
    %c2_66 = arith.constant 2 : index
    %c0_67 = arith.constant 0 : index
    %c0_68 = arith.constant 0 : index
    %34 = vector.load %arg6[%c1_65, %c2_66, %c0_67, %c0_68] : memref<2x3x192x96xf32, #tpu.memory_space<vmem>>, vector<1x1x192x96xf32>
    %35 = vector.shape_cast %34 : vector<1x1x192x96xf32> to vector<192x96xf32>
    %c0_69 = arith.constant 0 : index
    %c0_70 = arith.constant 0 : index
    %36 = vector.load %arg3[%c0_69, %c0_70] : memref<1x208xf32, #tpu.memory_space<vmem>>, vector<1x208xf32>
    %c0_71 = arith.constant 0 : index
    %c0_72 = arith.constant 0 : index
    %37 = vector.load %arg5[%c0_71, %c0_72] : memref<1x192xf32, #tpu.memory_space<vmem>>, vector<1x192xf32>
    %c0_73 = arith.constant 0 : index
    %c0_74 = arith.constant 0 : index
    %38 = vector.load %arg7[%c0_73, %c0_74] : memref<1x96xf32, #tpu.memory_space<vmem>>, vector<1x96xf32>
    %c0_75 = arith.constant 0 : index
    %c0_76 = arith.constant 0 : index
    %39 = vector.load %arg8[%c0_75, %c0_76] : memref<15x26xf32, #tpu.memory_space<vmem>>, vector<15x26xf32>
    %c0_77 = arith.constant 0 : index
    %c0_78 = arith.constant 0 : index
    %40 = vector.load %arg9[%c0_77, %c0_78] : memref<15x26xf32, #tpu.memory_space<vmem>>, vector<15x26xf32>
    %c0_79 = arith.constant 0 : index
    %c0_80 = arith.constant 0 : index
    %41 = vector.load %arg10[%c0_79, %c0_80] : memref<8x13xf32, #tpu.memory_space<vmem>>, vector<8x13xf32>
    %c0_81 = arith.constant 0 : index
    %c0_82 = arith.constant 0 : index
    %42 = vector.load %arg11[%c0_81, %c0_82] : memref<8x13xf32, #tpu.memory_space<vmem>>, vector<8x13xf32>
    %c0_83 = arith.constant 0 : index
    %c0_84 = arith.constant 0 : index
    %43 = vector.load %arg12[%c0_83, %c0_84] : memref<3x6xf32, #tpu.memory_space<vmem>>, vector<3x6xf32>
    %c0_85 = arith.constant 0 : index
    %c0_86 = arith.constant 0 : index
    %44 = vector.load %arg13[%c0_85, %c0_86] : memref<3x6xf32, #tpu.memory_space<vmem>>, vector<3x6xf32>
    %c0_87 = arith.constant 0 : index
    %c0_88 = arith.constant 0 : index
    %c0_89 = arith.constant 0 : index
    %45 = vector.load %arg14[%c0_87, %c0_88, %c0_89] : memref<3x96x32xf32, #tpu.memory_space<vmem>>, vector<1x96x32xf32>
    %46 = vector.shape_cast %45 : vector<1x96x32xf32> to vector<96x32xf32>
    %c1_90 = arith.constant 1 : index
    %c0_91 = arith.constant 0 : index
    %c0_92 = arith.constant 0 : index
    %47 = vector.load %arg14[%c1_90, %c0_91, %c0_92] : memref<3x96x32xf32, #tpu.memory_space<vmem>>, vector<1x96x32xf32>
    %48 = vector.shape_cast %47 : vector<1x96x32xf32> to vector<96x32xf32>
    %c2_93 = arith.constant 2 : index
    %c0_94 = arith.constant 0 : index
    %c0_95 = arith.constant 0 : index
    %49 = vector.load %arg14[%c2_93, %c0_94, %c0_95] : memref<3x96x32xf32, #tpu.memory_space<vmem>>, vector<1x96x32xf32>
    %50 = vector.shape_cast %49 : vector<1x96x32xf32> to vector<96x32xf32>
    %c0_96 = arith.constant 0 : index
    %c0_97 = arith.constant 0 : index
    %51 = vector.load %arg15[%c0_96, %c0_97] : memref<1x32xf32, #tpu.memory_space<vmem>>, vector<1x32xf32>
    %c0_98 = arith.constant 0 : index
    %c0_99 = arith.constant 0 : index
    %52 = vector.load %arg16[%c0_98, %c0_99] : memref<32x10xf32, #tpu.memory_space<vmem>>, vector<32x10xf32>
    %c0_100 = arith.constant 0 : index
    %c0_101 = arith.constant 0 : index
    %53 = vector.load %arg17[%c0_100, %c0_101] : memref<1x10xf32, #tpu.memory_space<vmem>>, vector<1x10xf32>
    %c0_102 = arith.constant 0 : index
    %c0_103 = arith.constant 0 : index
    %c0_104 = arith.constant 0 : index
    %54 = vector.load %arg1[%c0_102, %c0_103, %c0_104] : memref<2x28x28xf32, #tpu.memory_space<vmem>>, vector<1x28x28xf32>
    %55 = vector.shape_cast %54 : vector<1x28x28xf32> to vector<28x28xf32>
    %56 = vector.extract_strided_slice %55 {offsets = [0, 0], sizes = [26, 28], strides = [1, 1]} : vector<28x28xf32> to vector<26x28xf32>
    %cst = arith.constant dense<0.000000e+00> : vector<26x208xf32>
    %57 = tpu.matmul %56, %1, %cst {dimension_numbers = #tpu.dot_dimension_numbers<[1], [0], [0], [1], [0, 0, 1, 1], [], []>} : vector<26x28xf32>, vector<28x208xf32>, vector<26x208xf32> -> vector<26x208xf32>
    %58 = vector.extract_strided_slice %55 {offsets = [1, 0], sizes = [26, 28], strides = [1, 1]} : vector<28x28xf32> to vector<26x28xf32>
    %cst_105 = arith.constant dense<0.000000e+00> : vector<26x208xf32>
    %59 = tpu.matmul %58, %3, %cst_105 {dimension_numbers = #tpu.dot_dimension_numbers<[1], [0], [0], [1], [0, 0, 1, 1], [], []>} : vector<26x28xf32>, vector<28x208xf32>, vector<26x208xf32> -> vector<26x208xf32>
    %60 = arith.addf %57, %59 : vector<26x208xf32>
    %61 = vector.extract_strided_slice %55 {offsets = [2, 0], sizes = [26, 28], strides = [1, 1]} : vector<28x28xf32> to vector<26x28xf32>
    %cst_106 = arith.constant dense<0.000000e+00> : vector<26x208xf32>
    %62 = tpu.matmul %61, %5, %cst_106 {dimension_numbers = #tpu.dot_dimension_numbers<[1], [0], [0], [1], [0, 0, 1, 1], [], []>} : vector<26x28xf32>, vector<28x208xf32>, vector<26x208xf32> -> vector<26x208xf32>
    %63 = arith.addf %60, %62 : vector<26x208xf32>
    %64 = vector.broadcast %36 : vector<1x208xf32> to vector<26x208xf32>
    %65 = arith.addf %63, %64 : vector<26x208xf32>
    %cst_107 = arith.constant 0.000000e+00 : f32
    %66 = vector.broadcast %cst_107 : f32 to vector<26x208xf32>
    %67 = arith.maximumf %65, %66 : vector<26x208xf32>
    %cst_108 = arith.constant dense<0.000000e+00> : vector<15x208xf32>
    %68 = tpu.matmul %39, %67, %cst_108 {dimension_numbers = #tpu.dot_dimension_numbers<[1], [0], [0], [1], [0, 0, 1, 1], [], []>} : vector<15x26xf32>, vector<26x208xf32>, vector<15x208xf32> -> vector<15x208xf32>
    %cst_109 = arith.constant dense<0.000000e+00> : vector<15x208xf32>
    %69 = tpu.matmul %40, %67, %cst_109 {dimension_numbers = #tpu.dot_dimension_numbers<[1], [0], [0], [1], [0, 0, 1, 1], [], []>} : vector<15x26xf32>, vector<26x208xf32>, vector<15x208xf32> -> vector<15x208xf32>
    %70 = arith.maximumf %68, %69 : vector<15x208xf32>
    %71 = vector.extract_strided_slice %55 {offsets = [0, 0], sizes = [26, 28], strides = [1, 1]} : vector<28x28xf32> to vector<26x28xf32>
    %cst_110 = arith.constant dense<0.000000e+00> : vector<26x208xf32>
    %72 = tpu.matmul %71, %7, %cst_110 {dimension_numbers = #tpu.dot_dimension_numbers<[1], [0], [0], [1], [0, 0, 1, 1], [], []>} : vector<26x28xf32>, vector<28x208xf32>, vector<26x208xf32> -> vector<26x208xf32>
    %73 = vector.extract_strided_slice %55 {offsets = [1, 0], sizes = [26, 28], strides = [1, 1]} : vector<28x28xf32> to vector<26x28xf32>
    %cst_111 = arith.constant dense<0.000000e+00> : vector<26x208xf32>
    %74 = tpu.matmul %73, %9, %cst_111 {dimension_numbers = #tpu.dot_dimension_numbers<[1], [0], [0], [1], [0, 0, 1, 1], [], []>} : vector<26x28xf32>, vector<28x208xf32>, vector<26x208xf32> -> vector<26x208xf32>
    %75 = arith.addf %72, %74 : vector<26x208xf32>
    %76 = vector.extract_strided_slice %55 {offsets = [2, 0], sizes = [26, 28], strides = [1, 1]} : vector<28x28xf32> to vector<26x28xf32>
    %cst_112 = arith.constant dense<0.000000e+00> : vector<26x208xf32>
    %77 = tpu.matmul %76, %11, %cst_112 {dimension_numbers = #tpu.dot_dimension_numbers<[1], [0], [0], [1], [0, 0, 1, 1], [], []>} : vector<26x28xf32>, vector<28x208xf32>, vector<26x208xf32> -> vector<26x208xf32>
    %78 = arith.addf %75, %77 : vector<26x208xf32>
    %79 = vector.broadcast %36 : vector<1x208xf32> to vector<26x208xf32>
    %80 = arith.addf %78, %79 : vector<26x208xf32>
    %cst_113 = arith.constant 0.000000e+00 : f32
    %81 = vector.broadcast %cst_113 : f32 to vector<26x208xf32>
    %82 = arith.maximumf %80, %81 : vector<26x208xf32>
    %cst_114 = arith.constant dense<0.000000e+00> : vector<15x208xf32>
    %83 = tpu.matmul %39, %82, %cst_114 {dimension_numbers = #tpu.dot_dimension_numbers<[1], [0], [0], [1], [0, 0, 1, 1], [], []>} : vector<15x26xf32>, vector<26x208xf32>, vector<15x208xf32> -> vector<15x208xf32>
    %cst_115 = arith.constant dense<0.000000e+00> : vector<15x208xf32>
    %84 = tpu.matmul %40, %82, %cst_115 {dimension_numbers = #tpu.dot_dimension_numbers<[1], [0], [0], [1], [0, 0, 1, 1], [], []>} : vector<15x26xf32>, vector<26x208xf32>, vector<15x208xf32> -> vector<15x208xf32>
    %85 = arith.maximumf %83, %84 : vector<15x208xf32>
    %86 = arith.maximumf %70, %85 : vector<15x208xf32>
    %87 = vector.extract_strided_slice %86 {offsets = [0, 0], sizes = [13, 208], strides = [1, 1]} : vector<15x208xf32> to vector<13x208xf32>
    %cst_116 = arith.constant dense<0.000000e+00> : vector<13x192xf32>
    %88 = tpu.matmul %87, %13, %cst_116 {dimension_numbers = #tpu.dot_dimension_numbers<[1], [0], [0], [1], [0, 0, 1, 1], [], []>} : vector<13x208xf32>, vector<208x192xf32>, vector<13x192xf32> -> vector<13x192xf32>
    %89 = vector.extract_strided_slice %86 {offsets = [1, 0], sizes = [13, 208], strides = [1, 1]} : vector<15x208xf32> to vector<13x208xf32>
    %cst_117 = arith.constant dense<0.000000e+00> : vector<13x192xf32>
    %90 = tpu.matmul %89, %15, %cst_117 {dimension_numbers = #tpu.dot_dimension_numbers<[1], [0], [0], [1], [0, 0, 1, 1], [], []>} : vector<13x208xf32>, vector<208x192xf32>, vector<13x192xf32> -> vector<13x192xf32>
    %91 = arith.addf %88, %90 : vector<13x192xf32>
    %92 = vector.extract_strided_slice %86 {offsets = [2, 0], sizes = [13, 208], strides = [1, 1]} : vector<15x208xf32> to vector<13x208xf32>
    %cst_118 = arith.constant dense<0.000000e+00> : vector<13x192xf32>
    %93 = tpu.matmul %92, %17, %cst_118 {dimension_numbers = #tpu.dot_dimension_numbers<[1], [0], [0], [1], [0, 0, 1, 1], [], []>} : vector<13x208xf32>, vector<208x192xf32>, vector<13x192xf32> -> vector<13x192xf32>
    %94 = arith.addf %91, %93 : vector<13x192xf32>
    %95 = vector.broadcast %37 : vector<1x192xf32> to vector<13x192xf32>
    %96 = arith.addf %94, %95 : vector<13x192xf32>
    %cst_119 = arith.constant 0.000000e+00 : f32
    %97 = vector.broadcast %cst_119 : f32 to vector<13x192xf32>
    %98 = arith.maximumf %96, %97 : vector<13x192xf32>
    %cst_120 = arith.constant dense<0.000000e+00> : vector<8x192xf32>
    %99 = tpu.matmul %41, %98, %cst_120 {dimension_numbers = #tpu.dot_dimension_numbers<[1], [0], [0], [1], [0, 0, 1, 1], [], []>} : vector<8x13xf32>, vector<13x192xf32>, vector<8x192xf32> -> vector<8x192xf32>
    %cst_121 = arith.constant dense<0.000000e+00> : vector<8x192xf32>
    %100 = tpu.matmul %42, %98, %cst_121 {dimension_numbers = #tpu.dot_dimension_numbers<[1], [0], [0], [1], [0, 0, 1, 1], [], []>} : vector<8x13xf32>, vector<13x192xf32>, vector<8x192xf32> -> vector<8x192xf32>
    %101 = arith.maximumf %99, %100 : vector<8x192xf32>
    %102 = vector.extract_strided_slice %86 {offsets = [0, 0], sizes = [13, 208], strides = [1, 1]} : vector<15x208xf32> to vector<13x208xf32>
    %cst_122 = arith.constant dense<0.000000e+00> : vector<13x192xf32>
    %103 = tpu.matmul %102, %19, %cst_122 {dimension_numbers = #tpu.dot_dimension_numbers<[1], [0], [0], [1], [0, 0, 1, 1], [], []>} : vector<13x208xf32>, vector<208x192xf32>, vector<13x192xf32> -> vector<13x192xf32>
    %104 = vector.extract_strided_slice %86 {offsets = [1, 0], sizes = [13, 208], strides = [1, 1]} : vector<15x208xf32> to vector<13x208xf32>
    %cst_123 = arith.constant dense<0.000000e+00> : vector<13x192xf32>
    %105 = tpu.matmul %104, %21, %cst_123 {dimension_numbers = #tpu.dot_dimension_numbers<[1], [0], [0], [1], [0, 0, 1, 1], [], []>} : vector<13x208xf32>, vector<208x192xf32>, vector<13x192xf32> -> vector<13x192xf32>
    %106 = arith.addf %103, %105 : vector<13x192xf32>
    %107 = vector.extract_strided_slice %86 {offsets = [2, 0], sizes = [13, 208], strides = [1, 1]} : vector<15x208xf32> to vector<13x208xf32>
    %cst_124 = arith.constant dense<0.000000e+00> : vector<13x192xf32>
    %108 = tpu.matmul %107, %23, %cst_124 {dimension_numbers = #tpu.dot_dimension_numbers<[1], [0], [0], [1], [0, 0, 1, 1], [], []>} : vector<13x208xf32>, vector<208x192xf32>, vector<13x192xf32> -> vector<13x192xf32>
    %109 = arith.addf %106, %108 : vector<13x192xf32>
    %110 = vector.broadcast %37 : vector<1x192xf32> to vector<13x192xf32>
    %111 = arith.addf %109, %110 : vector<13x192xf32>
    %cst_125 = arith.constant 0.000000e+00 : f32
    %112 = vector.broadcast %cst_125 : f32 to vector<13x192xf32>
    %113 = arith.maximumf %111, %112 : vector<13x192xf32>
    %cst_126 = arith.constant dense<0.000000e+00> : vector<8x192xf32>
    %114 = tpu.matmul %41, %113, %cst_126 {dimension_numbers = #tpu.dot_dimension_numbers<[1], [0], [0], [1], [0, 0, 1, 1], [], []>} : vector<8x13xf32>, vector<13x192xf32>, vector<8x192xf32> -> vector<8x192xf32>
    %cst_127 = arith.constant dense<0.000000e+00> : vector<8x192xf32>
    %115 = tpu.matmul %42, %113, %cst_127 {dimension_numbers = #tpu.dot_dimension_numbers<[1], [0], [0], [1], [0, 0, 1, 1], [], []>} : vector<8x13xf32>, vector<13x192xf32>, vector<8x192xf32> -> vector<8x192xf32>
    %116 = arith.maximumf %114, %115 : vector<8x192xf32>
    %117 = arith.maximumf %101, %116 : vector<8x192xf32>
    %118 = vector.extract_strided_slice %117 {offsets = [0, 0], sizes = [6, 192], strides = [1, 1]} : vector<8x192xf32> to vector<6x192xf32>
    %cst_128 = arith.constant dense<0.000000e+00> : vector<6x96xf32>
    %119 = tpu.matmul %118, %25, %cst_128 {dimension_numbers = #tpu.dot_dimension_numbers<[1], [0], [0], [1], [0, 0, 1, 1], [], []>} : vector<6x192xf32>, vector<192x96xf32>, vector<6x96xf32> -> vector<6x96xf32>
    %120 = vector.extract_strided_slice %117 {offsets = [1, 0], sizes = [6, 192], strides = [1, 1]} : vector<8x192xf32> to vector<6x192xf32>
    %cst_129 = arith.constant dense<0.000000e+00> : vector<6x96xf32>
    %121 = tpu.matmul %120, %27, %cst_129 {dimension_numbers = #tpu.dot_dimension_numbers<[1], [0], [0], [1], [0, 0, 1, 1], [], []>} : vector<6x192xf32>, vector<192x96xf32>, vector<6x96xf32> -> vector<6x96xf32>
    %122 = arith.addf %119, %121 : vector<6x96xf32>
    %123 = vector.extract_strided_slice %117 {offsets = [2, 0], sizes = [6, 192], strides = [1, 1]} : vector<8x192xf32> to vector<6x192xf32>
    %cst_130 = arith.constant dense<0.000000e+00> : vector<6x96xf32>
    %124 = tpu.matmul %123, %29, %cst_130 {dimension_numbers = #tpu.dot_dimension_numbers<[1], [0], [0], [1], [0, 0, 1, 1], [], []>} : vector<6x192xf32>, vector<192x96xf32>, vector<6x96xf32> -> vector<6x96xf32>
    %125 = arith.addf %122, %124 : vector<6x96xf32>
    %126 = vector.broadcast %38 : vector<1x96xf32> to vector<6x96xf32>
    %127 = arith.addf %125, %126 : vector<6x96xf32>
    %cst_131 = arith.constant 0.000000e+00 : f32
    %128 = vector.broadcast %cst_131 : f32 to vector<6x96xf32>
    %129 = arith.maximumf %127, %128 : vector<6x96xf32>
    %cst_132 = arith.constant dense<0.000000e+00> : vector<3x96xf32>
    %130 = tpu.matmul %43, %129, %cst_132 {dimension_numbers = #tpu.dot_dimension_numbers<[1], [0], [0], [1], [0, 0, 1, 1], [], []>} : vector<3x6xf32>, vector<6x96xf32>, vector<3x96xf32> -> vector<3x96xf32>
    %cst_133 = arith.constant dense<0.000000e+00> : vector<3x96xf32>
    %131 = tpu.matmul %44, %129, %cst_133 {dimension_numbers = #tpu.dot_dimension_numbers<[1], [0], [0], [1], [0, 0, 1, 1], [], []>} : vector<3x6xf32>, vector<6x96xf32>, vector<3x96xf32> -> vector<3x96xf32>
    %132 = arith.maximumf %130, %131 : vector<3x96xf32>
    %133 = vector.extract_strided_slice %117 {offsets = [0, 0], sizes = [6, 192], strides = [1, 1]} : vector<8x192xf32> to vector<6x192xf32>
    %cst_134 = arith.constant dense<0.000000e+00> : vector<6x96xf32>
    %134 = tpu.matmul %133, %31, %cst_134 {dimension_numbers = #tpu.dot_dimension_numbers<[1], [0], [0], [1], [0, 0, 1, 1], [], []>} : vector<6x192xf32>, vector<192x96xf32>, vector<6x96xf32> -> vector<6x96xf32>
    %135 = vector.extract_strided_slice %117 {offsets = [1, 0], sizes = [6, 192], strides = [1, 1]} : vector<8x192xf32> to vector<6x192xf32>
    %cst_135 = arith.constant dense<0.000000e+00> : vector<6x96xf32>
    %136 = tpu.matmul %135, %33, %cst_135 {dimension_numbers = #tpu.dot_dimension_numbers<[1], [0], [0], [1], [0, 0, 1, 1], [], []>} : vector<6x192xf32>, vector<192x96xf32>, vector<6x96xf32> -> vector<6x96xf32>
    %137 = arith.addf %134, %136 : vector<6x96xf32>
    %138 = vector.extract_strided_slice %117 {offsets = [2, 0], sizes = [6, 192], strides = [1, 1]} : vector<8x192xf32> to vector<6x192xf32>
    %cst_136 = arith.constant dense<0.000000e+00> : vector<6x96xf32>
    %139 = tpu.matmul %138, %35, %cst_136 {dimension_numbers = #tpu.dot_dimension_numbers<[1], [0], [0], [1], [0, 0, 1, 1], [], []>} : vector<6x192xf32>, vector<192x96xf32>, vector<6x96xf32> -> vector<6x96xf32>
    %140 = arith.addf %137, %139 : vector<6x96xf32>
    %141 = vector.broadcast %38 : vector<1x96xf32> to vector<6x96xf32>
    %142 = arith.addf %140, %141 : vector<6x96xf32>
    %cst_137 = arith.constant 0.000000e+00 : f32
    %143 = vector.broadcast %cst_137 : f32 to vector<6x96xf32>
    %144 = arith.maximumf %142, %143 : vector<6x96xf32>
    %cst_138 = arith.constant dense<0.000000e+00> : vector<3x96xf32>
    %145 = tpu.matmul %43, %144, %cst_138 {dimension_numbers = #tpu.dot_dimension_numbers<[1], [0], [0], [1], [0, 0, 1, 1], [], []>} : vector<3x6xf32>, vector<6x96xf32>, vector<3x96xf32> -> vector<3x96xf32>
    %cst_139 = arith.constant dense<0.000000e+00> : vector<3x96xf32>
    %146 = tpu.matmul %44, %144, %cst_139 {dimension_numbers = #tpu.dot_dimension_numbers<[1], [0], [0], [1], [0, 0, 1, 1], [], []>} : vector<3x6xf32>, vector<6x96xf32>, vector<3x96xf32> -> vector<3x96xf32>
    %147 = arith.maximumf %145, %146 : vector<3x96xf32>
    %148 = arith.maximumf %132, %147 : vector<3x96xf32>
    %149 = vector.extract_strided_slice %148 {offsets = [0, 0], sizes = [1, 96], strides = [1, 1]} : vector<3x96xf32> to vector<1x96xf32>
    %cst_140 = arith.constant dense<0.000000e+00> : vector<1x32xf32>
    %150 = tpu.matmul %149, %46, %cst_140 {dimension_numbers = #tpu.dot_dimension_numbers<[1], [0], [0], [1], [0, 0, 1, 1], [], []>} : vector<1x96xf32>, vector<96x32xf32>, vector<1x32xf32> -> vector<1x32xf32>
    %151 = vector.extract_strided_slice %148 {offsets = [1, 0], sizes = [1, 96], strides = [1, 1]} : vector<3x96xf32> to vector<1x96xf32>
    %cst_141 = arith.constant dense<0.000000e+00> : vector<1x32xf32>
    %152 = tpu.matmul %151, %48, %cst_141 {dimension_numbers = #tpu.dot_dimension_numbers<[1], [0], [0], [1], [0, 0, 1, 1], [], []>} : vector<1x96xf32>, vector<96x32xf32>, vector<1x32xf32> -> vector<1x32xf32>
    %153 = arith.addf %150, %152 : vector<1x32xf32>
    %154 = vector.extract_strided_slice %148 {offsets = [2, 0], sizes = [1, 96], strides = [1, 1]} : vector<3x96xf32> to vector<1x96xf32>
    %cst_142 = arith.constant dense<0.000000e+00> : vector<1x32xf32>
    %155 = tpu.matmul %154, %50, %cst_142 {dimension_numbers = #tpu.dot_dimension_numbers<[1], [0], [0], [1], [0, 0, 1, 1], [], []>} : vector<1x96xf32>, vector<96x32xf32>, vector<1x32xf32> -> vector<1x32xf32>
    %156 = arith.addf %153, %155 : vector<1x32xf32>
    %157 = arith.addf %156, %51 : vector<1x32xf32>
    %cst_143 = arith.constant 0.000000e+00 : f32
    %158 = vector.broadcast %cst_143 : f32 to vector<1x32xf32>
    %159 = arith.maximumf %157, %158 : vector<1x32xf32>
    %cst_144 = arith.constant dense<0.000000e+00> : vector<1x10xf32>
    %160 = tpu.matmul %159, %52, %cst_144 {dimension_numbers = #tpu.dot_dimension_numbers<[1], [0], [0], [1], [0, 0, 1, 1], [], []>} : vector<1x32xf32>, vector<32x10xf32>, vector<1x10xf32> -> vector<1x10xf32>
    %161 = arith.addf %160, %53 : vector<1x10xf32>
    %cst_145 = arith.constant dense<0xFF800000> : vector<1xf32>
    %162 = vector.multi_reduction <maximumf>, %161, %cst_145 [1] : vector<1x10xf32> to vector<1xf32>
    %163 = vector.shape_cast %162 : vector<1xf32> to vector<1x1xf32>
    %164 = vector.broadcast %163 : vector<1x1xf32> to vector<1x10xf32>
    %165 = arith.subf %161, %164 : vector<1x10xf32>
    %166 = math.exp %165 : vector<1x10xf32>
    %cst_146 = arith.constant dense<0.000000e+00> : vector<1xf32>
    %167 = vector.multi_reduction <add>, %166, %cst_146 [1] : vector<1x10xf32> to vector<1xf32>
    %168 = vector.shape_cast %167 : vector<1xf32> to vector<1x1xf32>
    %169 = math.log %168 : vector<1x1xf32>
    %170 = vector.broadcast %169 : vector<1x1xf32> to vector<1x10xf32>
    %171 = arith.subf %165, %170 : vector<1x10xf32>
    %c0_147 = arith.constant 0 : index
    %c0_148 = arith.constant 0 : index
    %c0_149 = arith.constant 0 : index
    %172 = vector.load %arg18[%c0_147, %c0_148, %c0_149] : memref<2x1x10xf32, #tpu.memory_space<vmem>>, vector<1x1x10xf32>
    %173 = vector.shape_cast %172 : vector<1x1x10xf32> to vector<1x10xf32>
    %174 = vector.shape_cast %171 : vector<1x10xf32> to vector<1x1x10xf32>
    tpu.vector_store %arg18[%c0_147, %c0_148, %c0_149], %174 {strides = array<i32>} : memref<2x1x10xf32, #tpu.memory_space<vmem>>, vector<1x1x10xf32>,
    %c1_150 = arith.constant 1 : index
    %c0_151 = arith.constant 0 : index
    %c0_152 = arith.constant 0 : index
    %175 = vector.load %arg1[%c1_150, %c0_151, %c0_152] : memref<2x28x28xf32, #tpu.memory_space<vmem>>, vector<1x28x28xf32>
    %176 = vector.shape_cast %175 : vector<1x28x28xf32> to vector<28x28xf32>
    %177 = vector.extract_strided_slice %176 {offsets = [0, 0], sizes = [26, 28], strides = [1, 1]} : vector<28x28xf32> to vector<26x28xf32>
    %cst_153 = arith.constant dense<0.000000e+00> : vector<26x208xf32>
    %178 = tpu.matmul %177, %1, %cst_153 {dimension_numbers = #tpu.dot_dimension_numbers<[1], [0], [0], [1], [0, 0, 1, 1], [], []>} : vector<26x28xf32>, vector<28x208xf32>, vector<26x208xf32> -> vector<26x208xf32>
    %179 = vector.extract_strided_slice %176 {offsets = [1, 0], sizes = [26, 28], strides = [1, 1]} : vector<28x28xf32> to vector<26x28xf32>
    %cst_154 = arith.constant dense<0.000000e+00> : vector<26x208xf32>
    %180 = tpu.matmul %179, %3, %cst_154 {dimension_numbers = #tpu.dot_dimension_numbers<[1], [0], [0], [1], [0, 0, 1, 1], [], []>} : vector<26x28xf32>, vector<28x208xf32>, vector<26x208xf32> -> vector<26x208xf32>
    %181 = arith.addf %178, %180 : vector<26x208xf32>
    %182 = vector.extract_strided_slice %176 {offsets = [2, 0], sizes = [26, 28], strides = [1, 1]} : vector<28x28xf32> to vector<26x28xf32>
    %cst_155 = arith.constant dense<0.000000e+00> : vector<26x208xf32>
    %183 = tpu.matmul %182, %5, %cst_155 {dimension_numbers = #tpu.dot_dimension_numbers<[1], [0], [0], [1], [0, 0, 1, 1], [], []>} : vector<26x28xf32>, vector<28x208xf32>, vector<26x208xf32> -> vector<26x208xf32>
    %184 = arith.addf %181, %183 : vector<26x208xf32>
    %185 = vector.broadcast %36 : vector<1x208xf32> to vector<26x208xf32>
    %186 = arith.addf %184, %185 : vector<26x208xf32>
    %cst_156 = arith.constant 0.000000e+00 : f32
    %187 = vector.broadcast %cst_156 : f32 to vector<26x208xf32>
    %188 = arith.maximumf %186, %187 : vector<26x208xf32>
    %cst_157 = arith.constant dense<0.000000e+00> : vector<15x208xf32>
    %189 = tpu.matmul %39, %188, %cst_157 {dimension_numbers = #tpu.dot_dimension_numbers<[1], [0], [0], [1], [0, 0, 1, 1], [], []>} : vector<15x26xf32>, vector<26x208xf32>, vector<15x208xf32> -> vector<15x208xf32>
    %cst_158 = arith.constant dense<0.000000e+00> : vector<15x208xf32>
    %190 = tpu.matmul %40, %188, %cst_158 {dimension_numbers = #tpu.dot_dimension_numbers<[1], [0], [0], [1], [0, 0, 1, 1], [], []>} : vector<15x26xf32>, vector<26x208xf32>, vector<15x208xf32> -> vector<15x208xf32>
    %191 = arith.maximumf %189, %190 : vector<15x208xf32>
    %192 = vector.extract_strided_slice %176 {offsets = [0, 0], sizes = [26, 28], strides = [1, 1]} : vector<28x28xf32> to vector<26x28xf32>
    %cst_159 = arith.constant dense<0.000000e+00> : vector<26x208xf32>
    %193 = tpu.matmul %192, %7, %cst_159 {dimension_numbers = #tpu.dot_dimension_numbers<[1], [0], [0], [1], [0, 0, 1, 1], [], []>} : vector<26x28xf32>, vector<28x208xf32>, vector<26x208xf32> -> vector<26x208xf32>
    %194 = vector.extract_strided_slice %176 {offsets = [1, 0], sizes = [26, 28], strides = [1, 1]} : vector<28x28xf32> to vector<26x28xf32>
    %cst_160 = arith.constant dense<0.000000e+00> : vector<26x208xf32>
    %195 = tpu.matmul %194, %9, %cst_160 {dimension_numbers = #tpu.dot_dimension_numbers<[1], [0], [0], [1], [0, 0, 1, 1], [], []>} : vector<26x28xf32>, vector<28x208xf32>, vector<26x208xf32> -> vector<26x208xf32>
    %196 = arith.addf %193, %195 : vector<26x208xf32>
    %197 = vector.extract_strided_slice %176 {offsets = [2, 0], sizes = [26, 28], strides = [1, 1]} : vector<28x28xf32> to vector<26x28xf32>
    %cst_161 = arith.constant dense<0.000000e+00> : vector<26x208xf32>
    %198 = tpu.matmul %197, %11, %cst_161 {dimension_numbers = #tpu.dot_dimension_numbers<[1], [0], [0], [1], [0, 0, 1, 1], [], []>} : vector<26x28xf32>, vector<28x208xf32>, vector<26x208xf32> -> vector<26x208xf32>
    %199 = arith.addf %196, %198 : vector<26x208xf32>
    %200 = vector.broadcast %36 : vector<1x208xf32> to vector<26x208xf32>
    %201 = arith.addf %199, %200 : vector<26x208xf32>
    %cst_162 = arith.constant 0.000000e+00 : f32
    %202 = vector.broadcast %cst_162 : f32 to vector<26x208xf32>
    %203 = arith.maximumf %201, %202 : vector<26x208xf32>
    %cst_163 = arith.constant dense<0.000000e+00> : vector<15x208xf32>
    %204 = tpu.matmul %39, %203, %cst_163 {dimension_numbers = #tpu.dot_dimension_numbers<[1], [0], [0], [1], [0, 0, 1, 1], [], []>} : vector<15x26xf32>, vector<26x208xf32>, vector<15x208xf32> -> vector<15x208xf32>
    %cst_164 = arith.constant dense<0.000000e+00> : vector<15x208xf32>
    %205 = tpu.matmul %40, %203, %cst_164 {dimension_numbers = #tpu.dot_dimension_numbers<[1], [0], [0], [1], [0, 0, 1, 1], [], []>} : vector<15x26xf32>, vector<26x208xf32>, vector<15x208xf32> -> vector<15x208xf32>
    %206 = arith.maximumf %204, %205 : vector<15x208xf32>
    %207 = arith.maximumf %191, %206 : vector<15x208xf32>
    %208 = vector.extract_strided_slice %207 {offsets = [0, 0], sizes = [13, 208], strides = [1, 1]} : vector<15x208xf32> to vector<13x208xf32>
    %cst_165 = arith.constant dense<0.000000e+00> : vector<13x192xf32>
    %209 = tpu.matmul %208, %13, %cst_165 {dimension_numbers = #tpu.dot_dimension_numbers<[1], [0], [0], [1], [0, 0, 1, 1], [], []>} : vector<13x208xf32>, vector<208x192xf32>, vector<13x192xf32> -> vector<13x192xf32>
    %210 = vector.extract_strided_slice %207 {offsets = [1, 0], sizes = [13, 208], strides = [1, 1]} : vector<15x208xf32> to vector<13x208xf32>
    %cst_166 = arith.constant dense<0.000000e+00> : vector<13x192xf32>
    %211 = tpu.matmul %210, %15, %cst_166 {dimension_numbers = #tpu.dot_dimension_numbers<[1], [0], [0], [1], [0, 0, 1, 1], [], []>} : vector<13x208xf32>, vector<208x192xf32>, vector<13x192xf32> -> vector<13x192xf32>
    %212 = arith.addf %209, %211 : vector<13x192xf32>
    %213 = vector.extract_strided_slice %207 {offsets = [2, 0], sizes = [13, 208], strides = [1, 1]} : vector<15x208xf32> to vector<13x208xf32>
    %cst_167 = arith.constant dense<0.000000e+00> : vector<13x192xf32>
    %214 = tpu.matmul %213, %17, %cst_167 {dimension_numbers = #tpu.dot_dimension_numbers<[1], [0], [0], [1], [0, 0, 1, 1], [], []>} : vector<13x208xf32>, vector<208x192xf32>, vector<13x192xf32> -> vector<13x192xf32>
    %215 = arith.addf %212, %214 : vector<13x192xf32>
    %216 = vector.broadcast %37 : vector<1x192xf32> to vector<13x192xf32>
    %217 = arith.addf %215, %216 : vector<13x192xf32>
    %cst_168 = arith.constant 0.000000e+00 : f32
    %218 = vector.broadcast %cst_168 : f32 to vector<13x192xf32>
    %219 = arith.maximumf %217, %218 : vector<13x192xf32>
    %cst_169 = arith.constant dense<0.000000e+00> : vector<8x192xf32>
    %220 = tpu.matmul %41, %219, %cst_169 {dimension_numbers = #tpu.dot_dimension_numbers<[1], [0], [0], [1], [0, 0, 1, 1], [], []>} : vector<8x13xf32>, vector<13x192xf32>, vector<8x192xf32> -> vector<8x192xf32>
    %cst_170 = arith.constant dense<0.000000e+00> : vector<8x192xf32>
    %221 = tpu.matmul %42, %219, %cst_170 {dimension_numbers = #tpu.dot_dimension_numbers<[1], [0], [0], [1], [0, 0, 1, 1], [], []>} : vector<8x13xf32>, vector<13x192xf32>, vector<8x192xf32> -> vector<8x192xf32>
    %222 = arith.maximumf %220, %221 : vector<8x192xf32>
    %223 = vector.extract_strided_slice %207 {offsets = [0, 0], sizes = [13, 208], strides = [1, 1]} : vector<15x208xf32> to vector<13x208xf32>
    %cst_171 = arith.constant dense<0.000000e+00> : vector<13x192xf32>
    %224 = tpu.matmul %223, %19, %cst_171 {dimension_numbers = #tpu.dot_dimension_numbers<[1], [0], [0], [1], [0, 0, 1, 1], [], []>} : vector<13x208xf32>, vector<208x192xf32>, vector<13x192xf32> -> vector<13x192xf32>
    %225 = vector.extract_strided_slice %207 {offsets = [1, 0], sizes = [13, 208], strides = [1, 1]} : vector<15x208xf32> to vector<13x208xf32>
    %cst_172 = arith.constant dense<0.000000e+00> : vector<13x192xf32>
    %226 = tpu.matmul %225, %21, %cst_172 {dimension_numbers = #tpu.dot_dimension_numbers<[1], [0], [0], [1], [0, 0, 1, 1], [], []>} : vector<13x208xf32>, vector<208x192xf32>, vector<13x192xf32> -> vector<13x192xf32>
    %227 = arith.addf %224, %226 : vector<13x192xf32>
    %228 = vector.extract_strided_slice %207 {offsets = [2, 0], sizes = [13, 208], strides = [1, 1]} : vector<15x208xf32> to vector<13x208xf32>
    %cst_173 = arith.constant dense<0.000000e+00> : vector<13x192xf32>
    %229 = tpu.matmul %228, %23, %cst_173 {dimension_numbers = #tpu.dot_dimension_numbers<[1], [0], [0], [1], [0, 0, 1, 1], [], []>} : vector<13x208xf32>, vector<208x192xf32>, vector<13x192xf32> -> vector<13x192xf32>
    %230 = arith.addf %227, %229 : vector<13x192xf32>
    %231 = vector.broadcast %37 : vector<1x192xf32> to vector<13x192xf32>
    %232 = arith.addf %230, %231 : vector<13x192xf32>
    %cst_174 = arith.constant 0.000000e+00 : f32
    %233 = vector.broadcast %cst_174 : f32 to vector<13x192xf32>
    %234 = arith.maximumf %232, %233 : vector<13x192xf32>
    %cst_175 = arith.constant dense<0.000000e+00> : vector<8x192xf32>
    %235 = tpu.matmul %41, %234, %cst_175 {dimension_numbers = #tpu.dot_dimension_numbers<[1], [0], [0], [1], [0, 0, 1, 1], [], []>} : vector<8x13xf32>, vector<13x192xf32>, vector<8x192xf32> -> vector<8x192xf32>
    %cst_176 = arith.constant dense<0.000000e+00> : vector<8x192xf32>
    %236 = tpu.matmul %42, %234, %cst_176 {dimension_numbers = #tpu.dot_dimension_numbers<[1], [0], [0], [1], [0, 0, 1, 1], [], []>} : vector<8x13xf32>, vector<13x192xf32>, vector<8x192xf32> -> vector<8x192xf32>
    %237 = arith.maximumf %235, %236 : vector<8x192xf32>
    %238 = arith.maximumf %222, %237 : vector<8x192xf32>
    %239 = vector.extract_strided_slice %238 {offsets = [0, 0], sizes = [6, 192], strides = [1, 1]} : vector<8x192xf32> to vector<6x192xf32>
    %cst_177 = arith.constant dense<0.000000e+00> : vector<6x96xf32>
    %240 = tpu.matmul %239, %25, %cst_177 {dimension_numbers = #tpu.dot_dimension_numbers<[1], [0], [0], [1], [0, 0, 1, 1], [], []>} : vector<6x192xf32>, vector<192x96xf32>, vector<6x96xf32> -> vector<6x96xf32>
    %241 = vector.extract_strided_slice %238 {offsets = [1, 0], sizes = [6, 192], strides = [1, 1]} : vector<8x192xf32> to vector<6x192xf32>
    %cst_178 = arith.constant dense<0.000000e+00> : vector<6x96xf32>
    %242 = tpu.matmul %241, %27, %cst_178 {dimension_numbers = #tpu.dot_dimension_numbers<[1], [0], [0], [1], [0, 0, 1, 1], [], []>} : vector<6x192xf32>, vector<192x96xf32>, vector<6x96xf32> -> vector<6x96xf32>
    %243 = arith.addf %240, %242 : vector<6x96xf32>
    %244 = vector.extract_strided_slice %238 {offsets = [2, 0], sizes = [6, 192], strides = [1, 1]} : vector<8x192xf32> to vector<6x192xf32>
    %cst_179 = arith.constant dense<0.000000e+00> : vector<6x96xf32>
    %245 = tpu.matmul %244, %29, %cst_179 {dimension_numbers = #tpu.dot_dimension_numbers<[1], [0], [0], [1], [0, 0, 1, 1], [], []>} : vector<6x192xf32>, vector<192x96xf32>, vector<6x96xf32> -> vector<6x96xf32>
    %246 = arith.addf %243, %245 : vector<6x96xf32>
    %247 = vector.broadcast %38 : vector<1x96xf32> to vector<6x96xf32>
    %248 = arith.addf %246, %247 : vector<6x96xf32>
    %cst_180 = arith.constant 0.000000e+00 : f32
    %249 = vector.broadcast %cst_180 : f32 to vector<6x96xf32>
    %250 = arith.maximumf %248, %249 : vector<6x96xf32>
    %cst_181 = arith.constant dense<0.000000e+00> : vector<3x96xf32>
    %251 = tpu.matmul %43, %250, %cst_181 {dimension_numbers = #tpu.dot_dimension_numbers<[1], [0], [0], [1], [0, 0, 1, 1], [], []>} : vector<3x6xf32>, vector<6x96xf32>, vector<3x96xf32> -> vector<3x96xf32>
    %cst_182 = arith.constant dense<0.000000e+00> : vector<3x96xf32>
    %252 = tpu.matmul %44, %250, %cst_182 {dimension_numbers = #tpu.dot_dimension_numbers<[1], [0], [0], [1], [0, 0, 1, 1], [], []>} : vector<3x6xf32>, vector<6x96xf32>, vector<3x96xf32> -> vector<3x96xf32>
    %253 = arith.maximumf %251, %252 : vector<3x96xf32>
    %254 = vector.extract_strided_slice %238 {offsets = [0, 0], sizes = [6, 192], strides = [1, 1]} : vector<8x192xf32> to vector<6x192xf32>
    %cst_183 = arith.constant dense<0.000000e+00> : vector<6x96xf32>
    %255 = tpu.matmul %254, %31, %cst_183 {dimension_numbers = #tpu.dot_dimension_numbers<[1], [0], [0], [1], [0, 0, 1, 1], [], []>} : vector<6x192xf32>, vector<192x96xf32>, vector<6x96xf32> -> vector<6x96xf32>
    %256 = vector.extract_strided_slice %238 {offsets = [1, 0], sizes = [6, 192], strides = [1, 1]} : vector<8x192xf32> to vector<6x192xf32>
    %cst_184 = arith.constant dense<0.000000e+00> : vector<6x96xf32>
    %257 = tpu.matmul %256, %33, %cst_184 {dimension_numbers = #tpu.dot_dimension_numbers<[1], [0], [0], [1], [0, 0, 1, 1], [], []>} : vector<6x192xf32>, vector<192x96xf32>, vector<6x96xf32> -> vector<6x96xf32>
    %258 = arith.addf %255, %257 : vector<6x96xf32>
    %259 = vector.extract_strided_slice %238 {offsets = [2, 0], sizes = [6, 192], strides = [1, 1]} : vector<8x192xf32> to vector<6x192xf32>
    %cst_185 = arith.constant dense<0.000000e+00> : vector<6x96xf32>
    %260 = tpu.matmul %259, %35, %cst_185 {dimension_numbers = #tpu.dot_dimension_numbers<[1], [0], [0], [1], [0, 0, 1, 1], [], []>} : vector<6x192xf32>, vector<192x96xf32>, vector<6x96xf32> -> vector<6x96xf32>
    %261 = arith.addf %258, %260 : vector<6x96xf32>
    %262 = vector.broadcast %38 : vector<1x96xf32> to vector<6x96xf32>
    %263 = arith.addf %261, %262 : vector<6x96xf32>
    %cst_186 = arith.constant 0.000000e+00 : f32
    %264 = vector.broadcast %cst_186 : f32 to vector<6x96xf32>
    %265 = arith.maximumf %263, %264 : vector<6x96xf32>
    %cst_187 = arith.constant dense<0.000000e+00> : vector<3x96xf32>
    %266 = tpu.matmul %43, %265, %cst_187 {dimension_numbers = #tpu.dot_dimension_numbers<[1], [0], [0], [1], [0, 0, 1, 1], [], []>} : vector<3x6xf32>, vector<6x96xf32>, vector<3x96xf32> -> vector<3x96xf32>
    %cst_188 = arith.constant dense<0.000000e+00> : vector<3x96xf32>
    %267 = tpu.matmul %44, %265, %cst_188 {dimension_numbers = #tpu.dot_dimension_numbers<[1], [0], [0], [1], [0, 0, 1, 1], [], []>} : vector<3x6xf32>, vector<6x96xf32>, vector<3x96xf32> -> vector<3x96xf32>
    %268 = arith.maximumf %266, %267 : vector<3x96xf32>
    %269 = arith.maximumf %253, %268 : vector<3x96xf32>
    %270 = vector.extract_strided_slice %269 {offsets = [0, 0], sizes = [1, 96], strides = [1, 1]} : vector<3x96xf32> to vector<1x96xf32>
    %cst_189 = arith.constant dense<0.000000e+00> : vector<1x32xf32>
    %271 = tpu.matmul %270, %46, %cst_189 {dimension_numbers = #tpu.dot_dimension_numbers<[1], [0], [0], [1], [0, 0, 1, 1], [], []>} : vector<1x96xf32>, vector<96x32xf32>, vector<1x32xf32> -> vector<1x32xf32>
    %272 = vector.extract_strided_slice %269 {offsets = [1, 0], sizes = [1, 96], strides = [1, 1]} : vector<3x96xf32> to vector<1x96xf32>
    %cst_190 = arith.constant dense<0.000000e+00> : vector<1x32xf32>
    %273 = tpu.matmul %272, %48, %cst_190 {dimension_numbers = #tpu.dot_dimension_numbers<[1], [0], [0], [1], [0, 0, 1, 1], [], []>} : vector<1x96xf32>, vector<96x32xf32>, vector<1x32xf32> -> vector<1x32xf32>
    %274 = arith.addf %271, %273 : vector<1x32xf32>
    %275 = vector.extract_strided_slice %269 {offsets = [2, 0], sizes = [1, 96], strides = [1, 1]} : vector<3x96xf32> to vector<1x96xf32>
    %cst_191 = arith.constant dense<0.000000e+00> : vector<1x32xf32>
    %276 = tpu.matmul %275, %50, %cst_191 {dimension_numbers = #tpu.dot_dimension_numbers<[1], [0], [0], [1], [0, 0, 1, 1], [], []>} : vector<1x96xf32>, vector<96x32xf32>, vector<1x32xf32> -> vector<1x32xf32>
    %277 = arith.addf %274, %276 : vector<1x32xf32>
    %278 = arith.addf %277, %51 : vector<1x32xf32>
    %cst_192 = arith.constant 0.000000e+00 : f32
    %279 = vector.broadcast %cst_192 : f32 to vector<1x32xf32>
    %280 = arith.maximumf %278, %279 : vector<1x32xf32>
    %cst_193 = arith.constant dense<0.000000e+00> : vector<1x10xf32>
    %281 = tpu.matmul %280, %52, %cst_193 {dimension_numbers = #tpu.dot_dimension_numbers<[1], [0], [0], [1], [0, 0, 1, 1], [], []>} : vector<1x32xf32>, vector<32x10xf32>, vector<1x10xf32> -> vector<1x10xf32>
    %282 = arith.addf %281, %53 : vector<1x10xf32>
    %cst_194 = arith.constant dense<0xFF800000> : vector<1xf32>
    %283 = vector.multi_reduction <maximumf>, %282, %cst_194 [1] : vector<1x10xf32> to vector<1xf32>
    %284 = vector.shape_cast %283 : vector<1xf32> to vector<1x1xf32>
    %285 = vector.broadcast %284 : vector<1x1xf32> to vector<1x10xf32>
    %286 = arith.subf %282, %285 : vector<1x10xf32>
    %287 = math.exp %286 : vector<1x10xf32>
    %cst_195 = arith.constant dense<0.000000e+00> : vector<1xf32>
    %288 = vector.multi_reduction <add>, %287, %cst_195 [1] : vector<1x10xf32> to vector<1xf32>
    %289 = vector.shape_cast %288 : vector<1xf32> to vector<1x1xf32>
    %290 = math.log %289 : vector<1x1xf32>
    %291 = vector.broadcast %290 : vector<1x1xf32> to vector<1x10xf32>
    %292 = arith.subf %286, %291 : vector<1x10xf32>
    %c1_196 = arith.constant 1 : index
    %c0_197 = arith.constant 0 : index
    %c0_198 = arith.constant 0 : index
    %293 = vector.load %arg18[%c1_196, %c0_197, %c0_198] : memref<2x1x10xf32, #tpu.memory_space<vmem>>, vector<1x1x10xf32>
    %294 = vector.shape_cast %293 : vector<1x1x10xf32> to vector<1x10xf32>
    %295 = vector.shape_cast %292 : vector<1x10xf32> to vector<1x1x10xf32>
    tpu.vector_store %arg18[%c1_196, %c0_197, %c0_198], %295 {strides = array<i32>} : memref<2x1x10xf32, #tpu.memory_space<vmem>>, vector<1x1x10xf32>,
    return
  }
  func.func @transform_0(%arg0: i32) -> (i32, i32, i32) {
    %c0_i32 = arith.constant 0 : i32
    %c0_i32_0 = arith.constant 0 : i32
    %c0_i32_1 = arith.constant 0 : i32
    return %arg0, %c0_i32, %c0_i32_0 : i32, i32, i32
  }
  func.func @transform_1(%arg0: i32) -> (i32, i32, i32, i32) {
    %c0_i32 = arith.constant 0 : i32
    %c0_i32_0 = arith.constant 0 : i32
    %c0_i32_1 = arith.constant 0 : i32
    %c0_i32_2 = arith.constant 0 : i32
    %c0_i32_3 = arith.constant 0 : i32
    return %c0_i32, %c0_i32_0, %c0_i32_1, %c0_i32_2 : i32, i32, i32, i32
  }
  func.func @transform_2(%arg0: i32) -> (i32, i32) {
    %c0_i32 = arith.constant 0 : i32
    %c0_i32_0 = arith.constant 0 : i32
    %c0_i32_1 = arith.constant 0 : i32
    return %c0_i32, %c0_i32_0 : i32, i32
  }
  func.func @transform_3(%arg0: i32) -> (i32, i32, i32, i32) {
    %c0_i32 = arith.constant 0 : i32
    %c0_i32_0 = arith.constant 0 : i32
    %c0_i32_1 = arith.constant 0 : i32
    %c0_i32_2 = arith.constant 0 : i32
    %c0_i32_3 = arith.constant 0 : i32
    return %c0_i32, %c0_i32_0, %c0_i32_1, %c0_i32_2 : i32, i32, i32, i32
  }
  func.func @transform_4(%arg0: i32) -> (i32, i32) {
    %c0_i32 = arith.constant 0 : i32
    %c0_i32_0 = arith.constant 0 : i32
    %c0_i32_1 = arith.constant 0 : i32
    return %c0_i32, %c0_i32_0 : i32, i32
  }
  func.func @transform_5(%arg0: i32) -> (i32, i32, i32, i32) {
    %c0_i32 = arith.constant 0 : i32
    %c0_i32_0 = arith.constant 0 : i32
    %c0_i32_1 = arith.constant 0 : i32
    %c0_i32_2 = arith.constant 0 : i32
    %c0_i32_3 = arith.constant 0 : i32
    return %c0_i32, %c0_i32_0, %c0_i32_1, %c0_i32_2 : i32, i32, i32, i32
  }
  func.func @transform_6(%arg0: i32) -> (i32, i32) {
    %c0_i32 = arith.constant 0 : i32
    %c0_i32_0 = arith.constant 0 : i32
    %c0_i32_1 = arith.constant 0 : i32
    return %c0_i32, %c0_i32_0 : i32, i32
  }
  func.func @transform_7(%arg0: i32) -> (i32, i32) {
    %c0_i32 = arith.constant 0 : i32
    %c0_i32_0 = arith.constant 0 : i32
    %c0_i32_1 = arith.constant 0 : i32
    return %c0_i32, %c0_i32_0 : i32, i32
  }
  func.func @transform_8(%arg0: i32) -> (i32, i32) {
    %c0_i32 = arith.constant 0 : i32
    %c0_i32_0 = arith.constant 0 : i32
    %c0_i32_1 = arith.constant 0 : i32
    return %c0_i32, %c0_i32_0 : i32, i32
  }
  func.func @transform_9(%arg0: i32) -> (i32, i32) {
    %c0_i32 = arith.constant 0 : i32
    %c0_i32_0 = arith.constant 0 : i32
    %c0_i32_1 = arith.constant 0 : i32
    return %c0_i32, %c0_i32_0 : i32, i32
  }
  func.func @transform_10(%arg0: i32) -> (i32, i32) {
    %c0_i32 = arith.constant 0 : i32
    %c0_i32_0 = arith.constant 0 : i32
    %c0_i32_1 = arith.constant 0 : i32
    return %c0_i32, %c0_i32_0 : i32, i32
  }
  func.func @transform_11(%arg0: i32) -> (i32, i32) {
    %c0_i32 = arith.constant 0 : i32
    %c0_i32_0 = arith.constant 0 : i32
    %c0_i32_1 = arith.constant 0 : i32
    return %c0_i32, %c0_i32_0 : i32, i32
  }
  func.func @transform_12(%arg0: i32) -> (i32, i32) {
    %c0_i32 = arith.constant 0 : i32
    %c0_i32_0 = arith.constant 0 : i32
    %c0_i32_1 = arith.constant 0 : i32
    return %c0_i32, %c0_i32_0 : i32, i32
  }
  func.func @transform_13(%arg0: i32) -> (i32, i32, i32) {
    %c0_i32 = arith.constant 0 : i32
    %c0_i32_0 = arith.constant 0 : i32
    %c0_i32_1 = arith.constant 0 : i32
    %c0_i32_2 = arith.constant 0 : i32
    return %c0_i32, %c0_i32_0, %c0_i32_1 : i32, i32, i32
  }
  func.func @transform_14(%arg0: i32) -> (i32, i32) {
    %c0_i32 = arith.constant 0 : i32
    %c0_i32_0 = arith.constant 0 : i32
    %c0_i32_1 = arith.constant 0 : i32
    return %c0_i32, %c0_i32_0 : i32, i32
  }
  func.func @transform_15(%arg0: i32) -> (i32, i32) {
    %c0_i32 = arith.constant 0 : i32
    %c0_i32_0 = arith.constant 0 : i32
    %c0_i32_1 = arith.constant 0 : i32
    return %c0_i32, %c0_i32_0 : i32, i32
  }
  func.func @transform_16(%arg0: i32) -> (i32, i32) {
    %c0_i32 = arith.constant 0 : i32
    %c0_i32_0 = arith.constant 0 : i32
    %c0_i32_1 = arith.constant 0 : i32
    return %c0_i32, %c0_i32_0 : i32, i32
  }
  func.func @transform_17(%arg0: i32) -> (i32, i32, i32) {
    %c0_i32 = arith.constant 0 : i32
    %c0_i32_0 = arith.constant 0 : i32
    %c0_i32_1 = arith.constant 0 : i32
    return %arg0, %c0_i32, %c0_i32_0 : i32, i32, i32
  }
}

</mosaic_0001>

<bundles_post_ra>
// kernel: cnn_mnist_forward.1
= control target key start
LH: loop header
LB: loop body
LE: loop exit
PB: predicated region body
PF: predicated region fallthrough
CT: control target
= control target key end

     0   :  { %s12964_s0 = inlined_call_operand.vmem [shape: f32[2,28,28], index: 0, kind: input, shape index: {}]   ;;  %s12965_s1 = inlined_call_operand.vmem [shape: f32[2,3,28,208], index: 1, kind: input, shape index: {}]   ;;  %s12966_s2 = inlined_call_operand.vmem [shape: f32[1,208], index: 2, kind: input, shape index: {}]   ;;  %s12967_s3 = inlined_call_operand.vmem [shape: f32[2,3,208,192], index: 3, kind: input, shape index: {}]   ;;  %s12968_s4 = inlined_call_operand.vmem [shape: f32[1,192], index: 4, kind: input, shape index: {}]   ;;  %s12969_s5 = inlined_call_operand.vmem [shape: f32[2,3,192,96], index: 5, kind: input, shape index: {}]   ;;  %s12970_s6 = inlined_call_operand.vmem [shape: f32[1,96], index: 6, kind: input, shape index: {}]   ;;  %s12971_s7 = inlined_call_operand.vmem [shape: f32[15,26], index: 7, kind: input, shape index: {}]   ;;  %s12972_s8 = inlined_call_operand.vmem [shape: f32[15,26], index: 8, kind: input, shape index: {}]   ;;  %s12973_s9 = inlined_call_operand.vmem [shape: f32[8,13], index: 9, kind: input, shape index: {}]   ;;  %s12974_s10 = inlined_call_operand.vmem [shape: f32[8,13], index: 10, kind: input, shape index: {}]   ;;  %s12975_s11 = inlined_call_operand.vmem [shape: f32[3,6], index: 11, kind: input, shape index: {}]   ;;  %s12976_s12 = inlined_call_operand.vmem [shape: f32[3,6], index: 12, kind: input, shape index: {}]   ;;  %s12977_s13 = inlined_call_operand.vmem [shape: f32[3,96,32], index: 13, kind: input, shape index: {}]   ;;  %s12978_s14 = inlined_call_operand.vmem [shape: f32[1,32], index: 14, kind: input, shape index: {}]   ;;  %s12979_s15 = inlined_call_operand.vmem [shape: f32[32,10], index: 15, kind: input, shape index: {}]   ;;  %s12980_s16 = inlined_call_operand.vmem [shape: f32[1,10], index: 16, kind: input, shape index: {}]   ;;  %s12981_s17 = inlined_call_operand.hbm [shape: f32[2,1,10], index: 17, kind: output, shape index: {}]  }
   0x1   :  { %13231 = sst [smem:[#allocation242_spill]] %s12964_s0 }
   0x2   :  { %13232 = sst [smem:[#allocation243_spill]] %s12965_s1 }
   0x3   :  { %s13233_s26 = sld [smem:[#allocation243_spill]]  ;;  %vm656_vm0 = vcmask 1043456   ;;  %v12986_v7 = vmov 0.0   ;;  %vm8921_vm1 = vmmov 1   ;;  %s13236_s29 = sld [smem:[#allocation242_spill]]  ;;  %vm639_vm3 = vcmask 1046528  }
   0x4   :  { %727 = vmatprep.mubr.f32.mxu0 %v12986_v7  ;;  %1079 = vmatprep.mubr.f32.mxu1 %v12986_v7  ;;  %vm9044_vm2 = vmpackc.low %vm656_vm0, %vm8921_vm1  ;;  %vm647_vm4 = vcmask 228352  }
   0x9   :  { %v6386_v0 = vld [vmem:[%s13233_s26 + $0x48] sm:$0xff]  ;;  %v6388_v1 = vld [vmem:[%s13233_s26 + $0x58] sm:$0xff]  ;;  %v6385_v2 = vld [vmem:[%s13233_s26 + $0x40] sm:$0xff] }
   0xa   :  { %v9026_v3 = vpack.c.bf16 %v6388_v1, %v6386_v0  ;;  %v6387_v4 = vld [vmem:[%s13233_s26 + $0x50] sm:$0xff]  ;;  %v6390_v5 = vld [vmem:[%s13233_s26 + $0x68] sm:$0xff]  ;;  %v6392_v6 = vld [vmem:[%s13233_s26 + $0x78] sm:$0xf] }
   0xb   :  { %v9039_v8 = vpack.c.bf16 %v6387_v4, %v6385_v2  ;;  %v9041_v9 = vpack.c.bf16 %v6392_v6, %v6390_v5  ;;  %v6389_v11 = vld [vmem:[%s13233_s26 + $0x60] sm:$0xff]  ;;  %v6391_v12 = vld [vmem:[%s13233_s26 + $0x70] sm:$0xf]  ;;  %v9063_v14 = vld [vmem:[%s13236_s29 + $0x8] sm:$0xff] }
   0xc   :  { %7351 = vmatprep.subr.bf16.mxu0 %v9026_v3  ;;  %v9058_v13 = vld [vmem:[%s13236_s29] sm:$0xff]  ;;  %v9066_v15 = vpack.c.bf16 %v6391_v12, %v6389_v11  ;;  %v641_v17 = vrot.slane %v9063_v14, 1  ;;  %v9073_v18 = vld [vmem:[%s13236_s29 + $0x10] sm:$0xff]  ;;  %v58_v19 = vld [vmem:[%s13233_s26 + $0x8] sm:$0xff] }
   0xd   :  { %7353 = vmatpush1.bf16.msra.mxu0 %v9039_v8  ;;  %v640_v16 = vrot.slane %v9058_v13, 1  ;;  %v60_v20 = vld [vmem:[%s13233_s26 + $0x18] sm:$0xff]  ;;  %v57_v21 = vld [vmem:[%s13233_s26] sm:$0xff]  ;;  %v59_v22 = vld [vmem:[%s13233_s26 + $0x10] sm:$0xff]  ;;  %v643_v27 = vrot.slane %v9073_v18, 1 }
   0xe   :  { %7356 = vmatprep.subr.msk.bf16.mxu0 %vm9044_vm2, %v9041_v9  ;;  %v9090_v23 = vpack.c.bf16 %v60_v20, %v58_v19  ;;  %v62_v24 = vld [vmem:[%s13233_s26 + $0x28] sm:$0xff]  ;;  %v64_v25 = vld [vmem:[%s13233_s26 + $0x38] sm:$0xf]  ;;  %v9105_v28 = vpack.c.bf16 %v59_v22, %v57_v21  ;;  %v61_v31 = vld [vmem:[%s13233_s26 + $0x20] sm:$0xff] }
   0xf   :  { %v9102_v26 = vsel %vm639_vm3, %v640_v16, %v641_v17  ;;  %v9110_v29 = vld [vmem:[%s13236_s29 + $0x18] sm:$0xf]  ;;  %v9113_v30 = vpack.c.bf16 %v64_v25, %v62_v24  ;;  %v63_v32 = vld [vmem:[%s13233_s26 + $0x30] sm:$0xf]  ;;  %v6394_v33 = vld [vmem:[%s13233_s26 + $0x88] sm:$0xff] }
  0x10   :  { %v6396_v34 = vld [vmem:[%s13233_s26 + $0x98] sm:$0xff] }
  0x11   :  { %7359 = vmatpush1.bf16.msk.msra.mxu0 %vm9044_vm2, %v9066_v15 }
  0x12   :  { %7361 = vmatprep.subr.bf16.mxu0 %v9090_v23 }
  0x13   :  { %22 = vsyncpa [#allocation3], 0  ;;  %v9131_v35 = vsel %vm639_vm3, %v641_v17, %v643_v27  ;;  %v9134_v36 = vrot.slane %v9110_v29, 1  ;;  %v9137_v37 = vpack.c.bf16 %v63_v32, %v61_v31  ;;  %v9142_v38 = vpack.c.bf16 %v6396_v34, %v6394_v33  ;;  %v6393_v40 = vld [vmem:[%s13233_s26 + $0x80] sm:$0xff]  ;;  %v6395_v41 = vld [vmem:[%s13233_s26 + $0x90] sm:$0xff] }
  0x14   :  { %6831 = vmatmul.mubr.msk.f32.vlgmr.msra.gmra.mrb[0].mxu0 %vm647_vm4, %v9102_v26  ;;  %v6398_v42 = vld [vmem:[%s13233_s26 + $0xa8] sm:$0xff]  ;;  %v6400_v43 = vld [vmem:[%s13233_s26 + $0xb8] sm:$0xf]  ;;  %v9173_v44 = vpack.c.bf16 %v6395_v41, %v6393_v40  ;;  %v6397_v46 = vld [vmem:[%s13233_s26 + $0xa0] sm:$0xff]  ;;  %v856_v49 = vrot.slane %v9058_v13, 2  ;;  %v857_v50 = vrot.slane %v9063_v14, 2  ;;  %v975_v56 = vlaneseq }
  0x15   :  { %733 = vmatprep.mubr.f32.mxu0 %v12986_v7  ;;  %7363 = vmatpush1.bf16.msra.mxu0 %v9105_v28  ;;  %v9149_v39 = vsel %vm639_vm3, %v643_v27, %v9134_v36  ;;  %v9175_v45 = vpack.c.bf16 %v6400_v43, %v6398_v42  ;;  %v6399_v47 = vld [vmem:[%s13233_s26 + $0xb0] sm:$0xf]  ;;  %vm855_vm5 = vcmask 1045504   ;;  %v859_v52 = vrot.slane %v9073_v18, 2  ;;  %v576_v59 = vld [vmem:[%s12966_s2] sm:$0x3] }
  0x16   :  { %7366 = vmatprep.subr.msk.bf16.mxu0 %vm9044_vm2, %v9113_v30  ;;  %v9187_v48 = vpack.c.bf16 %v6399_v47, %v6397_v46  ;;  %v9207_v51 = vsel %vm855_vm5, %v856_v49, %v857_v50  ;;  %v9217_v54 = vrot.slane %v9110_v29, 2  ;;  %v9232_v57 = vshrl.u32 %v975_v56, 7  ;;  %v6412_v56 = vld [vmem:[%s13233_s26 + $0x118] sm:$0xff] }
  0x17   :  { %v9214_v53 = vsel %vm855_vm5, %v857_v50, %v859_v52  ;;  %vm1008_vm6 = vcmask 1041408   ;;  %v9267_v50 = vld [vmem:[%s12971_s7] sm:$0xff]  ;;  %vm1001_vm8 = vcmask 211968   ;;  %vm1668_vm9 = vcmask 654336  }
  0x18   :  { %6832 = vmatmul.mubr.msk.f32.gmra.mrb[2].mxu0 %vm647_vm4, %v9131_v35  ;;  %v9224_v55 = vsel %vm855_vm5, %v859_v52, %v9217_v54  ;;  %v12985_v58 = vsub.s32 0, %v9232_v57  ;;  %v12984_v60 = vsub.s32 1, %v9232_v57  ;;  %vm9256_vm7 = vmpackc.low %vm1008_vm6, %vm8921_vm1  ;;  %v6410_v52 = vld [vmem:[%s13233_s26 + $0x108] sm:$0xff]  ;;  %vm1947_vm10 = vcmask 1044480  }
  0x19   :  { %739 = vmatprep.mubr.f32.mxu0 %v12986_v7  ;;  %7369 = vmatpush1.bf16.msk.msra.mxu0 %vm9044_vm2, %v9137_v37  ;;  %vm10302_vm11 = vmpackc.low %vm1947_vm10, %vm8921_vm1  ;;  %vm1943_vm12 = vcmask 105472   ;;  %vm2501_vm13 = vcmask 523264   ;;  %vm8923_vm14 = vmmov 0   ;;  %vm2730_vm15 = vcmask 48128  }
  0x1a   :  { %7371 = vmatprep.subr.bf16.mxu0 %v9142_v38  ;;  %v9241_v61 = vrot.slane %v576_v59, %v12985_v58  ;;  %v9245_v63 = vrot.slane %v576_v59, %v12984_v60  ;;  %v9281_v59 = vld [vmem:[%s12971_s7 + $0x8] sm:$0x7f]  ;;  %vm3241_vm0 = vcmask 785408   ;;  %vm3462_vm1 = vcmask 261120  }
  0x1b   :  { %vm3536_vm6 = vcmask 73728  }
  0x1c   :  { %6833 = vmatmul.mubr.msk.f32.gmra.mrb[4].mxu0 %vm647_vm4, %v9149_v39 }
  0x1d   :  { %745 = vmatprep.mubr.f32.mxu0 %v12986_v7 }
  0x20   :  { %6834 = vmatmul.mubr.msk.f32.gmra.mrb[6].mxu0 %vm647_vm4, %v9134_v36 }
  0x21   :  { %830 = vmatprep.mubr.f32.mxu0 %v12986_v7 }
  0x24   :  { %6837 = vmatmul.mubr.msk.f32.vlgmr.msra.gmra.mrb[0].mxu0 %vm647_vm4, %v9058_v13 }
  0x25   :  { %836 = vmatprep.mubr.f32.mxu0 %v12986_v7  ;;  %7373 = vmatpush1.bf16.msra.mxu0 %v9173_v44 }
  0x26   :  { %7376 = vmatprep.subr.msk.bf16.mxu0 %vm9044_vm2, %v9175_v45 }
  0x28   :  { %6838 = vmatmul.mubr.msk.f32.gmra.mrb[2].mxu0 %vm647_vm4, %v9063_v14 }
  0x29   :  { %842 = vmatprep.mubr.f32.mxu0 %v12986_v7  ;;  %7379 = vmatpush1.bf16.msk.msra.mxu0 %vm9044_vm2, %v9187_v48 }
  0x2c   :  { %6839 = vmatmul.mubr.msk.f32.gmra.mrb[4].mxu0 %vm647_vm4, %v9073_v18 }
  0x2d   :  { %848 = vmatprep.mubr.f32.mxu0 %v12986_v7 }
  0x30   :  { %6840 = vmatmul.mubr.msk.f32.gmra.mrb[6].mxu0 %vm647_vm4, %v9110_v29 }
  0x31   :  { %941 = vmatprep.mubr.f32.mxu0 %v12986_v7 }
  0x34   :  { %6843 = vmatmul.mubr.msk.f32.vlgmr.msra.gmra.mrb[0].mxu0 %vm647_vm4, %v9207_v51 }
  0x35   :  { %947 = vmatprep.mubr.f32.mxu0 %v12986_v7 }
  0x38   :  { %6844 = vmatmul.mubr.msk.f32.gmra.mrb[2].mxu0 %vm647_vm4, %v9214_v53 }
  0x39   :  { %953 = vmatprep.mubr.f32.mxu0 %v12986_v7 }
  0x3c   :  { %6845 = vmatmul.mubr.msk.f32.gmra.mrb[4].mxu0 %vm647_vm4, %v9224_v55 }
  0x3d   :  { %959 = vmatprep.mubr.f32.mxu0 %v12986_v7 }
  0x40   :  { %6846 = vmatmul.mubr.msk.f32.gmra.mrb[6].mxu0 %vm647_vm4, %v9217_v54 }
  0x41   :  { %1558 = vmatprep.mubr.f32.mxu0 %v12986_v7 }
 0x107   :  { %v943_v62 = vpop.f32.mrb[0].mxu0 }
 0x108   :  { %v945_v0 = vpop.f32.mrb[1].mxu0  ;;  %v985_v1 = vadd.f32 %v9241_v61, %v943_v62  ;;  %v9285_v62 = vpack.c.bf16 %v6412_v56, %v6410_v52  ;;  %v6424_v52 = vld [vmem:[%s13233_s26 + $0x178] sm:$0xf] }
 0x109   :  { %v986_v2 = vadd.f32 %v9245_v63, %v945_v0  ;;  %v6409_v0 = vld [vmem:[%s13233_s26 + $0x100] sm:$0xff] }
 0x10a   :  { %v993_v12 = vmax.f32 %v985_v1, 0.0  ;;  %v6411_v1 = vld [vmem:[%s13233_s26 + $0x110] sm:$0xff] }
 0x10b   :  { %v949_v4 = vpop.f32.mrb[2].mxu0  ;;  %v994_v17 = vmax.f32 %v986_v2, 0.0  ;;  %v6414_v2 = vld [vmem:[%s13233_s26 + $0x128] sm:$0xff] }
 0x10c   :  { %v987_v5 = vadd.f32 %v9241_v61, %v949_v4  ;;  %v951_v6 = vpop.f32.mrb[3].mxu0  ;;  %v6416_v4 = vld [vmem:[%s13233_s26 + $0x138] sm:$0xf] }
 0x10d   :  { %v988_v11 = vadd.f32 %v9245_v63, %v951_v6  ;;  %v9309_v6 = vpack.c.bf16 %v6411_v1, %v6409_v0  ;;  %v6421_v0 = vld [vmem:[%s13233_s26 + $0x160] sm:$0xff]  ;;  %v6423_v1 = vld [vmem:[%s13233_s26 + $0x170] sm:$0xf] }
 0x10e   :  { %v995_v16 = vmax.f32 %v987_v5, 0.0  ;;  %v9307_v5 = vld [vmem:[%s12972_s8] sm:$0xff] }
 0x10f   :  { %v996_v19 = vmax.f32 %v988_v11, 0.0  ;;  %v955_v20 = vpop.f32.mrb[4].mxu0  ;;  %v9312_v11 = vpack.c.bf16 %v6416_v4, %v6414_v2  ;;  %v6429_v4 = vld [vmem:[%s12967_s3 + $0x1c0] sm:$0xff] }
 0x110   :  { %v957_v21 = vpop.f32.mrb[5].mxu0  ;;  %v7382_v22 = vpack.c.bf16 %v995_v16, %v993_v12  ;;  %v989_v25 = vadd.f32 %v9241_v61, %v955_v20  ;;  %v6413_v12 = vld [vmem:[%s13233_s26 + $0x120] sm:$0xff]  ;;  %v6415_v16 = vld [vmem:[%s13233_s26 + $0x130] sm:$0xf]  ;;  %v9333_v20 = vld [vmem:[%s12972_s8 + $0x8] sm:$0x7f] }
 0x111   :  { %v7380_v24 = vpack.c.bf16 %v996_v19, %v994_v17  ;;  %v990_v27 = vadd.f32 %v9245_v63, %v957_v21  ;;  %v6402_v17 = vld [vmem:[%s13233_s26 + $0xc8] sm:$0xff]  ;;  %v6404_v19 = vld [vmem:[%s13233_s26 + $0xd8] sm:$0xff]  ;;  %v9335_v21 = vpack.c.bf16 %v6415_v16, %v6413_v12  ;;  %v6431_v12 = vld [vmem:[%s12967_s3 + $0x1d0] sm:$0xff] }
 0x112   :  { %v997_v40 = vmax.f32 %v989_v25, 0.0  ;;  %v6403_v25 = vld [vmem:[%s13233_s26 + $0xd0] sm:$0xff]  ;;  %v6434_v16 = vld [vmem:[%s12967_s3 + $0x1e8] sm:$0xff] }
 0x113   :  { %v961_v31 = vpop.f32.mrb[6].mxu0  ;;  %7381 = vmatprep.subr.bf16.mxu1 %v7380_v24  ;;  %v998_v42 = vmax.f32 %v990_v27, 0.0  ;;  %v6406_v27 = vld [vmem:[%s13233_s26 + $0xe8] sm:$0xff] }
 0x114   :  { %v991_v32 = vadd.f32 %v9241_v61, %v961_v31  ;;  %v963_v33 = vpop.f32.mrb[7].mxu0  ;;  %7383 = vmatpush1.bf16.msra.mxu1 %v7382_v22  ;;  %v6408_v31 = vld [vmem:[%s13233_s26 + $0xf8] sm:$0xf] }
 0x115   :  { %v992_v34 = vadd.f32 %v9245_v63, %v963_v33  ;;  %v9363_v33 = vpack.c.bf16 %v6408_v31, %v6406_v27  ;;  %v6435_v27 = vld [vmem:[%s12967_s3 + $0x1f0] sm:$0xff]  ;;  %v6438_v31 = vld [vmem:[%s12967_s3 + $0x208] sm:$0xff] }
 0x116   :  { %v999_v41 = vmax.f32 %v991_v32, 0.0 }
 0x117   :  { %v1000_v43 = vmax.f32 %v992_v34, 0.0  ;;  %v6405_v34 = vld [vmem:[%s13233_s26 + $0xe0] sm:$0xff] }
 0x118   :  { %v7387_v46 = vpack.c.bf16 %v999_v41, %v997_v40  ;;  %v6407_v40 = vld [vmem:[%s13233_s26 + $0xf0] sm:$0xf]  ;;  %v6418_v41 = vld [vmem:[%s13233_s26 + $0x148] sm:$0xff] }
 0x119   :  { %v7384_v49 = vpack.c.bf16 %v1000_v43, %v998_v42  ;;  %v6420_v42 = vld [vmem:[%s13233_s26 + $0x158] sm:$0xff]  ;;  %v9381_v43 = vpack.c.bf16 %v6407_v40, %v6405_v34 }
 0x11a   :  { %v6440_v34 = vld [vmem:[%s12967_s3 + $0x218] sm:$0xff] }
 0x11b   :  { %7386 = vmatprep.subr.msk.bf16.mxu1 %vm9256_vm7, %v7384_v49 }
 0x11c   :  { %7389 = vmatpush1.bf16.msk.msra.mxu1 %vm9256_vm7, %v7387_v46 }
 0x11d   :  { %7391 = vmatprep.subr.bf16.mxu1 %v7380_v24  ;;  %v6401_v24 = vld [vmem:[%s13233_s26 + $0xc0] sm:$0xff] }
 0x11e   :  { %v9360_v32 = vpack.c.bf16 %v6403_v25, %v6401_v24  ;;  %v6433_v25 = vld [vmem:[%s12967_s3 + $0x1e0] sm:$0xff] }
 0x11f   :  { %6849 = vmatmul.mubr.msk.f32.vlgmr.msra.gmra.mrb[0].mxu1 %vm1001_vm8, %v9267_v50  ;;  %v9511_v40 = vpack.c.bf16 %v6435_v27, %v6433_v25  ;;  %v6449_v27 = vld [vmem:[%s12967_s3 + $0x260] sm:$0xff] }
 0x120   :  { %7393 = vmatpush1.bf16.msra.mxu1 %v7382_v22  ;;  %1085 = vmatprep.mubr.f32.mxu1 %v12986_v7  ;;  %v9340_v22 = vpack.c.bf16 %v6404_v19, %v6402_v17  ;;  %v6436_v17 = vld [vmem:[%s12967_s3 + $0x1f8] sm:$0xff]  ;;  %v9493_v19 = vpack.c.bf16 %v6431_v12, %v6429_v4  ;;  %v6447_v4 = vld [vmem:[%s12967_s3 + $0x250] sm:$0xff]  ;;  %v6450_v12 = vld [vmem:[%s12967_s3 + $0x268] sm:$0xff] }
 0x121   :  { %7396 = vmatprep.subr.msk.bf16.mxu1 %vm9256_vm7, %v7384_v49  ;;  %v6422_v49 = vld [vmem:[%s13233_s26 + $0x168] sm:$0xff]  ;;  %v9496_v24 = vpack.c.bf16 %v6436_v17, %v6434_v16  ;;  %13240 = vst [vmem:[#allocation6_spill] sm:$0xff] %v9511_v40  ;;  %v6452_v16 = vld [vmem:[%s12967_s3 + $0x278] sm:$0xff] }
 0x122   :  { %v9415_v56 = vpack.c.bf16 %v6424_v52, %v6422_v49  ;;  %v6444_v49 = vld [vmem:[%s12967_s3 + $0x238] sm:$0xff]  ;;  %v9568_v25 = vpack.c.bf16 %v6452_v16, %v6450_v12 }
 0x123   :  { %6850 = vmatmul.mubr.msk.f32.gmra.mrb[2].mxu1 %vm1001_vm8, %v9281_v59  ;;  %13239 = vst [vmem:[#allocation5_spill] sm:$0xff] %v9496_v24 }
 0x124   :  { %7399 = vmatpush1.bf16.msk.msra.mxu1 %vm9256_vm7, %v7387_v46  ;;  %1162 = vmatprep.mubr.f32.mxu1 %v12986_v7  ;;  %v9386_v46 = vpack.c.bf16 %v6420_v42, %v6418_v41  ;;  %v9514_v41 = vpack.c.bf16 %v6440_v34, %v6438_v31  ;;  %v6437_v42 = vld [vmem:[%s12967_s3 + $0x200] sm:$0xff]  ;;  %13247 = vst [vmem:[#allocation13_spill] sm:$0xff] %v9568_v25  ;;  %v6451_v31 = vld [vmem:[%s12967_s3 + $0x270] sm:$0xff]  ;;  %v6454_v34 = vld [vmem:[%s12967_s3 + $0x288] sm:$0xff] }
 0x125   :  { %7401 = vmatprep.subr.bf16.mxu1 %v9285_v62 }
 0x126   :  { %13241 = vst [vmem:[#allocation7_spill] sm:$0xff] %v9514_v41 }
 0x127   :  { %6853 = vmatmul.mubr.msk.f32.vlgmr.msra.gmra.mrb[4].mxu1 %vm1001_vm8, %v9307_v5 }
 0x128   :  { %7403 = vmatpush1.bf16.msra.mxu1 %v9309_v6  ;;  %1168 = vmatprep.mubr.f32.mxu1 %v12986_v7 }
 0x129   :  { %7406 = vmatprep.subr.msk.bf16.mxu1 %vm9044_vm2, %v9312_v11 }
 0x12b   :  { %6854 = vmatmul.mubr.msk.f32.gmra.mrb[6].mxu1 %vm1001_vm8, %v9333_v20 }
 0x12c   :  { %7409 = vmatpush1.bf16.msk.msra.mxu1 %vm9044_vm2, %v9335_v21  ;;  %1249 = vmatprep.mubr.f32.mxu1 %v12986_v7 }
 0x12d   :  { %7411 = vmatprep.subr.bf16.mxu1 %v9340_v22  ;;  %v13495_v47 = vld [vmem:[#allocation7_spill] sm:$0xff] }
 0x12f   :  { %6857 = vmatmul.mubr.msk.f32.vlgmr.msra.gmra.mrb[8].mxu1 %vm647_vm4, %v9102_v26  ;;  %v6417_v26 = vld [vmem:[%s13233_s26 + $0x140] sm:$0xff] }
 0x130   :  { %1255 = vmatprep.mubr.f32.mxu1 %v12986_v7  ;;  %7413 = vmatpush1.bf16.msra.mxu1 %v9360_v32 }
 0x131   :  { %7416 = vmatprep.subr.msk.bf16.mxu1 %vm9044_vm2, %v9363_v33 }
 0x133   :  { %6858 = vmatmul.mubr.msk.f32.gmra.mrb[10].mxu1 %vm647_vm4, %v9131_v35  ;;  %v6419_v35 = vld [vmem:[%s13233_s26 + $0x150] sm:$0xff] }
 0x134   :  { %1261 = vmatprep.mubr.f32.mxu1 %v12986_v7  ;;  %7419 = vmatpush1.bf16.msk.msra.mxu1 %vm9044_vm2, %v9381_v43 }
 0x135   :  { %7421 = vmatprep.subr.bf16.mxu1 %v9386_v46 }
 0x137   :  { %6859 = vmatmul.mubr.msk.f32.gmra.mrb[12].mxu1 %vm647_vm4, %v9149_v39  ;;  %v9413_v39 = vpack.c.bf16 %v6419_v35, %v6417_v26  ;;  %v6439_v26 = vld [vmem:[%s12967_s3 + $0x210] sm:$0xff]  ;;  %v6442_v35 = vld [vmem:[%s12967_s3 + $0x228] sm:$0xff] }
 0x138   :  { %1267 = vmatprep.mubr.f32.mxu1 %v12986_v7  ;;  %v9529_v52 = vpack.c.bf16 %v6439_v26, %v6437_v42  ;;  %v6456_v42 = vld [vmem:[%s12967_s3 + $0x298] sm:$0xff]  ;;  %v9583_v26 = vpack.c.bf16 %v6451_v31, %v6449_v27 }
 0x13a   :  { %13242 = vst [vmem:[#allocation8_spill] sm:$0xff] %v9529_v52  ;;  %13248 = vst [vmem:[#allocation14_spill] sm:$0xff] %v9583_v26 }
 0x13b   :  { %6860 = vmatmul.mubr.msk.f32.gmra.mrb[14].mxu1 %vm647_vm4, %v9134_v36  ;;  %v9427_v36 = vpack.c.bf16 %v6423_v1, %v6421_v0  ;;  %v9532_v0 = vpack.c.bf16 %v6444_v49, %v6442_v35  ;;  %v6441_v1 = vld [vmem:[%s12967_s3 + $0x220] sm:$0xff]  ;;  %v9586_v35 = vpack.c.bf16 %v6456_v42, %v6454_v34 }
 0x13c   :  { %1344 = vmatprep.mubr.f32.mxu1 %v12986_v7  ;;  %v6453_v49 = vld [vmem:[%s12967_s3 + $0x280] sm:$0xff] }
 0x13d   :  { %13243 = vst [vmem:[#allocation9_spill] sm:$0xff] %v9532_v0  ;;  %13249 = vst [vmem:[#allocation15_spill] sm:$0xff] %v9586_v35 }
 0x13f   :  { %6863 = vmatmul.mubr.msk.f32.vlgmr.msra.gmra.mrb[8].mxu1 %vm647_vm4, %v9058_v13  ;;  %v6426_v13 = vld [vmem:[%s12967_s3 + $0x1a8] sm:$0xff] }
 0x140   :  { %1350 = vmatprep.mubr.f32.mxu1 %v12986_v7  ;;  %7423 = vmatpush1.bf16.msra.mxu1 %v9413_v39 }
 0x141   :  { %7426 = vmatprep.subr.msk.bf16.mxu1 %vm9044_vm2, %v9415_v56 }
 0x143   :  { %6864 = vmatmul.mubr.msk.f32.gmra.mrb[10].mxu1 %vm647_vm4, %v9063_v14  ;;  %v6428_v14 = vld [vmem:[%s12967_s3 + $0x1b8] sm:$0xff] }
 0x144   :  { %1356 = vmatprep.mubr.f32.mxu1 %v12986_v7  ;;  %7429 = vmatpush1.bf16.msk.msra.mxu1 %vm9044_vm2, %v9427_v36 }
 0x147   :  { %6865 = vmatmul.mubr.msk.f32.gmra.mrb[12].mxu1 %vm647_vm4, %v9073_v18  ;;  %v6425_v18 = vld [vmem:[%s12967_s3 + $0x1a0] sm:$0xff] }
 0x148   :  { %1362 = vmatprep.mubr.f32.mxu1 %v12986_v7 }
 0x14b   :  { %6866 = vmatmul.mubr.msk.f32.gmra.mrb[14].mxu1 %vm647_vm4, %v9110_v29  ;;  %v9464_v29 = vpack.c.bf16 %v6428_v14, %v6426_v13  ;;  %v6443_v13 = vld [vmem:[%s12967_s3 + $0x230] sm:$0xff]  ;;  %v6446_v14 = vld [vmem:[%s12967_s3 + $0x248] sm:$0xff] }
 0x14c   :  { %1439 = vmatprep.mubr.f32.mxu1 %v12986_v7 }
 0x14d   :  { %7451 = vmatprep.subr.bf16.mxu1 %v9464_v29 }
 0x14f   :  { %6869 = vmatmul.mubr.msk.f32.vlgmr.msra.gmra.mrb[8].mxu1 %vm647_vm4, %v9207_v51  ;;  %v6427_v51 = vld [vmem:[%s12967_s3 + $0x1b0] sm:$0xff] }
 0x150   :  { %1445 = vmatprep.mubr.f32.mxu1 %v12986_v7 }
 0x153   :  { %6870 = vmatmul.mubr.msk.f32.gmra.mrb[10].mxu1 %vm647_vm4, %v9214_v53  ;;  %v6430_v53 = vld [vmem:[%s12967_s3 + $0x1c8] sm:$0xff] }
 0x154   :  { %1451 = vmatprep.mubr.f32.mxu1 %v12986_v7 }
 0x157   :  { %6871 = vmatmul.mubr.msk.f32.gmra.mrb[12].mxu1 %vm647_vm4, %v9224_v55  ;;  %v9475_v55 = vpack.c.bf16 %v6427_v51, %v6425_v18  ;;  %v6448_v18 = vld [vmem:[%s12967_s3 + $0x258] sm:$0xff]  ;;  %v9547_v51 = vpack.c.bf16 %v6443_v13, %v6441_v1  ;;  %v6455_v1 = vld [vmem:[%s12967_s3 + $0x290] sm:$0xff] }
 0x158   :  { %1457 = vmatprep.mubr.f32.mxu1 %v12986_v7  ;;  %v9595_v13 = vpack.c.bf16 %v6455_v1, %v6453_v49 }
 0x159   :  { %7453 = vmatpush1.bf16.msra.mxu1 %v9475_v55  ;;  %13244 = vst [vmem:[#allocation10_spill] sm:$0xff] %v9547_v51 }
 0x15a   :  { %13250 = vst [vmem:[#allocation16_spill] sm:$0xff] %v9595_v13 }
 0x15b   :  { %6872 = vmatmul.mubr.msk.f32.gmra.mrb[14].mxu1 %vm647_vm4, %v9217_v54  ;;  %v6432_v54 = vld [vmem:[%s12967_s3 + $0x1d8] sm:$0xff] }
 0x15c   :  { %v9477_v2 = vpack.c.bf16 %v6432_v54, %v6430_v53  ;;  %v9550_v53 = vpack.c.bf16 %v6448_v18, %v6446_v14  ;;  %v6445_v54 = vld [vmem:[%s12967_s3 + $0x240] sm:$0xff] }
 0x15d   :  { %v9565_v17 = vpack.c.bf16 %v6447_v4, %v6445_v54 }
 0x15e   :  { %7455 = vmatprep.subr.bf16.mxu1 %v9477_v2  ;;  %13245 = vst [vmem:[#allocation11_spill] sm:$0xff] %v9550_v53 }
 0x15f   :  { %7457 = vmatpush1.bf16.msra.mxu1 %v9493_v19  ;;  %13246 = vst [vmem:[#allocation12_spill] sm:$0xff] %v9565_v17 }
 0x160   :  { %7459 = vmatprep.subr.bf16.mxu1 %v9496_v24 }
 0x163   :  { %7461 = vmatpush1.bf16.msra.mxu1 %v9511_v40 }
 0x164   :  { %7463 = vmatprep.subr.bf16.mxu1 %v9514_v41 }
 0x167   :  { %7465 = vmatpush1.bf16.msra.mxu1 %v9529_v52 }
 0x168   :  { %7467 = vmatprep.subr.bf16.mxu1 %v9532_v0 }
 0x16b   :  { %7469 = vmatpush1.bf16.msra.mxu1 %v9547_v51 }
 0x16c   :  { %7471 = vmatprep.subr.bf16.mxu1 %v9550_v53 }
 0x16f   :  { %7473 = vmatpush1.bf16.msra.mxu1 %v9565_v17 }
 0x170   :  { %7475 = vmatprep.subr.bf16.mxu1 %v9568_v25 }
 0x173   :  { %7477 = vmatpush1.bf16.msra.mxu1 %v9583_v26 }
 0x174   :  { %7479 = vmatprep.subr.bf16.mxu1 %v9586_v35 }
 0x177   :  { %7481 = vmatpush1.bf16.msra.mxu1 %v9595_v13 }
 0x1f2   :  { %v9599_v14 = vpop.f32.mrb[0].mxu1 }
 0x1f3   :  { %v9601_v18 = vpop.f32.mrb[1].mxu1 }
 0x1f6   :  { %v9603_v54 = vpop.f32.mrb[2].mxu1 }
 0x1f7   :  { %v9605_v4 = vpop.f32.mrb[3].mxu1 }
 0x1fa   :  { %v9607_v12 = vpop.f32.mrb[4].mxu1 }
 0x1fb   :  { %v9611_v27 = vpop.f32.mrb[5].mxu1 }
 0x1fe   :  { %v9615_v34 = vpop.f32.mrb[6].mxu1 }
 0x1ff   :  { %v9619_v49 = vpop.f32.mrb[7].mxu1 }
 0x222   :  { %v1441_v60 = vpop.f32.mrb[8].mxu1 }
 0x223   :  { %v1443_v58 = vpop.f32.mrb[9].mxu1  ;;  %v1472_v7 = vadd.f32 %v1441_v60, %v9241_v61 }
 0x224   :  { %v1473_v16 = vadd.f32 %v1443_v58, %v9245_v63 }
 0x225   :  { %v1480_v25 = vmax.f32 %v1472_v7, 0.0 }
 0x226   :  { %v1447_v13 = vpop.f32.mrb[10].mxu1  ;;  %v1481_v42 = vmax.f32 %v1473_v16, 0.0 }
 0x227   :  { %v1474_v35 = vadd.f32 %v1447_v13, %v9241_v61  ;;  %v1449_v31 = vpop.f32.mrb[11].mxu1 }
 0x228   :  { %v1475_v26 = vadd.f32 %v1449_v31, %v9245_v63 }
 0x229   :  { %v1482_v17 = vmax.f32 %v1474_v35, 0.0 }
 0x22a   :  { %v1483_v53 = vmax.f32 %v1475_v26, 0.0  ;;  %v1453_v51 = vpop.f32.mrb[12].mxu1 }
 0x22b   :  { %v7432_v0 = vpack.c.bf16 %v1482_v17, %v1480_v25  ;;  %v1455_v52 = vpop.f32.mrb[13].mxu1  ;;  %v1476_v41 = vadd.f32 %v1453_v51, %v9241_v61  ;;  %v6463_v25 = vld [vmem:[%s12967_s3 + $0x2d0] sm:$0xff] }
 0x22c   :  { %v7430_v1 = vpack.c.bf16 %v1483_v53, %v1481_v42  ;;  %v1477_v60 = vadd.f32 %v1455_v52, %v9245_v63  ;;  %v6462_v52 = vld [vmem:[%s12967_s3 + $0x2c8] sm:$0xff]  ;;  %v6461_v53 = vld [vmem:[%s12967_s3 + $0x2c0] sm:$0xff] }
 0x22d   :  { %v1484_v7 = vmax.f32 %v1476_v41, 0.0  ;;  %v9683_v42 = vpack.c.bf16 %v6463_v25, %v6461_v53  ;;  %v6475_v53 = vld [vmem:[%s12967_s3 + $0x330] sm:$0xff] }
 0x22e   :  { %v1459_v40 = vpop.f32.mrb[14].mxu1  ;;  %7431 = vmatprep.subr.bf16.mxu0 %v7430_v1  ;;  %v1485_v16 = vmax.f32 %v1477_v60, 0.0  ;;  %v6468_v60 = vld [vmem:[%s12967_s3 + $0x2f8] sm:$0xff] }
 0x22f   :  { %v1478_v58 = vadd.f32 %v1459_v40, %v9241_v61  ;;  %v1461_v13 = vpop.f32.mrb[15].mxu1  ;;  %7433 = vmatpush1.bf16.msra.mxu0 %v7432_v0  ;;  %v13251_v40 = vmov 0.0   ;;  %13252 = vst [vmem:[#allocation17_spill] sm:$0xff] %v9683_v42 }
 0x230   :  { %v1479_v31 = vadd.f32 %v1461_v13, %v9245_v63  ;;  %v6465_v13 = vld [vmem:[%s12967_s3 + $0x2e0] sm:$0xff] }
 0x231   :  { %v1486_v35 = vmax.f32 %v1478_v58, 0.0 }
 0x232   :  { %v1487_v26 = vmax.f32 %v1479_v31, 0.0  ;;  %v6467_v31 = vld [vmem:[%s12967_s3 + $0x2f0] sm:$0xff] }
 0x233   :  { %v7437_v24 = vpack.c.bf16 %v1486_v35, %v1484_v7  ;;  %v9701_v7 = vpack.c.bf16 %v6467_v31, %v6465_v13  ;;  %v6470_v35 = vld [vmem:[%s12967_s3 + $0x308] sm:$0xff] }
 0x234   :  { %v7434_v17 = vpack.c.bf16 %v1487_v26, %v1485_v16  ;;  %v6472_v16 = vld [vmem:[%s12967_s3 + $0x318] sm:$0xff] }
 0x235   :  { %13254 = vst [vmem:[#allocation19_spill] sm:$0xff] %v9701_v7  ;;  %v9711_v26 = vpack.c.bf16 %v6472_v16, %v6470_v35 }
 0x236   :  { %7436 = vmatprep.subr.msk.bf16.mxu0 %vm9256_vm7, %v7434_v17 }
 0x237   :  { %7439 = vmatpush1.bf16.msk.msra.mxu0 %vm9256_vm7, %v7437_v24  ;;  %13255 = vst [vmem:[#allocation20_spill] sm:$0xff] %v9711_v26 }
 0x238   :  { %7441 = vmatprep.subr.bf16.mxu0 %v7430_v1  ;;  %v6466_v1 = vld [vmem:[%s12967_s3 + $0x2e8] sm:$0xff] }
 0x239   :  { %v9693_v58 = vpack.c.bf16 %v6468_v60, %v6466_v1  ;;  %v111_v1 = vld [vmem:[%s12967_s3 + $0x8] sm:$0xff]  ;;  %v113_v60 = vld [vmem:[%s12967_s3 + $0x18] sm:$0xff] }
 0x23a   :  { %6875 = vmatmul.mubr.msk.f32.vlgmr.msra.gmra.mrb[8].mxu0 %vm1001_vm8, %v9267_v50  ;;  %v6458_v50 = vld [vmem:[%s12967_s3 + $0x2a8] sm:$0xff]  ;;  %v9747_v13 = vpack.c.bf16 %v113_v60, %v111_v1 }
 0x23b   :  { %7443 = vmatpush1.bf16.msra.mxu0 %v7432_v0  ;;  %1564 = vmatprep.mubr.f32.mxu0 %v13251_v40  ;;  %v6464_v0 = vld [vmem:[%s12967_s3 + $0x2d8] sm:$0xff]  ;;  %13253 = vst [vmem:[#allocation18_spill] sm:$0xff] %v9693_v58 }
 0x23c   :  { %7446 = vmatprep.subr.msk.bf16.mxu0 %vm9256_vm7, %v7434_v17  ;;  %v9675_v51 = vpack.c.bf16 %v6464_v0, %v6462_v52  ;;  %v6469_v17 = vld [vmem:[%s12967_s3 + $0x300] sm:$0xff]  ;;  %13259 = vst [vmem:[#allocation24_spill] sm:$0xff] %v9747_v13 }
 0x23d   :  { %v6473_v0 = vld [vmem:[%s12967_s3 + $0x320] sm:$0xff] }
 0x23e   :  { %6876 = vmatmul.mubr.msk.f32.gmra.mrb[10].mxu0 %vm1001_vm8, %v9281_v59  ;;  %v6460_v59 = vld [vmem:[%s12967_s3 + $0x2b8] sm:$0xff]  ;;  %v9737_v25 = vpack.c.bf16 %v6475_v53, %v6473_v0  ;;  %v13260_v53 = vmax.f32 %v9599_v14, %v9607_v12  ;;  %v112_v12 = vld [vmem:[%s12967_s3 + $0x10] sm:$0xff] }
 0x23f   :  { %7449 = vmatpush1.bf16.msk.msra.mxu0 %vm9256_vm7, %v7437_v24  ;;  %1635 = vmatprep.mubr.f32.mxu0 %v13251_v40  ;;  %v9657_v24 = vpack.c.bf16 %v6460_v59, %v6458_v50  ;;  %v6471_v50 = vld [vmem:[%s12967_s3 + $0x310] sm:$0xff] }
 0x240   :  { %v9719_v59 = vpack.c.bf16 %v6471_v50, %v6469_v17  ;;  %13258 = vst [vmem:[#allocation23_spill] sm:$0xff] %v9737_v25 }
 0x241   :  { %7483 = vmatprep.subr.bf16.mxu1 %v9657_v24 }
 0x242   :  { %6879 = vmatmul.mubr.msk.f32.vlgmr.msra.gmra.mrb[12].mxu0 %vm1001_vm8, %v9307_v5  ;;  %v6457_v5 = vld [vmem:[%s12967_s3 + $0x2a0] sm:$0xff]  ;;  %13256 = vst [vmem:[#allocation21_spill] sm:$0xff] %v9719_v59 }
 0x243   :  { %1641 = vmatprep.mubr.f32.mxu0 %v13251_v40 }
 0x246   :  { %6880 = vmatmul.mubr.msk.f32.gmra.mrb[14].mxu0 %vm1001_vm8, %v9333_v20  ;;  %v6459_v20 = vld [vmem:[%s12967_s3 + $0x2b0] sm:$0xff] }
 0x247   :  { %2092 = vmatprep.mubr.f32.mxu0 %v13251_v40  ;;  %v9665_v41 = vpack.c.bf16 %v6459_v20, %v6457_v5  ;;  %v6474_v5 = vld [vmem:[%s12967_s3 + $0x328] sm:$0xff]  ;;  %v6476_v20 = vld [vmem:[%s12967_s3 + $0x338] sm:$0xff] }
 0x248   :  { %v9729_v52 = vpack.c.bf16 %v6476_v20, %v6474_v5 }
 0x249   :  { %7485 = vmatpush1.bf16.msra.mxu1 %v9665_v41 }
 0x24a   :  { %7487 = vmatprep.subr.bf16.mxu1 %v9675_v51  ;;  %13257 = vst [vmem:[#allocation22_spill] sm:$0xff] %v9729_v52 }
 0x24d   :  { %7489 = vmatpush1.bf16.msra.mxu1 %v9683_v42 }
 0x24e   :  { %7491 = vmatprep.subr.bf16.mxu1 %v9693_v58 }
 0x251   :  { %7493 = vmatpush1.bf16.msra.mxu1 %v9701_v7  ;;  %v13262_v7 = vmax.f32 %v9603_v54, %v9615_v34  ;;  %v115_v54 = vld [vmem:[%s12967_s3 + $0x28] sm:$0xff] }
 0x252   :  { %7495 = vmatprep.subr.bf16.mxu1 %v9711_v26 }
 0x255   :  { %7497 = vmatpush1.bf16.msra.mxu1 %v9719_v59 }
 0x256   :  { %7499 = vmatprep.subr.bf16.mxu1 %v9729_v52  ;;  %v13261_v52 = vmax.f32 %v9601_v18, %v9611_v27  ;;  %v110_v18 = vld [vmem:[%s12967_s3] sm:$0xff] }
 0x259   :  { %7501 = vmatpush1.bf16.msra.mxu1 %v9737_v25 }
 0x25a   :  { %7503 = vmatprep.subr.bf16.mxu1 %v9747_v13 }
 0x30d   :  { %v1560_v31 = vpop.f32.mrb[8].mxu0 }
 0x30e   :  { %v1562_v35 = vpop.f32.mrb[9].mxu0 }
 0x311   :  { %v1566_v16 = vpop.f32.mrb[10].mxu0 }
 0x312   :  { %v1568_v17 = vpop.f32.mrb[11].mxu0 }
 0x315   :  { %v1637_v50 = vpop.f32.mrb[12].mxu0 }
 0x316   :  { %v1648_v5 = vmax.f32 %v1560_v31, %v1637_v50  ;;  %v1639_v20 = vpop.f32.mrb[13].mxu0  ;;  %v119_v50 = vld [vmem:[%s12967_s3 + $0x48] sm:$0xff] }
 0x317   :  { %v1649_v0 = vmax.f32 %v1562_v35, %v1639_v20  ;;  %v13263_v35 = vmax.f32 %v9605_v4, %v9619_v49  ;;  %v117_v4 = vld [vmem:[%s12967_s3 + $0x38] sm:$0xff] }
 0x318   :  { %v9753_v25 = vmax.f32 %v13260_v53, %v1648_v5  ;;  %v121_v5 = vld [vmem:[%s12967_s3 + $0x58] sm:$0xff]  ;;  %v118_v53 = vld [vmem:[%s12967_s3 + $0x40] sm:$0xff] }
 0x319   :  { %v9758_v1 = vmax.f32 %v13261_v52, %v1649_v0  ;;  %v1643_v60 = vpop.f32.mrb[14].mxu0  ;;  %v9796_v52 = vpack.c.bf16 %v117_v4, %v115_v54  ;;  %v9823_v0 = vpack.c.bf16 %v121_v5, %v119_v50  ;;  %v122_v4 = vld [vmem:[%s12967_s3 + $0x60] sm:$0xff] }
 0x31a   :  { %v1650_v13 = vmax.f32 %v1566_v16, %v1643_v60  ;;  %v1645_v59 = vpop.f32.mrb[15].mxu0  ;;  %v116_v16 = vld [vmem:[%s12967_s3 + $0x30] sm:$0xff]  ;;  %v126_v5 = vld [vmem:[%s12967_s3 + $0x80] sm:$0xff] }
 0x31b   :  { %v1651_v26 = vmax.f32 %v1568_v17, %v1645_v59  ;;  %v1663_v34 = vrot.slane %v9758_v1, 1  ;;  %13265 = vst [vmem:[#allocation26_spill] sm:$0xff] %v9796_v52  ;;  %13267 = vst [vmem:[#allocation28_spill] sm:$0xff] %v9823_v0  ;;  %v120_v60 = vld [vmem:[%s12967_s3 + $0x50] sm:$0xff] }
 0x31c   :  { %v9763_v31 = vmax.f32 %v13262_v7, %v1650_v13  ;;  %v1660_v7 = vrot.slane %v9753_v25, 1  ;;  %v114_v13 = vld [vmem:[%s12967_s3 + $0x20] sm:$0xff] }
 0x31d   :  { %v9768_v14 = vmax.f32 %v13263_v35, %v1651_v26  ;;  %v9790_v26 = vpack.c.bf16 %v112_v12, %v110_v18  ;;  %v9820_v20 = vpack.c.bf16 %v116_v16, %v114_v13  ;;  %v123_v35 = vld [vmem:[%s12967_s3 + $0x68] sm:$0xff]  ;;  %v125_v18 = vld [vmem:[%s12967_s3 + $0x78] sm:$0xff]  ;;  %v9841_v12 = vpack.c.bf16 %v120_v60, %v118_v53  ;;  %v128_v53 = vld [vmem:[%s12967_s3 + $0x90] sm:$0xff] }
 0x31e   :  { %v9777_v27 = vrot.slane %v9763_v31, 1  ;;  %v9844_v54 = vpack.c.bf16 %v125_v18, %v123_v35  ;;  %v129_v13 = vld [vmem:[%s12967_s3 + $0x98] sm:$0xff]  ;;  %v131_v60 = vld [vmem:[%s12967_s3 + $0xa8] sm:$0xff]  ;;  %v9877_v18 = vpack.c.bf16 %v128_v53, %v126_v5 }
 0x31f   :  { %v9787_v49 = vrot.slane %v9768_v14, 1  ;;  %13264 = vst [vmem:[#allocation25_spill] sm:$0xff] %v9790_v26  ;;  %13266 = vst [vmem:[#allocation27_spill] sm:$0xff] %v9820_v20  ;;  %v133_v35 = vld [vmem:[%s12967_s3 + $0xb8] sm:$0xff] }
 0x320   :  { %v9808_v17 = vsel %vm639_vm3, %v1660_v7, %v9777_v27  ;;  %13268 = vst [vmem:[#allocation29_spill] sm:$0xff] %v9841_v12  ;;  %13269 = vst [vmem:[#allocation30_spill] sm:$0xff] %v9844_v54  ;;  %v127_v7 = vld [vmem:[%s12967_s3 + $0x88] sm:$0xff]  ;;  %v137_v5 = vld [vmem:[%s12967_s3 + $0xd8] sm:$0xff] }
 0x321   :  { %v9794_v59 = vsel %vm639_vm3, %v1663_v34, %v9787_v49  ;;  %v124_v34 = vld [vmem:[%s12967_s3 + $0x70] sm:$0xff]  ;;  %v9862_v50 = vpack.c.bf16 %v129_v13, %v127_v7  ;;  %13272 = vst [vmem:[#allocation33_spill] sm:$0xff] %v9877_v18  ;;  %v135_v13 = vld [vmem:[%s12967_s3 + $0xc8] sm:$0xff] }
 0x322   :  { %6881 = vmatprep.mubr.msk.f32.mxu1 %vm1668_vm9, %v9794_v59  ;;  %v9859_v16 = vpack.c.bf16 %v124_v34, %v122_v4  ;;  %v9880_v4 = vpack.c.bf16 %v133_v35, %v131_v60  ;;  %v130_v34 = vld [vmem:[%s12967_s3 + $0xa0] sm:$0xff]  ;;  %v132_v7 = vld [vmem:[%s12967_s3 + $0xb0] sm:$0xff]  ;;  %v9898_v60 = vpack.c.bf16 %v137_v5, %v135_v13 }
 0x323   :  { %1738 = vmatmul.mubr.f32.vlgmr.msra.gmra.mrb[16].mxu1 %v9808_v17  ;;  %13271 = vst [vmem:[#allocation32_spill] sm:$0xff] %v9862_v50  ;;  %v9895_v53 = vpack.c.bf16 %v132_v7, %v130_v34  ;;  %v134_v35 = vld [vmem:[%s12967_s3 + $0xc0] sm:$0xff]  ;;  %v141_v34 = vld [vmem:[%s12967_s3 + $0xf8] sm:$0xff] }
 0x324   :  { %7505 = vmatpush1.bf16.msra.mxu1 %v9790_v26  ;;  %6882 = vmatprep.mubr.msk.f32.mxu1 %vm1668_vm9, %v9787_v49  ;;  %13270 = vst [vmem:[#allocation31_spill] sm:$0xff] %v9859_v16  ;;  %13273 = vst [vmem:[#allocation34_spill] sm:$0xff] %v9880_v4  ;;  %v138_v5 = vld [vmem:[%s12967_s3 + $0xe0] sm:$0xff] }
 0x325   :  { %7507 = vmatprep.subr.bf16.mxu1 %v9796_v52  ;;  %13274 = vst [vmem:[#allocation35_spill] sm:$0xff] %v9895_v53  ;;  %13275 = vst [vmem:[#allocation36_spill] sm:$0xff] %v9898_v60 }
 0x327   :  { %1744 = vmatmul.mubr.f32.gmra.mrb[18].mxu1 %v9777_v27 }
 0x328   :  { %7509 = vmatpush1.bf16.msra.mxu1 %v9820_v20  ;;  %6883 = vmatprep.mubr.msk.f32.mxu1 %vm1668_vm9, %v9758_v1 }
 0x329   :  { %7511 = vmatprep.subr.bf16.mxu1 %v9823_v0 }
 0x32c   :  { %7513 = vmatpush1.bf16.msra.mxu1 %v9841_v12  ;;  %v6498_v12 = vld [vmem:[%s12967_s3 + $0x3e8] sm:$0xff] }
 0x32d   :  { %7515 = vmatprep.subr.bf16.mxu1 %v9844_v54  ;;  %v6487_v54 = vld [vmem:[%s12967_s3 + $0x390] sm:$0xff] }
 0x330   :  { %7517 = vmatpush1.bf16.msra.mxu1 %v9859_v16  ;;  %v139_v16 = vld [vmem:[%s12967_s3 + $0xe8] sm:$0xff] }
 0x331   :  { %7519 = vmatprep.subr.bf16.mxu1 %v9862_v50  ;;  %v136_v50 = vld [vmem:[%s12967_s3 + $0xd0] sm:$0xff]  ;;  %v9916_v13 = vpack.c.bf16 %v141_v34, %v139_v16  ;;  %v142_v34 = vld [vmem:[%s12967_s3 + $0x100] sm:$0xff] }
 0x332   :  { %v9913_v7 = vpack.c.bf16 %v136_v50, %v134_v35  ;;  %v145_v50 = vld [vmem:[%s12967_s3 + $0x118] sm:$0xff] }
 0x333   :  { %13277 = vst [vmem:[#allocation38_spill] sm:$0xff] %v9916_v13 }
 0x334   :  { %7521 = vmatpush1.bf16.msra.mxu1 %v9877_v18  ;;  %13276 = vst [vmem:[#allocation37_spill] sm:$0xff] %v9913_v7  ;;  %v143_v18 = vld [vmem:[%s12967_s3 + $0x108] sm:$0xff] }
 0x335   :  { %7523 = vmatprep.subr.bf16.mxu1 %v9880_v4  ;;  %v140_v4 = vld [vmem:[%s12967_s3 + $0xf0] sm:$0xff]  ;;  %v9934_v35 = vpack.c.bf16 %v145_v50, %v143_v18  ;;  %v146_v50 = vld [vmem:[%s12967_s3 + $0x120] sm:$0xff] }
 0x336   :  { %v9931_v16 = vpack.c.bf16 %v140_v4, %v138_v5  ;;  %v149_v4 = vld [vmem:[%s12967_s3 + $0x138] sm:$0xff] }
 0x337   :  { %13279 = vst [vmem:[#allocation40_spill] sm:$0xff] %v9934_v35 }
 0x338   :  { %7525 = vmatpush1.bf16.msra.mxu1 %v9895_v53  ;;  %13278 = vst [vmem:[#allocation39_spill] sm:$0xff] %v9931_v16  ;;  %v147_v53 = vld [vmem:[%s12967_s3 + $0x128] sm:$0xff] }
 0x339   :  { %7527 = vmatprep.subr.bf16.mxu1 %v9898_v60  ;;  %v144_v60 = vld [vmem:[%s12967_s3 + $0x110] sm:$0xff]  ;;  %v9952_v5 = vpack.c.bf16 %v149_v4, %v147_v53  ;;  %v150_v4 = vld [vmem:[%s12967_s3 + $0x140] sm:$0xff] }
 0x33a   :  { %v9949_v18 = vpack.c.bf16 %v144_v60, %v142_v34  ;;  %v153_v60 = vld [vmem:[%s12967_s3 + $0x158] sm:$0xff] }
 0x33b   :  { %13281 = vst [vmem:[#allocation42_spill] sm:$0xff] %v9952_v5 }
 0x33c   :  { %7529 = vmatpush1.bf16.msra.mxu1 %v9913_v7  ;;  %13280 = vst [vmem:[#allocation41_spill] sm:$0xff] %v9949_v18  ;;  %v151_v7 = vld [vmem:[%s12967_s3 + $0x148] sm:$0xff] }
 0x33d   :  { %7531 = vmatprep.subr.bf16.mxu1 %v9916_v13  ;;  %v148_v13 = vld [vmem:[%s12967_s3 + $0x130] sm:$0xff]  ;;  %v9970_v34 = vpack.c.bf16 %v153_v60, %v151_v7  ;;  %v154_v60 = vld [vmem:[%s12967_s3 + $0x160] sm:$0xff] }
 0x33e   :  { %v9967_v53 = vpack.c.bf16 %v148_v13, %v146_v50  ;;  %v157_v13 = vld [vmem:[%s12967_s3 + $0x178] sm:$0xff] }
 0x33f   :  { %13283 = vst [vmem:[#allocation44_spill] sm:$0xff] %v9970_v34 }
 0x340   :  { %7533 = vmatpush1.bf16.msra.mxu1 %v9931_v16  ;;  %13282 = vst [vmem:[#allocation43_spill] sm:$0xff] %v9967_v53  ;;  %v155_v16 = vld [vmem:[%s12967_s3 + $0x168] sm:$0xff] }
 0x341   :  { %7535 = vmatprep.subr.bf16.mxu1 %v9934_v35  ;;  %v152_v35 = vld [vmem:[%s12967_s3 + $0x150] sm:$0xff]  ;;  %v9988_v50 = vpack.c.bf16 %v157_v13, %v155_v16  ;;  %v158_v13 = vld [vmem:[%s12967_s3 + $0x180] sm:$0xff] }
 0x342   :  { %v9985_v7 = vpack.c.bf16 %v152_v35, %v150_v4  ;;  %v161_v35 = vld [vmem:[%s12967_s3 + $0x198] sm:$0xff] }
 0x343   :  { %13285 = vst [vmem:[#allocation46_spill] sm:$0xff] %v9988_v50 }
 0x344   :  { %7537 = vmatpush1.bf16.msra.mxu1 %v9949_v18  ;;  %13284 = vst [vmem:[#allocation45_spill] sm:$0xff] %v9985_v7  ;;  %v159_v18 = vld [vmem:[%s12967_s3 + $0x188] sm:$0xff] }
 0x345   :  { %7539 = vmatprep.subr.bf16.mxu1 %v9952_v5  ;;  %v156_v5 = vld [vmem:[%s12967_s3 + $0x170] sm:$0xff]  ;;  %v10006_v4 = vpack.c.bf16 %v161_v35, %v159_v18  ;;  %v6477_v35 = vld [vmem:[%s12967_s3 + $0x340] sm:$0xff] }
 0x346   :  { %v10003_v16 = vpack.c.bf16 %v156_v5, %v154_v60  ;;  %v6480_v5 = vld [vmem:[%s12967_s3 + $0x358] sm:$0xff] }
 0x347   :  { %13287 = vst [vmem:[#allocation48_spill] sm:$0xff] %v10006_v4 }
 0x348   :  { %7541 = vmatpush1.bf16.msra.mxu1 %v9967_v53  ;;  %13286 = vst [vmem:[#allocation47_spill] sm:$0xff] %v10003_v16  ;;  %v6478_v53 = vld [vmem:[%s12967_s3 + $0x348] sm:$0xff] }
 0x349   :  { %7543 = vmatprep.subr.bf16.mxu1 %v9970_v34  ;;  %v160_v34 = vld [vmem:[%s12967_s3 + $0x190] sm:$0xff]  ;;  %v10024_v60 = vpack.c.bf16 %v6480_v5, %v6478_v53  ;;  %v6481_v5 = vld [vmem:[%s12967_s3 + $0x360] sm:$0xff] }
 0x34a   :  { %v10021_v18 = vpack.c.bf16 %v160_v34, %v158_v13  ;;  %v6484_v34 = vld [vmem:[%s12967_s3 + $0x378] sm:$0xff] }
 0x34b   :  { %13289 = vst [vmem:[#allocation50_spill] sm:$0xff] %v10024_v60 }
 0x34c   :  { %7545 = vmatpush1.bf16.msra.mxu1 %v9985_v7  ;;  %13288 = vst [vmem:[#allocation49_spill] sm:$0xff] %v10021_v18  ;;  %v6482_v7 = vld [vmem:[%s12967_s3 + $0x368] sm:$0xff] }
 0x34d   :  { %7547 = vmatprep.subr.bf16.mxu1 %v9988_v50  ;;  %v6479_v50 = vld [vmem:[%s12967_s3 + $0x350] sm:$0xff]  ;;  %v10042_v13 = vpack.c.bf16 %v6484_v34, %v6482_v7  ;;  %v10058_v7 = vrot.slane %v9768_v14, 2  ;;  %v1834_v34 = vrot.slane %v9758_v1, 2 }
 0x34e   :  { %v10039_v53 = vpack.c.bf16 %v6479_v50, %v6477_v35  ;;  %v6488_v50 = vld [vmem:[%s12967_s3 + $0x398] sm:$0xff] }
 0x34f   :  { %13291 = vst [vmem:[#allocation52_spill] sm:$0xff] %v10042_v13 }
 0x350   :  { %7549 = vmatpush1.bf16.msra.mxu1 %v10003_v16  ;;  %13290 = vst [vmem:[#allocation51_spill] sm:$0xff] %v10039_v53  ;;  %v6486_v16 = vld [vmem:[%s12967_s3 + $0x388] sm:$0xff] }
 0x351   :  { %7551 = vmatprep.subr.bf16.mxu1 %v10006_v4  ;;  %v6483_v4 = vld [vmem:[%s12967_s3 + $0x370] sm:$0xff] }
 0x352   :  { %v10063_v35 = vpack.c.bf16 %v6483_v4, %v6481_v5  ;;  %v6492_v4 = vld [vmem:[%s12967_s3 + $0x3b8] sm:$0xff] }
 0x354   :  { %7553 = vmatpush1.bf16.msra.mxu1 %v10021_v18  ;;  %13292 = vst [vmem:[#allocation53_spill] sm:$0xff] %v10063_v35  ;;  %v6485_v18 = vld [vmem:[%s12967_s3 + $0x380] sm:$0xff] }
 0x355   :  { %7555 = vmatprep.subr.bf16.mxu1 %v10024_v60  ;;  %v10067_v60 = vpack.c.bf16 %v6488_v50, %v6486_v16  ;;  %v10084_v16 = vsel %vm855_vm5, %v1834_v34, %v10058_v7  ;;  %v10089_v5 = vpack.c.bf16 %v6487_v54, %v6485_v18  ;;  %v6491_v34 = vld [vmem:[%s12967_s3 + $0x3b0] sm:$0xff]  ;;  %v6496_v54 = vld [vmem:[%s12967_s3 + $0x3d8] sm:$0xff] }
 0x357   :  { %1819 = vmatmul.mubr.f32.vlgmr.msra.gmra.mrb[16].mxu1 %v9753_v25  ;;  %13293 = vst [vmem:[#allocation54_spill] sm:$0xff] %v10067_v60  ;;  %13294 = vst [vmem:[#allocation55_spill] sm:$0xff] %v10089_v5 }
 0x358   :  { %6884 = vmatprep.mubr.msk.f32.mxu1 %vm1668_vm9, %v9768_v14  ;;  %7557 = vmatpush1.bf16.msra.mxu1 %v10039_v53  ;;  %v6490_v53 = vld [vmem:[%s12967_s3 + $0x3a8] sm:$0xff] }
 0x359   :  { %7559 = vmatprep.subr.bf16.mxu1 %v10042_v13  ;;  %v10092_v50 = vpack.c.bf16 %v6492_v4, %v6490_v53  ;;  %v6489_v13 = vld [vmem:[%s12967_s3 + $0x3a0] sm:$0xff] }
 0x35a   :  { %v10107_v18 = vpack.c.bf16 %v6491_v34, %v6489_v13  ;;  %v6493_v4 = vld [vmem:[%s12967_s3 + $0x3c0] sm:$0xff]  ;;  %v6500_v13 = vld [vmem:[%s12967_s3 + $0x3f8] sm:$0xff] }
 0x35b   :  { %1825 = vmatmul.mubr.f32.gmra.mrb[18].mxu1 %v9763_v31  ;;  %13295 = vst [vmem:[#allocation56_spill] sm:$0xff] %v10092_v50  ;;  %v10128_v34 = vpack.c.bf16 %v6500_v13, %v6498_v12  ;;  %v6501_v13 = vld [vmem:[%s12967_s3 + $0x400] sm:$0xff] }
 0x35c   :  { %7561 = vmatpush1.bf16.msra.mxu1 %v10063_v35  ;;  %6885 = vmatprep.mubr.msk.f32.mxu1 %vm1668_vm9, %v10084_v16  ;;  %v6494_v35 = vld [vmem:[%s12967_s3 + $0x3c8] sm:$0xff]  ;;  %13296 = vst [vmem:[#allocation57_spill] sm:$0xff] %v10107_v18 }
 0x35d   :  { %7563 = vmatprep.subr.bf16.mxu1 %v10067_v60  ;;  %v10110_v53 = vpack.c.bf16 %v6496_v54, %v6494_v35  ;;  %v6495_v60 = vld [vmem:[%s12967_s3 + $0x3d0] sm:$0xff]  ;;  %13299 = vst [vmem:[#allocation60_spill] sm:$0xff] %v10128_v34  ;;  %v6497_v54 = vld [vmem:[%s12967_s3 + $0x3e0] sm:$0xff] }
 0x35e   :  { %v10125_v35 = vpack.c.bf16 %v6495_v60, %v6493_v4  ;;  %v6504_v60 = vld [vmem:[%s12967_s3 + $0x418] sm:$0xff] }
 0x35f   :  { %13297 = vst [vmem:[#allocation58_spill] sm:$0xff] %v10110_v53 }
 0x360   :  { %7565 = vmatpush1.bf16.msra.mxu1 %v10089_v5  ;;  %13298 = vst [vmem:[#allocation59_spill] sm:$0xff] %v10125_v35  ;;  %v6502_v5 = vld [vmem:[%s12967_s3 + $0x408] sm:$0xff] }
 0x361   :  { %7567 = vmatprep.subr.bf16.mxu1 %v10092_v50  ;;  %v6499_v50 = vld [vmem:[%s12967_s3 + $0x3f0] sm:$0xff]  ;;  %v10146_v4 = vpack.c.bf16 %v6504_v60, %v6502_v5  ;;  %v6505_v60 = vld [vmem:[%s12967_s3 + $0x420] sm:$0xff] }
 0x362   :  { %v10143_v12 = vpack.c.bf16 %v6499_v50, %v6497_v54  ;;  %v6508_v50 = vld [vmem:[%s12967_s3 + $0x438] sm:$0xff] }
 0x363   :  { %13301 = vst [vmem:[#allocation62_spill] sm:$0xff] %v10146_v4 }
 0x364   :  { %7569 = vmatpush1.bf16.msra.mxu1 %v10107_v18  ;;  %13300 = vst [vmem:[#allocation61_spill] sm:$0xff] %v10143_v12  ;;  %v6506_v18 = vld [vmem:[%s12967_s3 + $0x428] sm:$0xff] }
 0x365   :  { %7571 = vmatprep.subr.bf16.mxu1 %v10110_v53  ;;  %v6503_v53 = vld [vmem:[%s12967_s3 + $0x410] sm:$0xff]  ;;  %v10164_v54 = vpack.c.bf16 %v6508_v50, %v6506_v18  ;;  %v6509_v50 = vld [vmem:[%s12967_s3 + $0x440] sm:$0xff] }
 0x366   :  { %v10161_v5 = vpack.c.bf16 %v6503_v53, %v6501_v13  ;;  %v6512_v53 = vld [vmem:[%s12967_s3 + $0x458] sm:$0xff] }
 0x367   :  { %13303 = vst [vmem:[#allocation64_spill] sm:$0xff] %v10164_v54 }
 0x368   :  { %7573 = vmatpush1.bf16.msra.mxu1 %v10125_v35  ;;  %13302 = vst [vmem:[#allocation63_spill] sm:$0xff] %v10161_v5  ;;  %v6510_v35 = vld [vmem:[%s12967_s3 + $0x448] sm:$0xff] }
 0x369   :  { %7575 = vmatprep.subr.bf16.mxu1 %v10128_v34  ;;  %v6507_v34 = vld [vmem:[%s12967_s3 + $0x430] sm:$0xff]  ;;  %v10182_v13 = vpack.c.bf16 %v6512_v53, %v6510_v35  ;;  %v6513_v53 = vld [vmem:[%s12967_s3 + $0x460] sm:$0xff] }
 0x36a   :  { %v10179_v18 = vpack.c.bf16 %v6507_v34, %v6505_v60  ;;  %v6516_v34 = vld [vmem:[%s12967_s3 + $0x478] sm:$0xff] }
 0x36b   :  { %13305 = vst [vmem:[#allocation66_spill] sm:$0xff] %v10182_v13 }
 0x36c   :  { %7577 = vmatpush1.bf16.msra.mxu1 %v10143_v12  ;;  %13304 = vst [vmem:[#allocation65_spill] sm:$0xff] %v10179_v18  ;;  %v6514_v12 = vld [vmem:[%s12967_s3 + $0x468] sm:$0xff] }
 0x36d   :  { %7579 = vmatprep.subr.bf16.mxu1 %v10146_v4  ;;  %v6511_v4 = vld [vmem:[%s12967_s3 + $0x450] sm:$0xff]  ;;  %v10200_v60 = vpack.c.bf16 %v6516_v34, %v6514_v12  ;;  %v6517_v34 = vld [vmem:[%s12967_s3 + $0x480] sm:$0xff] }
 0x36e   :  { %v10197_v35 = vpack.c.bf16 %v6511_v4, %v6509_v50  ;;  %v6520_v4 = vld [vmem:[%s12967_s3 + $0x498] sm:$0xff] }
 0x36f   :  { %13307 = vst [vmem:[#allocation68_spill] sm:$0xff] %v10200_v60 }
 0x370   :  { %7581 = vmatpush1.bf16.msra.mxu1 %v10161_v5  ;;  %13306 = vst [vmem:[#allocation67_spill] sm:$0xff] %v10197_v35  ;;  %v6518_v5 = vld [vmem:[%s12967_s3 + $0x488] sm:$0xff] }
 0x371   :  { %7583 = vmatprep.subr.bf16.mxu1 %v10164_v54  ;;  %v6515_v54 = vld [vmem:[%s12967_s3 + $0x470] sm:$0xff]  ;;  %v10218_v50 = vpack.c.bf16 %v6520_v4, %v6518_v5  ;;  %v6521_v4 = vld [vmem:[%s12967_s3 + $0x4a0] sm:$0xff] }
 0x372   :  { %v10215_v12 = vpack.c.bf16 %v6515_v54, %v6513_v53  ;;  %v6524_v54 = vld [vmem:[%s12967_s3 + $0x4b8] sm:$0xff] }
 0x373   :  { %13309 = vst [vmem:[#allocation70_spill] sm:$0xff] %v10218_v50 }
 0x374   :  { %7585 = vmatpush1.bf16.msra.mxu1 %v10179_v18  ;;  %13308 = vst [vmem:[#allocation69_spill] sm:$0xff] %v10215_v12  ;;  %v6522_v18 = vld [vmem:[%s12967_s3 + $0x4a8] sm:$0xff] }
 0x375   :  { %7587 = vmatprep.subr.bf16.mxu1 %v10182_v13  ;;  %v6519_v13 = vld [vmem:[%s12967_s3 + $0x490] sm:$0xff]  ;;  %v10236_v53 = vpack.c.bf16 %v6524_v54, %v6522_v18  ;;  %v6525_v54 = vld [vmem:[%s12967_s3 + $0x4c0] sm:$0xff] }
 0x376   :  { %v10233_v5 = vpack.c.bf16 %v6519_v13, %v6517_v34  ;;  %v6528_v13 = vld [vmem:[%s12967_s3 + $0x4d8] sm:$0xff] }
 0x377   :  { %13311 = vst [vmem:[#allocation72_spill] sm:$0xff] %v10236_v53 }
 0x378   :  { %7589 = vmatpush1.bf16.msra.mxu1 %v10197_v35  ;;  %13310 = vst [vmem:[#allocation71_spill] sm:$0xff] %v10233_v5  ;;  %v6526_v35 = vld [vmem:[%s12967_s3 + $0x4c8] sm:$0xff] }
 0x379   :  { %7591 = vmatprep.subr.bf16.mxu1 %v10200_v60  ;;  %v6523_v60 = vld [vmem:[%s12967_s3 + $0x4b0] sm:$0xff]  ;;  %v10254_v34 = vpack.c.bf16 %v6528_v13, %v6526_v35  ;;  %v1831_v35 = vrot.slane %v9753_v25, 2  ;;  %v13315_v13 = vsub.s32 0, %v9232_v57 }
 0x37a   :  { %v10251_v18 = vpack.c.bf16 %v6523_v60, %v6521_v4  ;;  %v10267_v60 = vrot.slane %v9763_v31, 2 }
 0x37b   :  { %13313 = vst [vmem:[#allocation74_spill] sm:$0xff] %v10254_v34 }
 0x37c   :  { %7593 = vmatpush1.bf16.msra.mxu1 %v10215_v12  ;;  %13312 = vst [vmem:[#allocation73_spill] sm:$0xff] %v10251_v18  ;;  %v10273_v4 = vsel %vm855_vm5, %v1831_v35, %v10267_v60  ;;  %v13316_v35 = vsub.s32 1, %v9232_v57  ;;  %v6582_v57 = vld [vmem:[%s12967_s3 + $0x688] sm:$0xff] }
 0x37d   :  { %7595 = vmatprep.subr.bf16.mxu1 %v10218_v50  ;;  %v6527_v50 = vld [vmem:[%s12967_s3 + $0x4d0] sm:$0xff] }
 0x37e   :  { %v10263_v12 = vpack.c.bf16 %v6527_v50, %v6525_v54  ;;  %v577_v50 = vld [vmem:[%s12968_s4] sm:$0x3] }
 0x37f   :  { %v10285_v54 = vrot.slane %v577_v50, %v13315_v13 }
 0x380   :  { %7597 = vmatpush1.bf16.msra.mxu1 %v10233_v5  ;;  %13314 = vst [vmem:[#allocation75_spill] sm:$0xff] %v10263_v12 }
 0x381   :  { %7599 = vmatprep.subr.bf16.mxu1 %v10236_v53 }
 0x384   :  { %7601 = vmatpush1.bf16.msra.mxu1 %v10251_v18 }
 0x385   :  { %7603 = vmatprep.subr.bf16.mxu1 %v10254_v34  ;;  %v10289_v34 = vrot.slane %v577_v50, %v13316_v35  ;;  %v6584_v50 = vld [vmem:[%s12967_s3 + $0x698] sm:$0xff] }
 0x386   :  { %v10306_v42 = vpack.c.bf16 %v6584_v50, %v6582_v57 }
 0x388   :  { %7605 = vmatpush1.bf16.msra.mxu1 %v10263_v12 }
 0x38b   :  { %1908 = vmatmul.mubr.f32.vlgmr.msra.gmra.mrb[16].mxu1 %v10273_v4 }
 0x38c   :  { %6886 = vmatprep.mubr.msk.f32.mxu1 %vm1668_vm9, %v10058_v7 }
 0x38f   :  { %1914 = vmatmul.mubr.f32.gmra.mrb[18].mxu1 %v10267_v60 }
 0x390   :  { %2018 = vmatprep.mubr.f32.mxu1 %v13251_v40 }
 0x45e   :  { %v1909_v12 = vpop.f32.mrb[16].mxu1 }
 0x45f   :  { %v1911_v18 = vpop.f32.mrb[17].mxu1  ;;  %v1935_v53 = vadd.f32 %v10285_v54, %v1909_v12 }
 0x460   :  { %v1936_v5 = vadd.f32 %v10289_v34, %v1911_v18 }
 0x461   :  { %v1939_v58 = vmax.f32 %v1935_v53, 0.0  ;;  %v6583_v53 = vld [vmem:[%s12967_s3 + $0x690] sm:$0xff] }
 0x462   :  { %v1915_v0 = vpop.f32.mrb[18].mxu1  ;;  %v1940_v12 = vmax.f32 %v1936_v5, 0.0  ;;  %v10331_v5 = vld [vmem:[%s12973_s9] sm:$0xff] }
 0x463   :  { %v1937_v20 = vadd.f32 %v10285_v54, %v1915_v0  ;;  %v1917_v52 = vpop.f32.mrb[19].mxu1 }
 0x464   :  { %v1938_v26 = vadd.f32 %v10289_v34, %v1917_v52 }
 0x465   :  { %v1941_v13 = vmax.f32 %v1937_v20, 0.0  ;;  %v6581_v20 = vld [vmem:[%s12967_s3 + $0x680] sm:$0xff] }
 0x466   :  { %v1942_v35 = vmax.f32 %v1938_v26, 0.0  ;;  %v6588_v26 = vld [vmem:[%s12967_s3 + $0x6b8] sm:$0xff]  ;;  %v10338_v57 = vpack.c.bf16 %v6583_v53, %v6581_v20 }
 0x467   :  { %v7609_v18 = vpack.c.bf16 %v1941_v13, %v1939_v58  ;;  %v6586_v58 = vld [vmem:[%s12967_s3 + $0x6a8] sm:$0xff]  ;;  %v10336_v13 = vld [vmem:[%s12974_s10] sm:$0xff] }
 0x468   :  { %v7606_v52 = vpack.c.bf16 %v1942_v35, %v1940_v12  ;;  %13319 = vst [vmem:[#allocation76_spill] sm:$0xff] %v10338_v57  ;;  %v10341_v50 = vpack.c.bf16 %v6588_v26, %v6586_v58  ;;  %v6585_v12 = vld [vmem:[%s12967_s3 + $0x6a0] sm:$0xff]  ;;  %v6587_v35 = vld [vmem:[%s12967_s3 + $0x6b0] sm:$0xff] }
 0x469   :  { %v10362_v20 = vpack.c.bf16 %v6587_v35, %v6585_v12  ;;  %v6589_v58 = vld [vmem:[%s12967_s3 + $0x6c0] sm:$0xff]  ;;  %v6591_v26 = vld [vmem:[%s12967_s3 + $0x6d0] sm:$0xff]  ;;  %v6596_v12 = vld [vmem:[%s12967_s3 + $0x6f8] sm:$0xff] }
 0x46a   :  { %7608 = vmatprep.subr.msk.bf16.mxu1 %vm10302_vm11, %v7606_v52  ;;  %7614 = vmatprep.subr.msk.bf16.mxu0 %vm10302_vm11, %v7606_v52  ;;  %13320 = vst [vmem:[#allocation77_spill] sm:$0xff] %v10341_v50  ;;  %v6592_v52 = vld [vmem:[%s12967_s3 + $0x6d8] sm:$0xff]  ;;  %v10381_v35 = vpack.c.bf16 %v6591_v26, %v6589_v58 }
 0x46b   :  { %7611 = vmatpush1.bf16.msk.msra.mxu1 %vm10302_vm11, %v7609_v18  ;;  %7617 = vmatpush1.bf16.msk.msra.mxu0 %vm10302_vm11, %v7609_v18  ;;  %v6590_v18 = vld [vmem:[%s12967_s3 + $0x6c8] sm:$0xff]  ;;  %13321 = vst [vmem:[#allocation78_spill] sm:$0xff] %v10362_v20  ;;  %v6600_v58 = vld [vmem:[%s12967_s3 + $0x718] sm:$0xff] }
 0x46c   :  { %7619 = vmatprep.subr.bf16.mxu0 %v10306_v42  ;;  %v10365_v53 = vpack.c.bf16 %v6592_v52, %v6590_v18  ;;  %13323 = vst [vmem:[#allocation80_spill] sm:$0xff] %v10381_v35  ;;  %v6593_v52 = vld [vmem:[%s12967_s3 + $0x6e0] sm:$0xff] }
 0x46e   :  { %6889 = vmatmul.mubr.msk.f32.vlgmr.msra.gmra.mrb[20].mxu1 %vm1943_vm12, %v10331_v5  ;;  %6892 = vmatmul.mubr.msk.f32.vlgmr.msra.gmra.mrb[16].mxu0 %vm1943_vm12, %v10336_v13  ;;  %13322 = vst [vmem:[#allocation79_spill] sm:$0xff] %v10365_v53 }
 0x46f   :  { %7621 = vmatpush1.bf16.msra.mxu0 %v10338_v57  ;;  %6893 = vmatprep.mubr.msk.f32.mxu0 %vm1668_vm9, %v9794_v59  ;;  %v6594_v59 = vld [vmem:[%s12967_s3 + $0x6e8] sm:$0xff] }
 0x470   :  { %7623 = vmatprep.subr.bf16.mxu0 %v10341_v50  ;;  %2414 = vmatprep.mubr.f32.mxu1 %v13251_v40  ;;  %v10384_v18 = vpack.c.bf16 %v6596_v12, %v6594_v59  ;;  %v6595_v50 = vld [vmem:[%s12967_s3 + $0x6f0] sm:$0xff]  ;;  %v6598_v57 = vld [vmem:[%s12967_s3 + $0x708] sm:$0xff]  ;;  %v6597_v12 = vld [vmem:[%s12967_s3 + $0x700] sm:$0xff] }
 0x471   :  { %v10399_v26 = vpack.c.bf16 %v6595_v50, %v6593_v52  ;;  %v10402_v59 = vpack.c.bf16 %v6600_v58, %v6598_v57  ;;  %v6604_v50 = vld [vmem:[%s12967_s3 + $0x738] sm:$0xff]  ;;  %v6601_v58 = vld [vmem:[%s12967_s3 + $0x720] sm:$0xff] }
 0x472   :  { %13324 = vst [vmem:[#allocation81_spill] sm:$0xff] %v10384_v18 }
 0x473   :  { %7625 = vmatpush1.bf16.msra.mxu0 %v10362_v20  ;;  %13325 = vst [vmem:[#allocation82_spill] sm:$0xff] %v10399_v26  ;;  %13326 = vst [vmem:[#allocation83_spill] sm:$0xff] %v10402_v59  ;;  %v6602_v20 = vld [vmem:[%s12967_s3 + $0x728] sm:$0xff] }
 0x474   :  { %7627 = vmatprep.subr.bf16.mxu0 %v10365_v53  ;;  %v6599_v53 = vld [vmem:[%s12967_s3 + $0x710] sm:$0xff]  ;;  %v10420_v52 = vpack.c.bf16 %v6604_v50, %v6602_v20  ;;  %v6605_v50 = vld [vmem:[%s12967_s3 + $0x740] sm:$0xff] }
 0x475   :  { %v10417_v57 = vpack.c.bf16 %v6599_v53, %v6597_v12  ;;  %v6608_v53 = vld [vmem:[%s12967_s3 + $0x758] sm:$0xff] }
 0x476   :  { %13328 = vst [vmem:[#allocation85_spill] sm:$0xff] %v10420_v52 }
 0x477   :  { %7629 = vmatpush1.bf16.msra.mxu0 %v10381_v35  ;;  %13327 = vst [vmem:[#allocation84_spill] sm:$0xff] %v10417_v57  ;;  %v6606_v35 = vld [vmem:[%s12967_s3 + $0x748] sm:$0xff] }
 0x478   :  { %7631 = vmatprep.subr.bf16.mxu0 %v10384_v18  ;;  %v6603_v18 = vld [vmem:[%s12967_s3 + $0x730] sm:$0xff]  ;;  %v10438_v12 = vpack.c.bf16 %v6608_v53, %v6606_v35  ;;  %v6609_v53 = vld [vmem:[%s12967_s3 + $0x760] sm:$0xff] }
 0x479   :  { %v10435_v20 = vpack.c.bf16 %v6603_v18, %v6601_v58  ;;  %v6612_v18 = vld [vmem:[%s12967_s3 + $0x778] sm:$0xff] }
 0x47a   :  { %13330 = vst [vmem:[#allocation87_spill] sm:$0xff] %v10438_v12 }
 0x47b   :  { %7633 = vmatpush1.bf16.msra.mxu0 %v10399_v26  ;;  %13329 = vst [vmem:[#allocation86_spill] sm:$0xff] %v10435_v20  ;;  %v6610_v26 = vld [vmem:[%s12967_s3 + $0x768] sm:$0xff] }
 0x47c   :  { %7635 = vmatprep.subr.bf16.mxu0 %v10402_v59  ;;  %v6607_v59 = vld [vmem:[%s12967_s3 + $0x750] sm:$0xff]  ;;  %v10456_v58 = vpack.c.bf16 %v6612_v18, %v6610_v26  ;;  %v6613_v18 = vld [vmem:[%s12967_s3 + $0x780] sm:$0xff] }
 0x47d   :  { %v10453_v35 = vpack.c.bf16 %v6607_v59, %v6605_v50  ;;  %v6616_v59 = vld [vmem:[%s12967_s3 + $0x798] sm:$0xff] }
 0x47e   :  { %13332 = vst [vmem:[#allocation89_spill] sm:$0xff] %v10456_v58 }
 0x47f   :  { %7637 = vmatpush1.bf16.msra.mxu0 %v10417_v57  ;;  %13331 = vst [vmem:[#allocation88_spill] sm:$0xff] %v10453_v35  ;;  %v6614_v57 = vld [vmem:[%s12967_s3 + $0x788] sm:$0xff] }
 0x480   :  { %7639 = vmatprep.subr.bf16.mxu0 %v10420_v52  ;;  %v6611_v52 = vld [vmem:[%s12967_s3 + $0x770] sm:$0xff]  ;;  %v10474_v50 = vpack.c.bf16 %v6616_v59, %v6614_v57  ;;  %v6617_v59 = vld [vmem:[%s12967_s3 + $0x7a0] sm:$0xff] }
 0x481   :  { %v10471_v26 = vpack.c.bf16 %v6611_v52, %v6609_v53  ;;  %v6620_v52 = vld [vmem:[%s12967_s3 + $0x7b8] sm:$0xff] }
 0x482   :  { %13334 = vst [vmem:[#allocation91_spill] sm:$0xff] %v10474_v50 }
 0x483   :  { %7641 = vmatpush1.bf16.msra.mxu0 %v10435_v20  ;;  %13333 = vst [vmem:[#allocation90_spill] sm:$0xff] %v10471_v26  ;;  %v6618_v20 = vld [vmem:[%s12967_s3 + $0x7a8] sm:$0xff] }
 0x484   :  { %7643 = vmatprep.subr.bf16.mxu0 %v10438_v12  ;;  %v6615_v12 = vld [vmem:[%s12967_s3 + $0x790] sm:$0xff]  ;;  %v10492_v53 = vpack.c.bf16 %v6620_v52, %v6618_v20  ;;  %v6621_v52 = vld [vmem:[%s12967_s3 + $0x7c0] sm:$0xff] }
 0x485   :  { %v10489_v57 = vpack.c.bf16 %v6615_v12, %v6613_v18  ;;  %v6624_v12 = vld [vmem:[%s12967_s3 + $0x7d8] sm:$0xff] }
 0x486   :  { %13336 = vst [vmem:[#allocation93_spill] sm:$0xff] %v10492_v53 }
 0x487   :  { %7645 = vmatpush1.bf16.msra.mxu0 %v10453_v35  ;;  %13335 = vst [vmem:[#allocation92_spill] sm:$0xff] %v10489_v57  ;;  %v6622_v35 = vld [vmem:[%s12967_s3 + $0x7c8] sm:$0xff] }
 0x488   :  { %7647 = vmatprep.subr.bf16.mxu0 %v10456_v58  ;;  %v6619_v58 = vld [vmem:[%s12967_s3 + $0x7b0] sm:$0xff]  ;;  %v10510_v18 = vpack.c.bf16 %v6624_v12, %v6622_v35  ;;  %v6625_v12 = vld [vmem:[%s12967_s3 + $0x7e0] sm:$0xff] }
 0x489   :  { %v10507_v20 = vpack.c.bf16 %v6619_v58, %v6617_v59  ;;  %v6628_v58 = vld [vmem:[%s12967_s3 + $0x7f8] sm:$0xff] }
 0x48a   :  { %13338 = vst [vmem:[#allocation95_spill] sm:$0xff] %v10510_v18 }
 0x48b   :  { %7649 = vmatpush1.bf16.msra.mxu0 %v10471_v26  ;;  %13337 = vst [vmem:[#allocation94_spill] sm:$0xff] %v10507_v20  ;;  %v6626_v26 = vld [vmem:[%s12967_s3 + $0x7e8] sm:$0xff] }
 0x48c   :  { %7651 = vmatprep.subr.bf16.mxu0 %v10474_v50  ;;  %v6623_v50 = vld [vmem:[%s12967_s3 + $0x7d0] sm:$0xff]  ;;  %v10528_v59 = vpack.c.bf16 %v6628_v58, %v6626_v26  ;;  %v6629_v58 = vld [vmem:[%s12967_s3 + $0x800] sm:$0xff] }
 0x48d   :  { %v10525_v35 = vpack.c.bf16 %v6623_v50, %v6621_v52  ;;  %v6632_v50 = vld [vmem:[%s12967_s3 + $0x818] sm:$0xff] }
 0x48e   :  { %13340 = vst [vmem:[#allocation97_spill] sm:$0xff] %v10528_v59 }
 0x48f   :  { %7653 = vmatpush1.bf16.msra.mxu0 %v10489_v57  ;;  %13339 = vst [vmem:[#allocation96_spill] sm:$0xff] %v10525_v35  ;;  %v6630_v57 = vld [vmem:[%s12967_s3 + $0x808] sm:$0xff] }
 0x490   :  { %7655 = vmatprep.subr.bf16.mxu0 %v10492_v53  ;;  %v6627_v53 = vld [vmem:[%s12967_s3 + $0x7f0] sm:$0xff]  ;;  %v10546_v52 = vpack.c.bf16 %v6632_v50, %v6630_v57  ;;  %v6529_v50 = vld [vmem:[%s12967_s3 + $0x4e0] sm:$0xff] }
 0x491   :  { %v10543_v26 = vpack.c.bf16 %v6627_v53, %v6625_v12  ;;  %v6532_v53 = vld [vmem:[%s12967_s3 + $0x4f8] sm:$0xff] }
 0x492   :  { %13342 = vst [vmem:[#allocation99_spill] sm:$0xff] %v10546_v52 }
 0x493   :  { %7657 = vmatpush1.bf16.msra.mxu0 %v10507_v20  ;;  %13341 = vst [vmem:[#allocation98_spill] sm:$0xff] %v10543_v26  ;;  %v6530_v20 = vld [vmem:[%s12967_s3 + $0x4e8] sm:$0xff] }
 0x494   :  { %7659 = vmatprep.subr.bf16.mxu0 %v10510_v18  ;;  %v6631_v18 = vld [vmem:[%s12967_s3 + $0x810] sm:$0xff]  ;;  %v10564_v12 = vpack.c.bf16 %v6532_v53, %v6530_v20  ;;  %v6533_v53 = vld [vmem:[%s12967_s3 + $0x500] sm:$0xff] }
 0x495   :  { %v10561_v57 = vpack.c.bf16 %v6631_v18, %v6629_v58  ;;  %v6536_v18 = vld [vmem:[%s12967_s3 + $0x518] sm:$0xff] }
 0x496   :  { %13343 = vst [vmem:[#allocation100_spill] sm:$0xff] %v10564_v12 }
 0x497   :  { %7661 = vmatpush1.bf16.msra.mxu0 %v10525_v35  ;;  %v6534_v35 = vld [vmem:[%s12967_s3 + $0x508] sm:$0xff] }
 0x498   :  { %7663 = vmatprep.subr.bf16.mxu0 %v10528_v59  ;;  %v6531_v59 = vld [vmem:[%s12967_s3 + $0x4f0] sm:$0xff]  ;;  %v10582_v58 = vpack.c.bf16 %v6536_v18, %v6534_v35  ;;  %v6537_v18 = vld [vmem:[%s12967_s3 + $0x520] sm:$0xff] }
 0x499   :  { %v10579_v20 = vpack.c.bf16 %v6531_v59, %v6529_v50  ;;  %v6540_v59 = vld [vmem:[%s12967_s3 + $0x538] sm:$0xff] }
 0x49b   :  { %7665 = vmatpush1.bf16.msra.mxu0 %v10543_v26  ;;  %v6538_v26 = vld [vmem:[%s12967_s3 + $0x528] sm:$0xff] }
 0x49c   :  { %7667 = vmatprep.subr.bf16.mxu0 %v10546_v52  ;;  %v6535_v52 = vld [vmem:[%s12967_s3 + $0x510] sm:$0xff]  ;;  %v10603_v50 = vpack.c.bf16 %v6540_v59, %v6538_v26 }
 0x49d   :  { %v10600_v35 = vpack.c.bf16 %v6535_v52, %v6533_v53  ;;  %v6541_v53 = vld [vmem:[%s12967_s3 + $0x540] sm:$0xff]  ;;  %v6543_v59 = vld [vmem:[%s12967_s3 + $0x550] sm:$0xff] }
 0x49e   :  { %13345 = vst [vmem:[#allocation102_spill] sm:$0xff] %v10603_v50 }
 0x49f   :  { %7669 = vmatpush1.bf16.msra.mxu0 %v10561_v57  ;;  %13344 = vst [vmem:[#allocation101_spill] sm:$0xff] %v10600_v35 }
 0x4a0   :  { %7671 = vmatprep.subr.bf16.mxu0 %v10564_v12  ;;  %v6539_v12 = vld [vmem:[%s12967_s3 + $0x530] sm:$0xff] }
 0x4a1   :  { %v10621_v26 = vpack.c.bf16 %v6539_v12, %v6537_v18  ;;  %v10639_v12 = vpack.c.bf16 %v6543_v59, %v6541_v53  ;;  %v6552_v53 = vld [vmem:[%s12967_s3 + $0x598] sm:$0xff] }
 0x4a2   :  { %2166 = vmatmul.mubr.f32.vlgmr.msra.gmra.mrb[18].mxu0 %v9808_v17  ;;  %v6544_v17 = vld [vmem:[%s12967_s3 + $0x558] sm:$0xff] }
 0x4a3   :  { %6894 = vmatprep.mubr.msk.f32.mxu0 %vm1668_vm9, %v9787_v49  ;;  %7673 = vmatpush1.bf16.msra.mxu0 %v10579_v20  ;;  %v6542_v49 = vld [vmem:[%s12967_s3 + $0x548] sm:$0xff]  ;;  %13346 = vst [vmem:[#allocation103_spill] sm:$0xff] %v10621_v26  ;;  %13348 = vst [vmem:[#allocation105_spill] sm:$0xff] %v10639_v12 }
 0x4a4   :  { %7675 = vmatprep.subr.bf16.mxu0 %v10582_v58  ;;  %v10624_v52 = vpack.c.bf16 %v6544_v17, %v6542_v49  ;;  %v6545_v49 = vld [vmem:[%s12967_s3 + $0x560] sm:$0xff]  ;;  %v6547_v17 = vld [vmem:[%s12967_s3 + $0x570] sm:$0xff] }
 0x4a5   :  { %v10657_v59 = vpack.c.bf16 %v6547_v17, %v6545_v49  ;;  %v6556_v49 = vld [vmem:[%s12967_s3 + $0x5b8] sm:$0xff] }
 0x4a6   :  { %2172 = vmatmul.mubr.f32.gmra.mrb[20].mxu0 %v9777_v27  ;;  %13347 = vst [vmem:[#allocation104_spill] sm:$0xff] %v10624_v52  ;;  %v6546_v27 = vld [vmem:[%s12967_s3 + $0x568] sm:$0xff] }
 0x4a7   :  { %7677 = vmatpush1.bf16.msra.mxu0 %v10600_v35  ;;  %6895 = vmatprep.mubr.msk.f32.mxu0 %vm1668_vm9, %v9758_v1  ;;  %v6548_v1 = vld [vmem:[%s12967_s3 + $0x578] sm:$0xff]  ;;  %13350 = vst [vmem:[#allocation107_spill] sm:$0xff] %v10657_v59 }
 0x4a8   :  { %7679 = vmatprep.subr.bf16.mxu0 %v10603_v50  ;;  %v10642_v18 = vpack.c.bf16 %v6548_v1, %v6546_v27  ;;  %v6550_v50 = vld [vmem:[%s12967_s3 + $0x588] sm:$0xff]  ;;  %v6549_v1 = vld [vmem:[%s12967_s3 + $0x580] sm:$0xff] }
 0x4a9   :  { %v10660_v27 = vpack.c.bf16 %v6552_v53, %v6550_v50  ;;  %v6553_v53 = vld [vmem:[%s12967_s3 + $0x5a0] sm:$0xff] }
 0x4aa   :  { %13349 = vst [vmem:[#allocation106_spill] sm:$0xff] %v10642_v18 }
 0x4ab   :  { %7681 = vmatpush1.bf16.msra.mxu0 %v10621_v26  ;;  %13351 = vst [vmem:[#allocation108_spill] sm:$0xff] %v10660_v27  ;;  %v6554_v26 = vld [vmem:[%s12967_s3 + $0x5a8] sm:$0xff] }
 0x4ac   :  { %7683 = vmatprep.subr.bf16.mxu0 %v10624_v52  ;;  %v6551_v52 = vld [vmem:[%s12967_s3 + $0x590] sm:$0xff]  ;;  %v10678_v17 = vpack.c.bf16 %v6556_v49, %v6554_v26  ;;  %v6557_v49 = vld [vmem:[%s12967_s3 + $0x5c0] sm:$0xff] }
 0x4ad   :  { %v10675_v50 = vpack.c.bf16 %v6551_v52, %v6549_v1  ;;  %v6560_v52 = vld [vmem:[%s12967_s3 + $0x5d8] sm:$0xff] }
 0x4ae   :  { %13353 = vst [vmem:[#allocation110_spill] sm:$0xff] %v10678_v17 }
 0x4af   :  { %7685 = vmatpush1.bf16.msra.mxu0 %v10639_v12  ;;  %13352 = vst [vmem:[#allocation109_spill] sm:$0xff] %v10675_v50  ;;  %v6558_v12 = vld [vmem:[%s12967_s3 + $0x5c8] sm:$0xff] }
 0x4b0   :  { %7687 = vmatprep.subr.bf16.mxu0 %v10642_v18  ;;  %v6555_v18 = vld [vmem:[%s12967_s3 + $0x5b0] sm:$0xff]  ;;  %v10696_v1 = vpack.c.bf16 %v6560_v52, %v6558_v12  ;;  %v6561_v52 = vld [vmem:[%s12967_s3 + $0x5e0] sm:$0xff] }
 0x4b1   :  { %v10693_v26 = vpack.c.bf16 %v6555_v18, %v6553_v53  ;;  %v6564_v18 = vld [vmem:[%s12967_s3 + $0x5f8] sm:$0xff] }
 0x4b2   :  { %13355 = vst [vmem:[#allocation112_spill] sm:$0xff] %v10696_v1 }
 0x4b3   :  { %7689 = vmatpush1.bf16.msra.mxu0 %v10657_v59  ;;  %13354 = vst [vmem:[#allocation111_spill] sm:$0xff] %v10693_v26  ;;  %v6562_v59 = vld [vmem:[%s12967_s3 + $0x5e8] sm:$0xff] }
 0x4b4   :  { %7691 = vmatprep.subr.bf16.mxu0 %v10660_v27  ;;  %v6559_v27 = vld [vmem:[%s12967_s3 + $0x5d0] sm:$0xff]  ;;  %v10714_v53 = vpack.c.bf16 %v6564_v18, %v6562_v59  ;;  %v6565_v18 = vld [vmem:[%s12967_s3 + $0x600] sm:$0xff] }
 0x4b5   :  { %v10711_v12 = vpack.c.bf16 %v6559_v27, %v6557_v49  ;;  %v6568_v27 = vld [vmem:[%s12967_s3 + $0x618] sm:$0xff] }
 0x4b6   :  { %13357 = vst [vmem:[#allocation114_spill] sm:$0xff] %v10714_v53 }
 0x4b7   :  { %7693 = vmatpush1.bf16.msra.mxu0 %v10675_v50  ;;  %13356 = vst [vmem:[#allocation113_spill] sm:$0xff] %v10711_v12  ;;  %v6566_v50 = vld [vmem:[%s12967_s3 + $0x608] sm:$0xff] }
 0x4b8   :  { %7695 = vmatprep.subr.bf16.mxu0 %v10678_v17  ;;  %v6563_v17 = vld [vmem:[%s12967_s3 + $0x5f0] sm:$0xff]  ;;  %v10732_v49 = vpack.c.bf16 %v6568_v27, %v6566_v50  ;;  %v6569_v27 = vld [vmem:[%s12967_s3 + $0x620] sm:$0xff] }
 0x4b9   :  { %v10729_v59 = vpack.c.bf16 %v6563_v17, %v6561_v52  ;;  %v6572_v17 = vld [vmem:[%s12967_s3 + $0x638] sm:$0xff] }
 0x4ba   :  { %13359 = vst [vmem:[#allocation116_spill] sm:$0xff] %v10732_v49 }
 0x4bb   :  { %7697 = vmatpush1.bf16.msra.mxu0 %v10693_v26  ;;  %13358 = vst [vmem:[#allocation115_spill] sm:$0xff] %v10729_v59  ;;  %v6570_v26 = vld [vmem:[%s12967_s3 + $0x628] sm:$0xff] }
 0x4bc   :  { %7699 = vmatprep.subr.bf16.mxu0 %v10696_v1  ;;  %v6567_v1 = vld [vmem:[%s12967_s3 + $0x610] sm:$0xff]  ;;  %v10750_v52 = vpack.c.bf16 %v6572_v17, %v6570_v26  ;;  %v6573_v17 = vld [vmem:[%s12967_s3 + $0x640] sm:$0xff] }
 0x4bd   :  { %v10747_v50 = vpack.c.bf16 %v6567_v1, %v6565_v18  ;;  %v6576_v1 = vld [vmem:[%s12967_s3 + $0x658] sm:$0xff] }
 0x4be   :  { %13361 = vst [vmem:[#allocation118_spill] sm:$0xff] %v10750_v52 }
 0x4bf   :  { %7701 = vmatpush1.bf16.msra.mxu0 %v10711_v12  ;;  %13360 = vst [vmem:[#allocation117_spill] sm:$0xff] %v10747_v50  ;;  %v6574_v12 = vld [vmem:[%s12967_s3 + $0x648] sm:$0xff] }
 0x4c0   :  { %7703 = vmatprep.subr.bf16.mxu0 %v10714_v53  ;;  %v6571_v53 = vld [vmem:[%s12967_s3 + $0x630] sm:$0xff]  ;;  %v10768_v18 = vpack.c.bf16 %v6576_v1, %v6574_v12  ;;  %v6577_v1 = vld [vmem:[%s12967_s3 + $0x660] sm:$0xff] }
 0x4c1   :  { %v10765_v26 = vpack.c.bf16 %v6571_v53, %v6569_v27  ;;  %v6580_v53 = vld [vmem:[%s12967_s3 + $0x678] sm:$0xff] }
 0x4c2   :  { %13363 = vst [vmem:[#allocation120_spill] sm:$0xff] %v10768_v18 }
 0x4c3   :  { %7705 = vmatpush1.bf16.msra.mxu0 %v10729_v59  ;;  %13362 = vst [vmem:[#allocation119_spill] sm:$0xff] %v10765_v26  ;;  %v6578_v59 = vld [vmem:[%s12967_s3 + $0x668] sm:$0xff] }
 0x4c4   :  { %7707 = vmatprep.subr.bf16.mxu0 %v10732_v49  ;;  %v6575_v49 = vld [vmem:[%s12967_s3 + $0x650] sm:$0xff]  ;;  %v10786_v27 = vpack.c.bf16 %v6580_v53, %v6578_v59  ;;  %v6633_v53 = vld [vmem:[%s12967_s3 + $0x820] sm:$0xff] }
 0x4c5   :  { %v10783_v12 = vpack.c.bf16 %v6575_v49, %v6573_v17  ;;  %v6636_v49 = vld [vmem:[%s12967_s3 + $0x838] sm:$0xff] }
 0x4c6   :  { %13365 = vst [vmem:[#allocation122_spill] sm:$0xff] %v10786_v27 }
 0x4c7   :  { %7709 = vmatpush1.bf16.msra.mxu0 %v10747_v50  ;;  %13364 = vst [vmem:[#allocation121_spill] sm:$0xff] %v10783_v12  ;;  %v6634_v50 = vld [vmem:[%s12967_s3 + $0x828] sm:$0xff] }
 0x4c8   :  { %7711 = vmatprep.subr.bf16.mxu0 %v10750_v52  ;;  %v6579_v52 = vld [vmem:[%s12967_s3 + $0x670] sm:$0xff]  ;;  %v10804_v17 = vpack.c.bf16 %v6636_v49, %v6634_v50  ;;  %v6637_v49 = vld [vmem:[%s12967_s3 + $0x840] sm:$0xff] }
 0x4c9   :  { %v10801_v59 = vpack.c.bf16 %v6579_v52, %v6577_v1  ;;  %v6640_v52 = vld [vmem:[%s12967_s3 + $0x858] sm:$0xff] }
 0x4ca   :  { %13367 = vst [vmem:[#allocation124_spill] sm:$0xff] %v10804_v17 }
 0x4cb   :  { %7713 = vmatpush1.bf16.msra.mxu0 %v10765_v26  ;;  %13366 = vst [vmem:[#allocation123_spill] sm:$0xff] %v10801_v59  ;;  %v6638_v26 = vld [vmem:[%s12967_s3 + $0x848] sm:$0xff] }
 0x4cc   :  { %7715 = vmatprep.subr.bf16.mxu0 %v10768_v18  ;;  %v6635_v18 = vld [vmem:[%s12967_s3 + $0x830] sm:$0xff]  ;;  %v10822_v1 = vpack.c.bf16 %v6640_v52, %v6638_v26  ;;  %v6641_v52 = vld [vmem:[%s12967_s3 + $0x860] sm:$0xff] }
 0x4cd   :  { %v10819_v50 = vpack.c.bf16 %v6635_v18, %v6633_v53  ;;  %v6644_v18 = vld [vmem:[%s12967_s3 + $0x878] sm:$0xff] }
 0x4ce   :  { %13369 = vst [vmem:[#allocation126_spill] sm:$0xff] %v10822_v1 }
 0x4cf   :  { %7717 = vmatpush1.bf16.msra.mxu0 %v10783_v12  ;;  %13368 = vst [vmem:[#allocation125_spill] sm:$0xff] %v10819_v50  ;;  %v6642_v12 = vld [vmem:[%s12967_s3 + $0x868] sm:$0xff] }
 0x4d0   :  { %7719 = vmatprep.subr.bf16.mxu0 %v10786_v27  ;;  %v6639_v27 = vld [vmem:[%s12967_s3 + $0x850] sm:$0xff]  ;;  %v10843_v53 = vpack.c.bf16 %v6644_v18, %v6642_v12 }
 0x4d1   :  { %v10840_v26 = vpack.c.bf16 %v6639_v27, %v6637_v49  ;;  %v6645_v49 = vld [vmem:[%s12967_s3 + $0x880] sm:$0xff]  ;;  %v6647_v18 = vld [vmem:[%s12967_s3 + $0x890] sm:$0xff] }
 0x4d2   :  { %13371 = vst [vmem:[#allocation128_spill] sm:$0xff] %v10843_v53 }
 0x4d3   :  { %7721 = vmatpush1.bf16.msra.mxu0 %v10801_v59  ;;  %13370 = vst [vmem:[#allocation127_spill] sm:$0xff] %v10840_v26 }
 0x4d4   :  { %7723 = vmatprep.subr.bf16.mxu0 %v10804_v17  ;;  %v6643_v17 = vld [vmem:[%s12967_s3 + $0x870] sm:$0xff] }
 0x4d5   :  { %v10861_v12 = vpack.c.bf16 %v6643_v17, %v6641_v52  ;;  %v10879_v17 = vpack.c.bf16 %v6647_v18, %v6645_v49  ;;  %v6656_v49 = vld [vmem:[%s12967_s3 + $0x8d8] sm:$0xff] }
 0x4d6   :  { %2243 = vmatmul.mubr.f32.vlgmr.msra.gmra.mrb[18].mxu0 %v9753_v25  ;;  %v6646_v25 = vld [vmem:[%s12967_s3 + $0x888] sm:$0xff] }
 0x4d7   :  { %6896 = vmatprep.mubr.msk.f32.mxu0 %vm1668_vm9, %v9768_v14  ;;  %7725 = vmatpush1.bf16.msra.mxu0 %v10819_v50  ;;  %v6648_v14 = vld [vmem:[%s12967_s3 + $0x898] sm:$0xff]  ;;  %13372 = vst [vmem:[#allocation129_spill] sm:$0xff] %v10861_v12  ;;  %13374 = vst [vmem:[#allocation131_spill] sm:$0xff] %v10879_v17 }
 0x4d8   :  { %7727 = vmatprep.subr.bf16.mxu0 %v10822_v1  ;;  %v10864_v27 = vpack.c.bf16 %v6648_v14, %v6646_v25  ;;  %v6649_v25 = vld [vmem:[%s12967_s3 + $0x8a0] sm:$0xff]  ;;  %v6651_v14 = vld [vmem:[%s12967_s3 + $0x8b0] sm:$0xff] }
 0x4d9   :  { %v10897_v18 = vpack.c.bf16 %v6651_v14, %v6649_v25  ;;  %v6660_v25 = vld [vmem:[%s12967_s3 + $0x8f8] sm:$0xff] }
 0x4da   :  { %2249 = vmatmul.mubr.f32.gmra.mrb[20].mxu0 %v9763_v31  ;;  %13373 = vst [vmem:[#allocation130_spill] sm:$0xff] %v10864_v27  ;;  %v6650_v31 = vld [vmem:[%s12967_s3 + $0x8a8] sm:$0xff] }
 0x4db   :  { %7729 = vmatpush1.bf16.msra.mxu0 %v10840_v26  ;;  %6897 = vmatprep.mubr.msk.f32.mxu0 %vm1668_vm9, %v10084_v16  ;;  %v6652_v16 = vld [vmem:[%s12967_s3 + $0x8b8] sm:$0xff]  ;;  %13376 = vst [vmem:[#allocation133_spill] sm:$0xff] %v10897_v18 }
 0x4dc   :  { %7731 = vmatprep.subr.bf16.mxu0 %v10843_v53  ;;  %v10882_v52 = vpack.c.bf16 %v6652_v16, %v6650_v31  ;;  %v6654_v53 = vld [vmem:[%s12967_s3 + $0x8c8] sm:$0xff]  ;;  %v6653_v16 = vld [vmem:[%s12967_s3 + $0x8c0] sm:$0xff] }
 0x4dd   :  { %v10900_v31 = vpack.c.bf16 %v6656_v49, %v6654_v53  ;;  %v6657_v49 = vld [vmem:[%s12967_s3 + $0x8e0] sm:$0xff] }
 0x4de   :  { %13375 = vst [vmem:[#allocation132_spill] sm:$0xff] %v10882_v52 }
 0x4df   :  { %7733 = vmatpush1.bf16.msra.mxu0 %v10861_v12  ;;  %13377 = vst [vmem:[#allocation134_spill] sm:$0xff] %v10900_v31  ;;  %v6658_v12 = vld [vmem:[%s12967_s3 + $0x8e8] sm:$0xff] }
 0x4e0   :  { %7735 = vmatprep.subr.bf16.mxu0 %v10864_v27  ;;  %v6655_v27 = vld [vmem:[%s12967_s3 + $0x8d0] sm:$0xff]  ;;  %v10918_v14 = vpack.c.bf16 %v6660_v25, %v6658_v12  ;;  %v6661_v25 = vld [vmem:[%s12967_s3 + $0x900] sm:$0xff] }
 0x4e1   :  { %v10915_v53 = vpack.c.bf16 %v6655_v27, %v6653_v16  ;;  %v6664_v27 = vld [vmem:[%s12967_s3 + $0x918] sm:$0xff] }
 0x4e2   :  { %13379 = vst [vmem:[#allocation136_spill] sm:$0xff] %v10918_v14 }
 0x4e3   :  { %7737 = vmatpush1.bf16.msra.mxu0 %v10879_v17  ;;  %13378 = vst [vmem:[#allocation135_spill] sm:$0xff] %v10915_v53  ;;  %v6662_v17 = vld [vmem:[%s12967_s3 + $0x908] sm:$0xff] }
 0x4e4   :  { %7739 = vmatprep.subr.bf16.mxu0 %v10882_v52  ;;  %v6659_v52 = vld [vmem:[%s12967_s3 + $0x8f0] sm:$0xff]  ;;  %v10936_v16 = vpack.c.bf16 %v6664_v27, %v6662_v17  ;;  %v6665_v27 = vld [vmem:[%s12967_s3 + $0x920] sm:$0xff] }
 0x4e5   :  { %v10933_v12 = vpack.c.bf16 %v6659_v52, %v6657_v49  ;;  %v6668_v52 = vld [vmem:[%s12967_s3 + $0x938] sm:$0xff] }
 0x4e6   :  { %13381 = vst [vmem:[#allocation138_spill] sm:$0xff] %v10936_v16 }
 0x4e7   :  { %7741 = vmatpush1.bf16.msra.mxu0 %v10897_v18  ;;  %13380 = vst [vmem:[#allocation137_spill] sm:$0xff] %v10933_v12  ;;  %v6666_v18 = vld [vmem:[%s12967_s3 + $0x928] sm:$0xff] }
 0x4e8   :  { %7743 = vmatprep.subr.bf16.mxu0 %v10900_v31  ;;  %v6663_v31 = vld [vmem:[%s12967_s3 + $0x910] sm:$0xff]  ;;  %v10954_v49 = vpack.c.bf16 %v6668_v52, %v6666_v18  ;;  %v6669_v52 = vld [vmem:[%s12967_s3 + $0x940] sm:$0xff] }
 0x4e9   :  { %v10951_v17 = vpack.c.bf16 %v6663_v31, %v6661_v25  ;;  %v6672_v31 = vld [vmem:[%s12967_s3 + $0x958] sm:$0xff] }
 0x4ea   :  { %13383 = vst [vmem:[#allocation140_spill] sm:$0xff] %v10954_v49 }
 0x4eb   :  { %7745 = vmatpush1.bf16.msra.mxu0 %v10915_v53  ;;  %13382 = vst [vmem:[#allocation139_spill] sm:$0xff] %v10951_v17  ;;  %v6670_v53 = vld [vmem:[%s12967_s3 + $0x948] sm:$0xff] }
 0x4ec   :  { %7747 = vmatprep.subr.bf16.mxu0 %v10918_v14  ;;  %v6667_v14 = vld [vmem:[%s12967_s3 + $0x930] sm:$0xff]  ;;  %v10972_v25 = vpack.c.bf16 %v6672_v31, %v6670_v53  ;;  %v6673_v31 = vld [vmem:[%s12967_s3 + $0x960] sm:$0xff] }
 0x4ed   :  { %v10969_v18 = vpack.c.bf16 %v6667_v14, %v6665_v27  ;;  %v6676_v14 = vld [vmem:[%s12967_s3 + $0x978] sm:$0xff] }
 0x4ee   :  { %13385 = vst [vmem:[#allocation142_spill] sm:$0xff] %v10972_v25 }
 0x4ef   :  { %7749 = vmatpush1.bf16.msra.mxu0 %v10933_v12  ;;  %13384 = vst [vmem:[#allocation141_spill] sm:$0xff] %v10969_v18  ;;  %v6674_v12 = vld [vmem:[%s12967_s3 + $0x968] sm:$0xff] }
 0x4f0   :  { %7751 = vmatprep.subr.bf16.mxu0 %v10936_v16  ;;  %v6671_v16 = vld [vmem:[%s12967_s3 + $0x950] sm:$0xff]  ;;  %v10990_v27 = vpack.c.bf16 %v6676_v14, %v6674_v12  ;;  %v6677_v14 = vld [vmem:[%s12967_s3 + $0x980] sm:$0xff] }
 0x4f1   :  { %v10987_v53 = vpack.c.bf16 %v6671_v16, %v6669_v52  ;;  %v6680_v16 = vld [vmem:[%s12967_s3 + $0x998] sm:$0xff] }
 0x4f2   :  { %13387 = vst [vmem:[#allocation144_spill] sm:$0xff] %v10990_v27 }
 0x4f3   :  { %7753 = vmatpush1.bf16.msra.mxu0 %v10951_v17  ;;  %13386 = vst [vmem:[#allocation143_spill] sm:$0xff] %v10987_v53  ;;  %v6678_v17 = vld [vmem:[%s12967_s3 + $0x988] sm:$0xff] }
 0x4f4   :  { %7755 = vmatprep.subr.bf16.mxu0 %v10954_v49  ;;  %v6675_v49 = vld [vmem:[%s12967_s3 + $0x970] sm:$0xff]  ;;  %v11008_v52 = vpack.c.bf16 %v6680_v16, %v6678_v17  ;;  %v6681_v16 = vld [vmem:[%s12967_s3 + $0x9a0] sm:$0xff] }
 0x4f5   :  { %v11005_v12 = vpack.c.bf16 %v6675_v49, %v6673_v31  ;;  %v6684_v49 = vld [vmem:[%s12967_s3 + $0x9b8] sm:$0xff] }
 0x4f6   :  { %13389 = vst [vmem:[#allocation146_spill] sm:$0xff] %v11008_v52 }
 0x4f7   :  { %7757 = vmatpush1.bf16.msra.mxu0 %v10969_v18  ;;  %13388 = vst [vmem:[#allocation145_spill] sm:$0xff] %v11005_v12  ;;  %v6682_v18 = vld [vmem:[%s12967_s3 + $0x9a8] sm:$0xff] }
 0x4f8   :  { %7759 = vmatprep.subr.bf16.mxu0 %v10972_v25  ;;  %v6679_v25 = vld [vmem:[%s12967_s3 + $0x990] sm:$0xff]  ;;  %v11026_v31 = vpack.c.bf16 %v6684_v49, %v6682_v18 }
 0x4f9   :  { %v11023_v17 = vpack.c.bf16 %v6679_v25, %v6677_v14  ;;  %v429_v14 = vld [vmem:[%s12969_s5 + $0x10] sm:$0xff] }
 0x4fa   :  { %13391 = vst [vmem:[#allocation148_spill] sm:$0xff] %v11026_v31 }
 0x4fb   :  { %7761 = vmatpush1.bf16.msra.mxu0 %v10987_v53  ;;  %13390 = vst [vmem:[#allocation147_spill] sm:$0xff] %v11023_v17 }
 0x4fc   :  { %7763 = vmatprep.subr.bf16.mxu0 %v10990_v27  ;;  %v6683_v27 = vld [vmem:[%s12967_s3 + $0x9b0] sm:$0xff] }
 0x4fd   :  { %v11035_v53 = vpack.c.bf16 %v6683_v27, %v6681_v16  ;;  %v430_v16 = vld [vmem:[%s12969_s5 + $0x18] sm:$0xff] }
 0x4ff   :  { %7765 = vmatpush1.bf16.msra.mxu0 %v11005_v12  ;;  %13392 = vst [vmem:[#allocation149_spill] sm:$0xff] %v11035_v53 }
 0x500   :  { %7767 = vmatprep.subr.bf16.mxu0 %v11008_v52 }
 0x503   :  { %7769 = vmatpush1.bf16.msra.mxu0 %v11023_v17  ;;  %v431_v17 = vld [vmem:[%s12969_s5 + $0x20] sm:$0xff] }
 0x504   :  { %7771 = vmatprep.subr.bf16.mxu0 %v11026_v31  ;;  %v11071_v31 = vpack.c.bf16 %v430_v16, %v429_v14  ;;  %v433_v14 = vld [vmem:[%s12969_s5 + $0x30] sm:$0xff]  ;;  %v434_v16 = vld [vmem:[%s12969_s5 + $0x38] sm:$0xff] }
 0x506   :  { %13394 = vst [vmem:[#allocation151_spill] sm:$0xff] %v11071_v31 }
 0x507   :  { %7773 = vmatpush1.bf16.msra.mxu0 %v11035_v53 }
 0x50a   :  { %2320 = vmatmul.mubr.f32.vlgmr.msra.gmra.mrb[18].mxu0 %v10273_v4  ;;  %v13151_v4 = vmov 0.0|0.0  }
 0x50b   :  { %6898 = vmatprep.mubr.msk.f32.mxu0 %vm1668_vm9, %v10058_v7  ;;  %v427_v7 = vld [vmem:[%s12969_s5] sm:$0xff]  ;;  %7822 = vmatprep.subr.bf16.mxu0 %v13151_v4 }
 0x50e   :  { %2326 = vmatmul.mubr.f32.gmra.mrb[20].mxu0 %v10267_v60  ;;  %v428_v60 = vld [vmem:[%s12969_s5 + $0x8] sm:$0xff] }
 0x50f   :  { %v11062_v53 = vpack.c.bf16 %v428_v60, %v427_v7  ;;  %v432_v7 = vld [vmem:[%s12969_s5 + $0x28] sm:$0xff] }
 0x510   :  { %v11081_v60 = vpack.c.bf16 %v432_v7, %v431_v17  ;;  %v435_v17 = vld [vmem:[%s12969_s5 + $0x40] sm:$0xff]  ;;  %v436_v7 = vld [vmem:[%s12969_s5 + $0x48] sm:$0xff] }
 0x511   :  { %13393 = vst [vmem:[#allocation150_spill] sm:$0xff] %v11062_v53  ;;  %7824 = vmatpush1.bf16.msra.mxu0 %v11062_v53  ;;  %v11091_v53 = vpack.c.bf16 %v434_v16, %v433_v14  ;;  %v437_v14 = vld [vmem:[%s12969_s5 + $0x50] sm:$0xff]  ;;  %v438_v16 = vld [vmem:[%s12969_s5 + $0x58] sm:$0xff] }
 0x512   :  { %7825 = vmatprep.subr.bf16.mxu0 %v13151_v4  ;;  %13395 = vst [vmem:[#allocation152_spill] sm:$0xff] %v11081_v60 }
 0x513   :  { %13396 = vst [vmem:[#allocation153_spill] sm:$0xff] %v11091_v53 }
 0x515   :  { %7827 = vmatpush1.bf16.msra.mxu0 %v11071_v31  ;;  %v11101_v31 = vpack.c.bf16 %v436_v7, %v435_v17  ;;  %v439_v17 = vld [vmem:[%s12969_s5 + $0x60] sm:$0xff]  ;;  %v440_v7 = vld [vmem:[%s12969_s5 + $0x68] sm:$0xff] }
 0x516   :  { %7828 = vmatprep.subr.bf16.mxu0 %v13151_v4 }
 0x517   :  { %13397 = vst [vmem:[#allocation154_spill] sm:$0xff] %v11101_v31 }
 0x519   :  { %7830 = vmatpush1.bf16.msra.mxu0 %v11081_v60  ;;  %v11111_v60 = vpack.c.bf16 %v438_v16, %v437_v14  ;;  %v441_v14 = vld [vmem:[%s12969_s5 + $0x70] sm:$0xff]  ;;  %v442_v16 = vld [vmem:[%s12969_s5 + $0x78] sm:$0xff] }
 0x51a   :  { %7831 = vmatprep.subr.bf16.mxu0 %v13151_v4 }
 0x51b   :  { %13398 = vst [vmem:[#allocation155_spill] sm:$0xff] %v11111_v60 }
 0x51d   :  { %7833 = vmatpush1.bf16.msra.mxu0 %v11091_v53  ;;  %v11121_v53 = vpack.c.bf16 %v440_v7, %v439_v17  ;;  %v443_v17 = vld [vmem:[%s12969_s5 + $0x80] sm:$0xff]  ;;  %v444_v7 = vld [vmem:[%s12969_s5 + $0x88] sm:$0xff] }
 0x51e   :  { %7834 = vmatprep.subr.bf16.mxu0 %v13151_v4 }
 0x51f   :  { %13399 = vst [vmem:[#allocation156_spill] sm:$0xff] %v11121_v53 }
 0x521   :  { %7836 = vmatpush1.bf16.msra.mxu0 %v11101_v31  ;;  %v11131_v31 = vpack.c.bf16 %v442_v16, %v441_v14 }
 0x522   :  { %7837 = vmatprep.subr.bf16.mxu0 %v13151_v4 }
 0x523   :  { %13400 = vst [vmem:[#allocation157_spill] sm:$0xff] %v11131_v31 }
 0x525   :  { %7839 = vmatpush1.bf16.msra.mxu0 %v11111_v60  ;;  %v11141_v60 = vpack.c.bf16 %v444_v7, %v443_v17 }
 0x526   :  { %7840 = vmatprep.subr.bf16.mxu0 %v13151_v4 }
 0x527   :  { %13401 = vst [vmem:[#allocation158_spill] sm:$0xff] %v11141_v60 }
 0x529   :  { %7842 = vmatpush1.bf16.msra.mxu0 %v11121_v53 }
 0x52a   :  { %7843 = vmatprep.subr.bf16.mxu0 %v13151_v4 }
 0x52d   :  { %7845 = vmatpush1.bf16.msra.mxu0 %v11131_v31 }
 0x52e   :  { %7846 = vmatprep.subr.bf16.mxu0 %v13151_v4 }
 0x531   :  { %7848 = vmatpush1.bf16.msra.mxu0 %v11141_v60 }
 0x532   :  { %7849 = vmatprep.subr.bf16.mxu0 %v13151_v4 }
 0x541   :  { %v11043_v18 = vpop.f32.mrb[20].mxu1  ;;  %v11045_v25 = vpop.f32.mrb[16].mxu0 }
 0x542   :  { %v11049_v27 = vpop.f32.mrb[21].mxu1  ;;  %v11051_v49 = vpop.f32.mrb[17].mxu0 }
 0x5dd   :  { %v2321_v14 = vpop.f32.mrb[18].mxu0 }
 0x5de   :  { %v2323_v16 = vpop.f32.mrb[19].mxu0  ;;  %v2336_v53 = vadd.f32 %v2321_v14, %v10285_v54  ;;  %v6693_v14 = vld [vmem:[%s12969_s5 + $0x100] sm:$0xff] }
 0x5df   :  { %v2337_v52 = vadd.f32 %v2323_v16, %v10289_v34  ;;  %v6694_v16 = vld [vmem:[%s12969_s5 + $0x108] sm:$0xff] }
 0x5e0   :  { %v2340_v17 = vmax.f32 %v2336_v53, 0.0  ;;  %v6690_v53 = vld [vmem:[%s12969_s5 + $0xe8] sm:$0xff] }
 0x5e1   :  { %v2327_v12 = vpop.f32.mrb[20].mxu0  ;;  %v2341_v50 = vmax.f32 %v2337_v52, 0.0 }
 0x5e2   :  { %v2338_v26 = vadd.f32 %v2327_v12, %v10285_v54  ;;  %v2329_v1 = vpop.f32.mrb[21].mxu0  ;;  %v6685_v12 = vld [vmem:[%s12969_s5 + $0xc0] sm:$0xff] }
 0x5e3   :  { %v2339_v31 = vadd.f32 %v2329_v1, %v10289_v34  ;;  %v6686_v1 = vld [vmem:[%s12969_s5 + $0xc8] sm:$0xff] }
 0x5e4   :  { %v2342_v7 = vmax.f32 %v2338_v26, 0.0  ;;  %v6688_v26 = vld [vmem:[%s12969_s5 + $0xd8] sm:$0xff] }
 0x5e5   :  { %v2343_v59 = vmax.f32 %v2339_v31, 0.0  ;;  %v6692_v31 = vld [vmem:[%s12969_s5 + $0xf8] sm:$0xff] }
 0x5e6   :  { %v7777_v35 = vpack.c.bf16 %v2342_v7, %v2340_v17  ;;  %v11209_v17 = vpack.c.bf16 %v6694_v16, %v6693_v14  ;;  %v6695_v7 = vld [vmem:[%s12969_s5 + $0x110] sm:$0xff]  ;;  %v6701_v14 = vld [vmem:[%s12969_s5 + $0x140] sm:$0xff]  ;;  %v6702_v16 = vld [vmem:[%s12969_s5 + $0x148] sm:$0xff] }
 0x5e7   :  { %v7774_v60 = vpack.c.bf16 %v2343_v59, %v2341_v50  ;;  %v11167_v59 = vpack.c.bf16 %v6686_v1, %v6685_v12  ;;  %v6687_v50 = vld [vmem:[%s12969_s5 + $0xd0] sm:$0xff]  ;;  %v6696_v12 = vld [vmem:[%s12969_s5 + $0x118] sm:$0xff] }
 0x5e8   :  { %13406 = vst [vmem:[#allocation163_spill] sm:$0xff] %v11209_v17  ;;  %v11219_v1 = vpack.c.bf16 %v6696_v12, %v6695_v7  ;;  %v11249_v7 = vpack.c.bf16 %v6702_v16, %v6701_v14  ;;  %v445_v12 = vld [vmem:[%s12969_s5 + $0x90] sm:$0xff]  ;;  %v447_v16 = vld [vmem:[%s12969_s5 + $0xa0] sm:$0xff] }
 0x5e9   :  { %7776 = vmatprep.subr.msk.bf16.mxu1 %vm10302_vm11, %v7774_v60  ;;  %13402 = vst [vmem:[#allocation159_spill] sm:$0xff] %v11167_v59 }
 0x5ea   :  { %7779 = vmatpush1.bf16.msk.msra.mxu1 %vm10302_vm11, %v7777_v35  ;;  %13407 = vst [vmem:[#allocation164_spill] sm:$0xff] %v11219_v1  ;;  %13410 = vst [vmem:[#allocation167_spill] sm:$0xff] %v11249_v7 }
 0x5eb   :  { %7782 = vmatprep.subr.msk.bf16.mxu1 %vm10302_vm11, %v7774_v60 }
 0x5ed   :  { %6901 = vmatmul.mubr.msk.f32.vlgmr.msra.gmra.mrb[22].mxu1 %vm1943_vm12, %v10331_v5  ;;  %v11179_v5 = vpack.c.bf16 %v6688_v26, %v6687_v50  ;;  %v6697_v50 = vld [vmem:[%s12969_s5 + $0x120] sm:$0xff]  ;;  %v6698_v26 = vld [vmem:[%s12969_s5 + $0x128] sm:$0xff] }
 0x5ee   :  { %7785 = vmatpush1.bf16.msk.msra.mxu1 %vm10302_vm11, %v7777_v35  ;;  %2485 = vmatprep.mubr.f32.mxu1 %v13251_v40  ;;  %v6689_v35 = vld [vmem:[%s12969_s5 + $0xe0] sm:$0xff] }
 0x5ef   :  { %7786 = vmatprep.subr.bf16.mxu1 %v13151_v4  ;;  %13403 = vst [vmem:[#allocation160_spill] sm:$0xff] %v11179_v5  ;;  %v11189_v52 = vpack.c.bf16 %v6690_v53, %v6689_v35  ;;  %v11229_v35 = vpack.c.bf16 %v6698_v26, %v6697_v50  ;;  %v6699_v53 = vld [vmem:[%s12969_s5 + $0x130] sm:$0xff]  ;;  %v446_v50 = vld [vmem:[%s12969_s5 + $0x98] sm:$0xff] }
 0x5f0   :  { %v11260_v26 = vpack.c.bf16 %v446_v50, %v445_v12  ;;  %v448_v12 = vld [vmem:[%s12969_s5 + $0xa8] sm:$0xff] }
 0x5f1   :  { %6904 = vmatmul.mubr.msk.f32.vlgmr.msra.gmra.mrb[24].mxu1 %vm1943_vm12, %v10336_v13  ;;  %13404 = vst [vmem:[#allocation161_spill] sm:$0xff] %v11189_v52  ;;  %v6691_v13 = vld [vmem:[%s12969_s5 + $0xf0] sm:$0xff]  ;;  %13408 = vst [vmem:[#allocation165_spill] sm:$0xff] %v11229_v35  ;;  %v11280_v50 = vpack.c.bf16 %v448_v12, %v447_v16  ;;  %v450_v12 = vld [vmem:[%s12969_s5 + $0xb8] sm:$0xff] }
 0x5f2   :  { %7788 = vmatpush1.bf16.msra.mxu1 %v11167_v59  ;;  %v11199_v60 = vpack.c.bf16 %v6692_v31, %v6691_v13  ;;  %v6700_v13 = vld [vmem:[%s12969_s5 + $0x138] sm:$0xff]  ;;  %13411 = vst [vmem:[#allocation168_spill] sm:$0xff] %v11260_v26  ;;  %7851 = vmatpush1.bf16.msra.mxu0 %v11260_v26  ;;  %v449_v16 = vld [vmem:[%s12969_s5 + $0xb0] sm:$0xff] }
 0x5f3   :  { %7789 = vmatprep.subr.bf16.mxu1 %v13151_v4  ;;  %v11239_v31 = vpack.c.bf16 %v6700_v13, %v6699_v53  ;;  %v6703_v53 = vld [vmem:[%s12969_s5 + $0x150] sm:$0xff]  ;;  %v6704_v13 = vld [vmem:[%s12969_s5 + $0x158] sm:$0xff]  ;;  %7852 = vmatprep.subr.bf16.mxu0 %v13151_v4  ;;  %13413 = vst [vmem:[#allocation170_spill] sm:$0xff] %v11280_v50 }
 0x5f4   :  { %13405 = vst [vmem:[#allocation162_spill] sm:$0xff] %v11199_v60  ;;  %v11268_v14 = vpack.c.bf16 %v6704_v13, %v6703_v53  ;;  %v6705_v53 = vld [vmem:[%s12969_s5 + $0x160] sm:$0xff]  ;;  %v6706_v13 = vld [vmem:[%s12969_s5 + $0x168] sm:$0xff] }
 0x5f5   :  { %13409 = vst [vmem:[#allocation166_spill] sm:$0xff] %v11239_v31 }
 0x5f6   :  { %7791 = vmatpush1.bf16.msra.mxu1 %v11179_v5  ;;  %13412 = vst [vmem:[#allocation169_spill] sm:$0xff] %v11268_v14  ;;  %7854 = vmatpush1.bf16.msra.mxu0 %v11280_v50 }
 0x5f7   :  { %7792 = vmatprep.subr.bf16.mxu1 %v13151_v4  ;;  %7855 = vmatprep.subr.bf16.mxu0 %v13151_v4 }
 0x5fa   :  { %7794 = vmatpush1.bf16.msra.mxu1 %v11189_v52 }
 0x5fb   :  { %7795 = vmatprep.subr.bf16.mxu1 %v13151_v4  ;;  %v13653_v0 = vld [vmem:[#allocation162_spill] sm:$0xff] }
 0x5fe   :  { %7797 = vmatpush1.bf16.msra.mxu1 %v11199_v60  ;;  %v13417_v60 = vmax.f32 %v11043_v18, %v11045_v25 }
 0x5ff   :  { %7798 = vmatprep.subr.bf16.mxu1 %v13151_v4 }
 0x602   :  { %7800 = vmatpush1.bf16.msra.mxu1 %v11209_v17 }
 0x603   :  { %7801 = vmatprep.subr.bf16.mxu1 %v13151_v4 }
 0x606   :  { %7803 = vmatpush1.bf16.msra.mxu1 %v11219_v1 }
 0x607   :  { %7804 = vmatprep.subr.bf16.mxu1 %v13151_v4 }
 0x60a   :  { %7806 = vmatpush1.bf16.msra.mxu1 %v11229_v35 }
 0x60b   :  { %7807 = vmatprep.subr.bf16.mxu1 %v13151_v4 }
 0x60e   :  { %7809 = vmatpush1.bf16.msra.mxu1 %v11239_v31 }
 0x60f   :  { %7810 = vmatprep.subr.bf16.mxu1 %v13151_v4 }
 0x612   :  { %7812 = vmatpush1.bf16.msra.mxu1 %v11249_v7  ;;  %v11300_v7 = vpack.c.bf16 %v450_v12, %v449_v16 }
 0x613   :  { %7813 = vmatprep.subr.bf16.mxu1 %v13151_v4 }
 0x614   :  { %13415 = vst [vmem:[#allocation172_spill] sm:$0xff] %v11300_v7  ;;  %7857 = vmatpush1.bf16.msra.mxu0 %v11300_v7  ;;  %v6806_v7 = vld [vmem:[%s12977_s13 + $0x68] sm:$0xff] }
 0x615   :  { %7126 = vmatprep.subr.mxu0 %v13251_v40 }
 0x616   :  { %7815 = vmatpush1.bf16.msra.mxu1 %v11268_v14  ;;  %v11288_v14 = vpack.c.bf16 %v6706_v13, %v6705_v53  ;;  %v6707_v53 = vld [vmem:[%s12969_s5 + $0x170] sm:$0xff]  ;;  %v6708_v13 = vld [vmem:[%s12969_s5 + $0x178] sm:$0xff] }
 0x617   :  { %7816 = vmatprep.subr.bf16.mxu1 %v13151_v4 }
 0x618   :  { %13414 = vst [vmem:[#allocation171_spill] sm:$0xff] %v11288_v14 }
 0x61a   :  { %7818 = vmatpush1.bf16.msra.mxu1 %v11288_v14  ;;  %v11308_v14 = vpack.c.bf16 %v6708_v13, %v6707_v53  ;;  %v6709_v53 = vld [vmem:[%s12969_s5 + $0x180] sm:$0xff]  ;;  %v6710_v13 = vld [vmem:[%s12969_s5 + $0x188] sm:$0xff] }
 0x61b   :  { %7819 = vmatprep.subr.bf16.mxu1 %v13151_v4  ;;  %v11333_v25 = vpack.c.bf16 %v6710_v13, %v6709_v53  ;;  %v6715_v53 = vld [vmem:[%s12969_s5 + $0x1b0] sm:$0xff]  ;;  %v6716_v13 = vld [vmem:[%s12969_s5 + $0x1b8] sm:$0xff] }
 0x61c   :  { %13416 = vst [vmem:[#allocation173_spill] sm:$0xff] %v11308_v14 }
 0x61d   :  { %13419 = vst [vmem:[#allocation174_spill] sm:$0xff] %v11333_v25 }
 0x61e   :  { %7821 = vmatpush1.bf16.msra.mxu1 %v11308_v14 }
 0x61f   :  { %7858 = vmatprep.subr.bf16.mxu1 %v13151_v4  ;;  %v13418_v4 = vmax.f32 %v11049_v27, %v11051_v49  ;;  %v6712_v27 = vld [vmem:[%s12969_s5 + $0x198] sm:$0xff] }
 0x6c0   :  { %v2416_v16 = vpop.f32.mrb[22].mxu1 }
 0x6c1   :  { %v2418_v12 = vpop.f32.mrb[23].mxu1 }
 0x6c4   :  { %v2487_v31 = vpop.f32.mrb[24].mxu1 }
 0x6c5   :  { %v2492_v35 = vmax.f32 %v2416_v16, %v2487_v31  ;;  %v2489_v1 = vpop.f32.mrb[25].mxu1  ;;  %v6714_v16 = vld [vmem:[%s12969_s5 + $0x1a8] sm:$0xff] }
 0x6c6   :  { %v2493_v17 = vmax.f32 %v2418_v12, %v2489_v1  ;;  %v6711_v1 = vld [vmem:[%s12969_s5 + $0x190] sm:$0xff] }
 0x6c7   :  { %v11317_v52 = vmax.f32 %v13417_v60, %v2492_v35  ;;  %v6713_v35 = vld [vmem:[%s12969_s5 + $0x1a0] sm:$0xff] }
 0x6c8   :  { %v11328_v31 = vmax.f32 %v13418_v4, %v2493_v17  ;;  %v11353_v4 = vpack.c.bf16 %v6712_v27, %v6711_v1  ;;  %v13421_v17 = vmov 0.0|0.0   ;;  %v11363_v12 = vpack.c.bf16 %v6714_v16, %v6713_v35  ;;  %v6717_v27 = vld [vmem:[%s12969_s5 + $0x1c0] sm:$0xff]  ;;  %v6718_v35 = vld [vmem:[%s12969_s5 + $0x1c8] sm:$0xff] }
 0x6c9   :  { %v13154_v60 = vrot.slane %v11317_v52, 1  ;;  %v11373_v1 = vpack.c.bf16 %v6716_v13, %v6715_v53  ;;  %v11383_v16 = vpack.c.bf16 %v6718_v35, %v6717_v27  ;;  %v6719_v53 = vld [vmem:[%s12969_s5 + $0x1d0] sm:$0xff]  ;;  %v6720_v13 = vld [vmem:[%s12969_s5 + $0x1d8] sm:$0xff]  ;;  %v6721_v27 = vld [vmem:[%s12969_s5 + $0x1e0] sm:$0xff] }
 0x6ca   :  { %6906 = vmatprep.mubr.msk.f32.mxu0 %vm2501_vm13, %v11328_v31  ;;  %v13155_v18 = vrot.slane %v11328_v31, 1  ;;  %v13153_v49 = vrot.slane %v11328_v31, 2  ;;  %13420 = vst [vmem:[#allocation175_spill] sm:$0xff] %v11353_v4  ;;  %13422 = vst [vmem:[#allocation176_spill] sm:$0xff] %v11363_v12  ;;  %v6722_v35 = vld [vmem:[%s12969_s5 + $0x1e8] sm:$0xff] }
 0x6cb   :  { %2641 = vmatmul.mubr.f32.vlgmr.msra.gmra.mrb[22].mxu0 %v11317_v52  ;;  %13423 = vst [vmem:[#allocation177_spill] sm:$0xff] %v11373_v1  ;;  %13424 = vst [vmem:[#allocation178_spill] sm:$0xff] %v11383_v16 }
 0x6cc   :  { %6905 = vmatprep.mubr.msk.f32.mxu1 %vm2501_vm13, %v13155_v18  ;;  %7128 = vmatprep.mubr.msk.f32.mxu0 %vm8923_vm14, %v13251_v40 }
 0x6cd   :  { %2569 = vmatmul.mubr.f32.vlgmr.msra.gmra.mrb[26].mxu1 %v13154_v60  ;;  %v11403_v60 = vpack.c.bf16 %v6722_v35, %v6721_v27  ;;  %v6725_v27 = vld [vmem:[%s12969_s5 + $0x200] sm:$0xff]  ;;  %v6726_v35 = vld [vmem:[%s12969_s5 + $0x208] sm:$0xff] }
 0x6ce   :  { %7860 = vmatpush1.bf16.msra.mxu1 %v11333_v25  ;;  %6907 = vmatprep.mubr.msk.f32.mxu1 %vm2501_vm13, %v13153_v49  ;;  %v11393_v49 = vpack.c.bf16 %v6720_v13, %v6719_v53  ;;  %v6723_v53 = vld [vmem:[%s12969_s5 + $0x1f0] sm:$0xff]  ;;  %v6724_v13 = vld [vmem:[%s12969_s5 + $0x1f8] sm:$0xff]  ;;  %v11597_v25 = vld [vmem:[%s12975_s11] sm:$0x7] }
 0x6cf   :  { %7861 = vmatprep.subr.bf16.mxu1 %v13421_v17  ;;  %13426 = vst [vmem:[#allocation180_spill] sm:$0xff] %v11403_v60  ;;  %v11413_v18 = vpack.c.bf16 %v6724_v13, %v6723_v53  ;;  %v6727_v53 = vld [vmem:[%s12969_s5 + $0x210] sm:$0xff]  ;;  %v6728_v13 = vld [vmem:[%s12969_s5 + $0x218] sm:$0xff] }
 0x6d0   :  { %13425 = vst [vmem:[#allocation179_spill] sm:$0xff] %v11393_v49 }
 0x6d1   :  { %13427 = vst [vmem:[#allocation181_spill] sm:$0xff] %v11413_v18 }
 0x6d2   :  { %7863 = vmatpush1.bf16.msra.mxu1 %v11353_v4 }
 0x6d3   :  { %7864 = vmatprep.subr.bf16.mxu1 %v13421_v17 }
 0x6d6   :  { %7866 = vmatpush1.bf16.msra.mxu1 %v11363_v12 }
 0x6d7   :  { %7867 = vmatprep.subr.bf16.mxu1 %v13421_v17 }
 0x6da   :  { %7869 = vmatpush1.bf16.msra.mxu1 %v11373_v1 }
 0x6db   :  { %7870 = vmatprep.subr.bf16.mxu1 %v13421_v17 }
 0x6de   :  { %7872 = vmatpush1.bf16.msra.mxu1 %v11383_v16  ;;  %v13163_v16 = vrot.slane %v11317_v52, 2 }
 0x6df   :  { %7873 = vmatprep.subr.bf16.mxu1 %v13421_v17 }
 0x6e2   :  { %7875 = vmatpush1.bf16.msra.mxu1 %v11393_v49  ;;  %v11423_v49 = vpack.c.bf16 %v6726_v35, %v6725_v27  ;;  %v6729_v27 = vld [vmem:[%s12969_s5 + $0x220] sm:$0xff]  ;;  %v6730_v35 = vld [vmem:[%s12969_s5 + $0x228] sm:$0xff] }
 0x6e3   :  { %7876 = vmatprep.subr.bf16.mxu1 %v13421_v17 }
 0x6e4   :  { %13428 = vst [vmem:[#allocation182_spill] sm:$0xff] %v11423_v49 }
 0x6e6   :  { %7878 = vmatpush1.bf16.msra.mxu1 %v11403_v60  ;;  %v11433_v60 = vpack.c.bf16 %v6728_v13, %v6727_v53  ;;  %v6731_v53 = vld [vmem:[%s12969_s5 + $0x230] sm:$0xff]  ;;  %v6732_v13 = vld [vmem:[%s12969_s5 + $0x238] sm:$0xff] }
 0x6e7   :  { %7879 = vmatprep.subr.bf16.mxu1 %v13421_v17 }
 0x6e8   :  { %13429 = vst [vmem:[#allocation183_spill] sm:$0xff] %v11433_v60 }
 0x6ea   :  { %7881 = vmatpush1.bf16.msra.mxu1 %v11413_v18  ;;  %v11443_v18 = vpack.c.bf16 %v6730_v35, %v6729_v27  ;;  %v6733_v27 = vld [vmem:[%s12969_s5 + $0x240] sm:$0xff]  ;;  %v6734_v35 = vld [vmem:[%s12969_s5 + $0x248] sm:$0xff] }
 0x6eb   :  { %7882 = vmatprep.subr.bf16.mxu1 %v13421_v17 }
 0x6ec   :  { %13430 = vst [vmem:[#allocation184_spill] sm:$0xff] %v11443_v18 }
 0x6ee   :  { %7884 = vmatpush1.bf16.msra.mxu1 %v11423_v49  ;;  %v11453_v49 = vpack.c.bf16 %v6732_v13, %v6731_v53  ;;  %v6735_v53 = vld [vmem:[%s12969_s5 + $0x250] sm:$0xff]  ;;  %v6736_v13 = vld [vmem:[%s12969_s5 + $0x258] sm:$0xff] }
 0x6ef   :  { %7885 = vmatprep.subr.bf16.mxu1 %v13421_v17 }
 0x6f0   :  { %13431 = vst [vmem:[#allocation185_spill] sm:$0xff] %v11453_v49 }
 0x6f2   :  { %7887 = vmatpush1.bf16.msra.mxu1 %v11433_v60  ;;  %v11463_v60 = vpack.c.bf16 %v6734_v35, %v6733_v27  ;;  %v11478_v27 = vpack.c.bf16 %v6736_v13, %v6735_v53  ;;  %v6737_v35 = vld [vmem:[%s12969_s5 + $0x260] sm:$0xff]  ;;  %v6739_v53 = vld [vmem:[%s12969_s5 + $0x270] sm:$0xff]  ;;  %v6740_v13 = vld [vmem:[%s12969_s5 + $0x278] sm:$0xff] }
 0x6f3   :  { %7888 = vmatprep.subr.bf16.mxu1 %v13421_v17 }
 0x6f4   :  { %13432 = vst [vmem:[#allocation186_spill] sm:$0xff] %v11463_v60  ;;  %13433 = vst [vmem:[#allocation187_spill] sm:$0xff] %v11478_v27 }
 0x6f6   :  { %7890 = vmatpush1.bf16.msra.mxu1 %v11443_v18 }
 0x6f7   :  { %7891 = vmatprep.subr.bf16.mxu1 %v13421_v17 }
 0x6fa   :  { %7893 = vmatpush1.bf16.msra.mxu1 %v11453_v49  ;;  %v6738_v49 = vld [vmem:[%s12969_s5 + $0x268] sm:$0xff] }
 0x6fb   :  { %7930 = vmatprep.subr.bf16.mxu1 %v13421_v17 }
 0x6fd   :  { %2716 = vmatmul.mubr.f32.vlgmr.msra.gmra.mrb[28].mxu1 %v13163_v16  ;;  %v11488_v16 = vpack.c.bf16 %v6738_v49, %v6737_v35  ;;  %v6741_v49 = vld [vmem:[%s12969_s5 + $0x280] sm:$0xff]  ;;  %v6742_v35 = vld [vmem:[%s12969_s5 + $0x288] sm:$0xff] }
 0x6fe   :  { %7932 = vmatpush1.bf16.msra.mxu1 %v11463_v60  ;;  %6914 = vmatprep.mubr.msk.f32.mxu1 %vm2501_vm13, %v11328_v31  ;;  %v11498_v60 = vpack.c.bf16 %v6740_v13, %v6739_v53  ;;  %v6743_v53 = vld [vmem:[%s12969_s5 + $0x290] sm:$0xff]  ;;  %v6744_v13 = vld [vmem:[%s12969_s5 + $0x298] sm:$0xff] }
 0x6ff   :  { %7933 = vmatprep.subr.bf16.mxu1 %v13421_v17  ;;  %13434 = vst [vmem:[#allocation188_spill] sm:$0xff] %v11488_v16 }
 0x700   :  { %13435 = vst [vmem:[#allocation189_spill] sm:$0xff] %v11498_v60 }
 0x702   :  { %7935 = vmatpush1.bf16.msra.mxu1 %v11478_v27  ;;  %v11508_v27 = vpack.c.bf16 %v6742_v35, %v6741_v49  ;;  %v6745_v49 = vld [vmem:[%s12969_s5 + $0x2a0] sm:$0xff]  ;;  %v6746_v35 = vld [vmem:[%s12969_s5 + $0x2a8] sm:$0xff] }
 0x703   :  { %7936 = vmatprep.subr.bf16.mxu1 %v13421_v17 }
 0x704   :  { %13436 = vst [vmem:[#allocation190_spill] sm:$0xff] %v11508_v27 }
 0x706   :  { %7938 = vmatpush1.bf16.msra.mxu1 %v11488_v16  ;;  %v11518_v16 = vpack.c.bf16 %v6744_v13, %v6743_v53  ;;  %v6747_v53 = vld [vmem:[%s12969_s5 + $0x2b0] sm:$0xff]  ;;  %v6748_v13 = vld [vmem:[%s12969_s5 + $0x2b8] sm:$0xff] }
 0x707   :  { %7939 = vmatprep.subr.bf16.mxu1 %v13421_v17 }
 0x708   :  { %13437 = vst [vmem:[#allocation191_spill] sm:$0xff] %v11518_v16 }
 0x70a   :  { %7941 = vmatpush1.bf16.msra.mxu1 %v11498_v60  ;;  %v11528_v60 = vpack.c.bf16 %v6746_v35, %v6745_v49  ;;  %v6749_v49 = vld [vmem:[%s12969_s5 + $0x2c0] sm:$0xff]  ;;  %v6750_v35 = vld [vmem:[%s12969_s5 + $0x2c8] sm:$0xff] }
 0x70b   :  { %7942 = vmatprep.subr.bf16.mxu1 %v13421_v17 }
 0x70c   :  { %13438 = vst [vmem:[#allocation192_spill] sm:$0xff] %v11528_v60 }
 0x70e   :  { %7944 = vmatpush1.bf16.msra.mxu1 %v11508_v27  ;;  %v11538_v27 = vpack.c.bf16 %v6748_v13, %v6747_v53  ;;  %v6751_v53 = vld [vmem:[%s12969_s5 + $0x2d0] sm:$0xff]  ;;  %v6752_v13 = vld [vmem:[%s12969_s5 + $0x2d8] sm:$0xff] }
 0x70f   :  { %7945 = vmatprep.subr.bf16.mxu1 %v13421_v17 }
 0x710   :  { %13439 = vst [vmem:[#allocation193_spill] sm:$0xff] %v11538_v27 }
 0x712   :  { %7947 = vmatpush1.bf16.msra.mxu1 %v11518_v16  ;;  %v11548_v16 = vpack.c.bf16 %v6750_v35, %v6749_v49  ;;  %v6753_v49 = vld [vmem:[%s12969_s5 + $0x2e0] sm:$0xff]  ;;  %v6754_v35 = vld [vmem:[%s12969_s5 + $0x2e8] sm:$0xff] }
 0x713   :  { %7948 = vmatprep.subr.bf16.mxu1 %v13421_v17 }
 0x714   :  { %13440 = vst [vmem:[#allocation194_spill] sm:$0xff] %v11548_v16 }
 0x716   :  { %7950 = vmatpush1.bf16.msra.mxu1 %v11528_v60  ;;  %v11558_v60 = vpack.c.bf16 %v6752_v13, %v6751_v53  ;;  %v6755_v53 = vld [vmem:[%s12969_s5 + $0x2f0] sm:$0xff]  ;;  %v6756_v13 = vld [vmem:[%s12969_s5 + $0x2f8] sm:$0xff] }
 0x717   :  { %7951 = vmatprep.subr.bf16.mxu1 %v13421_v17 }
 0x718   :  { %13441 = vst [vmem:[#allocation195_spill] sm:$0xff] %v11558_v60 }
 0x71a   :  { %7953 = vmatpush1.bf16.msra.mxu1 %v11538_v27  ;;  %v11568_v27 = vpack.c.bf16 %v6754_v35, %v6753_v49 }
 0x71b   :  { %7954 = vmatprep.subr.bf16.mxu1 %v13421_v17 }
 0x71c   :  { %13442 = vst [vmem:[#allocation196_spill] sm:$0xff] %v11568_v27 }
 0x71e   :  { %7956 = vmatpush1.bf16.msra.mxu1 %v11548_v16  ;;  %v11578_v16 = vpack.c.bf16 %v6756_v13, %v6755_v53 }
 0x71f   :  { %7957 = vmatprep.subr.bf16.mxu1 %v13421_v17 }
 0x720   :  { %13443 = vst [vmem:[#allocation197_spill] sm:$0xff] %v11578_v16 }
 0x722   :  { %7959 = vmatpush1.bf16.msra.mxu1 %v11558_v60 }
 0x723   :  { %7960 = vmatprep.subr.bf16.mxu1 %v13421_v17 }
 0x726   :  { %7962 = vmatpush1.bf16.msra.mxu1 %v11568_v27 }
 0x727   :  { %7963 = vmatprep.subr.bf16.mxu1 %v13421_v17 }
 0x72a   :  { %7965 = vmatpush1.bf16.msra.mxu1 %v11578_v16  ;;  %v11591_v16 = vld [vmem:[%s12970_s6] ss:$0 sm:$0xff] }
 0x72b   :  { %7136 = vmatprep.subr.mxu1 %v13251_v40 }
 0x72d   :  { %3016 = vmatmul.mubr.f32.vlgmr.msra.gmra.mrb[30].mxu1 %v11317_v52 }
 0x72e   :  { %7138 = vmatprep.mubr.msk.f32.mxu1 %vm8923_vm14, %v13251_v40 }
 0x79e   :  { %v2642_v49 = vpop.f32.mrb[22].mxu0 }
 0x79f   :  { %v2644_v35 = vpop.f32.mrb[23].mxu0 }
 0x7a0   :  { %v2570_v27 = vpop.f32.mrb[26].mxu1 }
 0x7a1   :  { %v2643_v53 = vadd.f32 %v2642_v49, %v2570_v27  ;;  %v2572_v13 = vpop.f32.mrb[27].mxu1  ;;  %v6757_v27 = vld [vmem:[%s12969_s5 + $0x300] sm:$0xff]  ;;  %v6758_v49 = vld [vmem:[%s12969_s5 + $0x308] sm:$0xff] }
 0x7a2   :  { %v6762_v13 = vld [vmem:[%s12969_s5 + $0x328] sm:$0xff] }
 0x7d0   :  { %v2717_v60 = vpop.f32.mrb[28].mxu1 }
 0x7d1   :  { %v2721_v18 = vadd.f32 %v2717_v60, %v2643_v53  ;;  %v2719_v1 = vpop.f32.mrb[29].mxu1  ;;  %v11617_v60 = vpack.c.bf16 %v6758_v49, %v6757_v27  ;;  %v6761_v53 = vld [vmem:[%s12969_s5 + $0x320] sm:$0xff]  ;;  %v6763_v49 = vld [vmem:[%s12969_s5 + $0x330] sm:$0xff] }
 0x7d2   :  { %v13445_v1 = vrot.slane %v11328_v31, 1  ;;  %v11642_v27 = vpack.c.bf16 %v6762_v13, %v6761_v53  ;;  %v6766_v53 = vld [vmem:[%s12969_s5 + $0x348] sm:$0xff] }
 0x7d3   :  { %v2728_v12 = vadd.f32 %v11591_v16, %v2721_v18  ;;  %v11615_v18 = vld [vmem:[%s12976_s12] sm:$0x7]  ;;  %13444 = vst [vmem:[#allocation198_spill] sm:$0xff] %v11617_v60 }
 0x7d4   :  { %13447 = vst [vmem:[#allocation200_spill] sm:$0xff] %v11642_v27 }
 0x7d5   :  { %v2729_v4 = vmax.f32 %v2728_v12, 0.0  ;;  %v6759_v12 = vld [vmem:[%s12969_s5 + $0x310] sm:$0xff] }
 0x7d7   :  { %7127 = vmatpush3.msk.msra.mxu0 %vm855_vm5, %v2729_v4 }
 0x7d8   :  { %7129 = vmatmul.mubr.msk.f32.vlgmr.msra.gmra.mrb[24].mxu0 %vm2730_vm15, %v11597_v25  ;;  %7131 = vmatprep.subr.mxu0 %v13251_v40 }
 0x7d9   :  { %7132 = vmatpush3.msk.msra.mxu0 %vm855_vm5, %v2729_v4  ;;  %7133 = vmatprep.mubr.msk.f32.mxu0 %vm8923_vm14, %v13251_v40  ;;  %v6760_v4 = vld [vmem:[%s12969_s5 + $0x318] sm:$0xff] }
 0x7da   :  { %7894 = vmatprep.subr.bf16.mxu0 %v13421_v17  ;;  %v11632_v35 = vpack.c.bf16 %v6760_v4, %v6759_v12  ;;  %v6764_v12 = vld [vmem:[%s12969_s5 + $0x338] sm:$0xff] }
 0x7db   :  { %v11652_v4 = vpack.c.bf16 %v6764_v12, %v6763_v49  ;;  %v6767_v49 = vld [vmem:[%s12969_s5 + $0x350] sm:$0xff]  ;;  %v6768_v12 = vld [vmem:[%s12969_s5 + $0x358] sm:$0xff] }
 0x7dc   :  { %7134 = vmatmul.mubr.msk.f32.vlgmr.msra.gmra.mrb[26].mxu0 %vm2730_vm15, %v11615_v18  ;;  %13446 = vst [vmem:[#allocation199_spill] sm:$0xff] %v11632_v35 }
 0x7dd   :  { %7896 = vmatpush1.bf16.msra.mxu0 %v11617_v60  ;;  %6913 = vmatprep.mubr.msk.f32.mxu0 %vm2501_vm13, %v13445_v1  ;;  %13448 = vst [vmem:[#allocation201_spill] sm:$0xff] %v11652_v4  ;;  %v6765_v1 = vld [vmem:[%s12969_s5 + $0x340] sm:$0xff] }
 0x7de   :  { %7897 = vmatprep.subr.bf16.mxu0 %v13421_v17  ;;  %v11662_v13 = vpack.c.bf16 %v6766_v53, %v6765_v1  ;;  %v6769_v1 = vld [vmem:[%s12969_s5 + $0x360] sm:$0xff]  ;;  %v6770_v53 = vld [vmem:[%s12969_s5 + $0x368] sm:$0xff] }
 0x7e0   :  { %13449 = vst [vmem:[#allocation202_spill] sm:$0xff] %v11662_v13 }
 0x7e1   :  { %7899 = vmatpush1.bf16.msra.mxu0 %v11632_v35 }
 0x7e2   :  { %7900 = vmatprep.subr.bf16.mxu0 %v13421_v17 }
 0x7e5   :  { %7902 = vmatpush1.bf16.msra.mxu0 %v11642_v27  ;;  %v11672_v27 = vpack.c.bf16 %v6768_v12, %v6767_v49  ;;  %v6771_v49 = vld [vmem:[%s12969_s5 + $0x370] sm:$0xff]  ;;  %v6772_v12 = vld [vmem:[%s12969_s5 + $0x378] sm:$0xff] }
 0x7e6   :  { %7903 = vmatprep.subr.bf16.mxu0 %v13421_v17 }
 0x7e7   :  { %13450 = vst [vmem:[#allocation203_spill] sm:$0xff] %v11672_v27 }
 0x7e9   :  { %7905 = vmatpush1.bf16.msra.mxu0 %v11652_v4  ;;  %v11682_v4 = vpack.c.bf16 %v6770_v53, %v6769_v1  ;;  %v6773_v1 = vld [vmem:[%s12969_s5 + $0x380] sm:$0xff]  ;;  %v6774_v53 = vld [vmem:[%s12969_s5 + $0x388] sm:$0xff] }
 0x7ea   :  { %7906 = vmatprep.subr.bf16.mxu0 %v13421_v17 }
 0x7eb   :  { %13451 = vst [vmem:[#allocation204_spill] sm:$0xff] %v11682_v4 }
 0x7ed   :  { %7908 = vmatpush1.bf16.msra.mxu0 %v11662_v13  ;;  %v11692_v13 = vpack.c.bf16 %v6772_v12, %v6771_v49  ;;  %v6775_v49 = vld [vmem:[%s12969_s5 + $0x390] sm:$0xff]  ;;  %v6776_v12 = vld [vmem:[%s12969_s5 + $0x398] sm:$0xff] }
 0x7ee   :  { %7909 = vmatprep.subr.bf16.mxu0 %v13421_v17 }
 0x7ef   :  { %13452 = vst [vmem:[#allocation205_spill] sm:$0xff] %v11692_v13 }
 0x7f1   :  { %7911 = vmatpush1.bf16.msra.mxu0 %v11672_v27  ;;  %v11702_v27 = vpack.c.bf16 %v6774_v53, %v6773_v1  ;;  %v6777_v1 = vld [vmem:[%s12969_s5 + $0x3a0] sm:$0xff]  ;;  %v6778_v53 = vld [vmem:[%s12969_s5 + $0x3a8] sm:$0xff] }
 0x7f2   :  { %7912 = vmatprep.subr.bf16.mxu0 %v13421_v17  ;;  %v11724_v60 = vpack.c.bf16 %v6778_v53, %v6777_v1  ;;  %v6782_v1 = vld [vmem:[%s12969_s5 + $0x3c8] sm:$0xff] }
 0x7f3   :  { %13453 = vst [vmem:[#allocation206_spill] sm:$0xff] %v11702_v27 }
 0x7f4   :  { %13455 = vst [vmem:[#allocation208_spill] sm:$0xff] %v11724_v60 }
 0x7f5   :  { %7914 = vmatpush1.bf16.msra.mxu0 %v11682_v4  ;;  %v11712_v4 = vpack.c.bf16 %v6776_v12, %v6775_v49  ;;  %v6779_v49 = vld [vmem:[%s12969_s5 + $0x3b0] sm:$0xff]  ;;  %v6780_v12 = vld [vmem:[%s12969_s5 + $0x3b8] sm:$0xff] }
 0x7f6   :  { %7915 = vmatprep.subr.bf16.mxu0 %v13421_v17 }
 0x7f7   :  { %13454 = vst [vmem:[#allocation207_spill] sm:$0xff] %v11712_v4 }
 0x7f9   :  { %7917 = vmatpush1.bf16.msra.mxu0 %v11692_v13 }
 0x7fa   :  { %7918 = vmatprep.subr.bf16.mxu0 %v13421_v17 }
 0x7fd   :  { %7920 = vmatpush1.bf16.msra.mxu0 %v11702_v27  ;;  %v11734_v27 = vpack.c.bf16 %v6780_v12, %v6779_v49  ;;  %v6783_v49 = vld [vmem:[%s12969_s5 + $0x3d0] sm:$0xff]  ;;  %v6784_v12 = vld [vmem:[%s12969_s5 + $0x3d8] sm:$0xff] }
 0x7fe   :  { %7921 = vmatprep.subr.bf16.mxu0 %v13421_v17 }
 0x7ff   :  { %13456 = vst [vmem:[#allocation209_spill] sm:$0xff] %v11734_v27 }
 0x800   :  { %v11721_v13 = vpop.f32.mrb[30].mxu1 }
 0x801   :  { %7923 = vmatpush1.bf16.msra.mxu0 %v11712_v4  ;;  %v3019_v35 = vpop.f32.mrb[31].mxu1  ;;  %v13459_v4 = vrot.slane %v11328_v31, 2  ;;  %v6787_v31 = vld [vmem:[%s12969_s5 + $0x3f0] sm:$0xff] }
 0x802   :  { %7924 = vmatprep.subr.bf16.mxu0 %v13421_v17  ;;  %v6781_v35 = vld [vmem:[%s12969_s5 + $0x3c0] sm:$0xff] }
 0x803   :  { %v11744_v53 = vpack.c.bf16 %v6782_v1, %v6781_v35  ;;  %v11759_v35 = vpack.c.bf16 %v6784_v12, %v6783_v49  ;;  %v6785_v1 = vld [vmem:[%s12969_s5 + $0x3e0] sm:$0xff]  ;;  %v6790_v12 = vld [vmem:[%s12969_s5 + $0x408] sm:$0xff] }
 0x805   :  { %7926 = vmatpush1.bf16.msra.mxu0 %v11724_v60  ;;  %13457 = vst [vmem:[#allocation210_spill] sm:$0xff] %v11744_v53  ;;  %v13458_v60 = vrot.slane %v11317_v52, 1  ;;  %13460 = vst [vmem:[#allocation211_spill] sm:$0xff] %v11759_v35 }
 0x806   :  { %7927 = vmatprep.subr.bf16.mxu0 %v13421_v17 }
 0x809   :  { %7929 = vmatpush1.bf16.msra.mxu0 %v11734_v27  ;;  %v6786_v27 = vld [vmem:[%s12969_s5 + $0x3e8] sm:$0xff] }
 0x80a   :  { %7966 = vmatprep.subr.bf16.mxu0 %v13421_v17 }
 0x80c   :  { %2946 = vmatmul.mubr.f32.vlgmr.msra.gmra.mrb[28].mxu0 %v13458_v60  ;;  %v11769_v60 = vpack.c.bf16 %v6786_v27, %v6785_v1  ;;  %v6789_v27 = vld [vmem:[%s12969_s5 + $0x400] sm:$0xff] }
 0x80d   :  { %7968 = vmatpush1.bf16.msra.mxu0 %v11744_v53  ;;  %6915 = vmatprep.mubr.msk.f32.mxu0 %vm2501_vm13, %v13459_v4  ;;  %v6788_v4 = vld [vmem:[%s12969_s5 + $0x3f8] sm:$0xff]  ;;  %v11789_v1 = vpack.c.bf16 %v6790_v12, %v6789_v27  ;;  %v6793_v27 = vld [vmem:[%s12969_s5 + $0x420] sm:$0xff]  ;;  %v6794_v12 = vld [vmem:[%s12969_s5 + $0x428] sm:$0xff] }
 0x80e   :  { %7969 = vmatprep.subr.bf16.mxu0 %v13421_v17  ;;  %13461 = vst [vmem:[#allocation212_spill] sm:$0xff] %v11769_v60  ;;  %v11779_v49 = vpack.c.bf16 %v6788_v4, %v6787_v31  ;;  %v6791_v31 = vld [vmem:[%s12969_s5 + $0x410] sm:$0xff]  ;;  %v6792_v4 = vld [vmem:[%s12969_s5 + $0x418] sm:$0xff] }
 0x80f   :  { %13463 = vst [vmem:[#allocation214_spill] sm:$0xff] %v11789_v1 }
 0x810   :  { %13462 = vst [vmem:[#allocation213_spill] sm:$0xff] %v11779_v49 }
 0x811   :  { %7971 = vmatpush1.bf16.msra.mxu0 %v11759_v35 }
 0x812   :  { %7972 = vmatprep.subr.bf16.mxu0 %v13421_v17 }
 0x815   :  { %7974 = vmatpush1.bf16.msra.mxu0 %v11769_v60  ;;  %v11799_v60 = vpack.c.bf16 %v6792_v4, %v6791_v31  ;;  %v6795_v31 = vld [vmem:[%s12969_s5 + $0x430] sm:$0xff]  ;;  %v6796_v4 = vld [vmem:[%s12969_s5 + $0x438] sm:$0xff] }
 0x816   :  { %7975 = vmatprep.subr.bf16.mxu0 %v13421_v17 }
 0x817   :  { %13464 = vst [vmem:[#allocation215_spill] sm:$0xff] %v11799_v60 }
 0x819   :  { %7977 = vmatpush1.bf16.msra.mxu0 %v11779_v49  ;;  %v11809_v49 = vpack.c.bf16 %v6794_v12, %v6793_v27  ;;  %v6797_v27 = vld [vmem:[%s12969_s5 + $0x440] sm:$0xff]  ;;  %v6798_v12 = vld [vmem:[%s12969_s5 + $0x448] sm:$0xff] }
 0x81a   :  { %7978 = vmatprep.subr.bf16.mxu0 %v13421_v17 }
 0x81b   :  { %13465 = vst [vmem:[#allocation216_spill] sm:$0xff] %v11809_v49 }
 0x81d   :  { %7980 = vmatpush1.bf16.msra.mxu0 %v11789_v1  ;;  %v11819_v1 = vpack.c.bf16 %v6796_v4, %v6795_v31  ;;  %v6799_v31 = vld [vmem:[%s12969_s5 + $0x450] sm:$0xff]  ;;  %v6800_v4 = vld [vmem:[%s12969_s5 + $0x458] sm:$0xff] }
 0x81e   :  { %7981 = vmatprep.subr.bf16.mxu0 %v13421_v17 }
 0x81f   :  { %13466 = vst [vmem:[#allocation217_spill] sm:$0xff] %v11819_v1 }
 0x821   :  { %7983 = vmatpush1.bf16.msra.mxu0 %v11799_v60  ;;  %v11829_v60 = vpack.c.bf16 %v6798_v12, %v6797_v27  ;;  %v6801_v27 = vld [vmem:[%s12969_s5 + $0x460] sm:$0xff]  ;;  %v6802_v12 = vld [vmem:[%s12969_s5 + $0x468] sm:$0xff] }
 0x822   :  { %7984 = vmatprep.subr.bf16.mxu0 %v13421_v17 }
 0x823   :  { %13467 = vst [vmem:[#allocation218_spill] sm:$0xff] %v11829_v60 }
 0x825   :  { %7986 = vmatpush1.bf16.msra.mxu0 %v11809_v49  ;;  %v11839_v49 = vpack.c.bf16 %v6800_v4, %v6799_v31  ;;  %v6803_v31 = vld [vmem:[%s12969_s5 + $0x470] sm:$0xff]  ;;  %v6804_v4 = vld [vmem:[%s12969_s5 + $0x478] sm:$0xff] }
 0x826   :  { %7987 = vmatprep.subr.bf16.mxu0 %v13421_v17 }
 0x827   :  { %13468 = vst [vmem:[#allocation219_spill] sm:$0xff] %v11839_v49 }
 0x829   :  { %7989 = vmatpush1.bf16.msra.mxu0 %v11819_v1  ;;  %v11849_v1 = vpack.c.bf16 %v6802_v12, %v6801_v27  ;;  %v13471_v27 = vrot.slane %v11317_v52, 2  ;;  %v587_v12 = vld [vmem:[%s12977_s13] sm:$0xff]  ;;  %v590_v52 = vld [vmem:[%s12977_s13 + $0x18] sm:$0xff] }
 0x82a   :  { %7990 = vmatprep.subr.bf16.mxu0 %v13421_v17 }
 0x82b   :  { %13469 = vst [vmem:[#allocation220_spill] sm:$0xff] %v11849_v1 }
 0x82d   :  { %7992 = vmatpush1.bf16.msra.mxu0 %v11829_v60  ;;  %v11859_v60 = vpack.c.bf16 %v6804_v4, %v6803_v31  ;;  %v588_v31 = vld [vmem:[%s12977_s13 + $0x8] sm:$0xff] }
 0x82e   :  { %7993 = vmatprep.subr.bf16.mxu0 %v13421_v17  ;;  %v11874_v4 = vpack.c.bf16 %v588_v31, %v587_v12  ;;  %v592_v12 = vld [vmem:[%s12977_s13 + $0x28] sm:$0xff] }
 0x82f   :  { %13470 = vst [vmem:[#allocation221_spill] sm:$0xff] %v11859_v60 }
 0x830   :  { %13472 = vst [vmem:[#allocation222_spill] sm:$0xff] %v11874_v4 }
 0x831   :  { %7995 = vmatpush1.bf16.msra.mxu0 %v11839_v49  ;;  %v6817_v49 = vld [vmem:[%s12977_s13 + $0xc0] sm:$0xff] }
 0x832   :  { %7996 = vmatprep.subr.bf16.mxu0 %v13421_v17 }
 0x835   :  { %7998 = vmatpush1.bf16.msra.mxu0 %v11849_v1  ;;  %v591_v1 = vld [vmem:[%s12977_s13 + $0x20] sm:$0xff] }
 0x836   :  { %7999 = vmatprep.subr.bf16.mxu0 %v13421_v17  ;;  %v11893_v31 = vpack.c.bf16 %v592_v12, %v591_v1 }
 0x838   :  { %13474 = vst [vmem:[#allocation224_spill] sm:$0xff] %v11893_v31 }
 0x839   :  { %8001 = vmatpush1.bf16.msra.mxu0 %v11859_v60  ;;  %v589_v60 = vld [vmem:[%s12977_s13 + $0x10] sm:$0xff] }
 0x83a   :  { %8020 = vmatprep.subr.bf16.mxu0 %v13421_v17 }
 0x83c   :  { %3086 = vmatmul.mubr.f32.vlgmr.msra.gmra.mrb[30].mxu0 %v13471_v27  ;;  %v11883_v27 = vpack.c.bf16 %v590_v52, %v589_v60  ;;  %v593_v60 = vld [vmem:[%s12977_s13 + $0x30] sm:$0xff]  ;;  %v594_v52 = vld [vmem:[%s12977_s13 + $0x38] sm:$0xff] }
 0x83d   :  { %7197 = vmatprep.mubr.msk.f32.mxu0 %vm8923_vm14, %v13251_v40  ;;  %8022 = vmatpush3.bf16.msra.mxu0 %v11874_v4  ;;  %v11903_v4 = vpack.c.bf16 %v594_v52, %v593_v60 }
 0x83e   :  { %13473 = vst [vmem:[#allocation223_spill] sm:$0xff] %v11883_v27  ;;  %8023 = vmatprep.subr.bf16.mxu0 %v13421_v17 }
 0x83f   :  { %13475 = vst [vmem:[#allocation225_spill] sm:$0xff] %v11903_v4 }
 0x841   :  { %8025 = vmatpush3.bf16.msra.mxu0 %v11883_v27 }
 0x842   :  { %8026 = vmatprep.subr.bf16.mxu0 %v13421_v17 }
 0x845   :  { %8028 = vmatpush3.bf16.msra.mxu0 %v11893_v31 }
 0x846   :  { %8029 = vmatprep.subr.bf16.mxu0 %v13421_v17 }
 0x849   :  { %8031 = vmatpush3.bf16.msra.mxu0 %v11903_v4 }
 0x84a   :  { %8032 = vmatprep.subr.bf16.mxu0 %v13421_v17 }
 0x8ab   :  { %v11907_v1 = vpop.f32.mrb[24].mxu0 }
 0x8ac   :  { %v7130_v12 = vpop.f32.mrb[25].mxu0 }
 0x8ad   :  { %v6805_v12 = vld [vmem:[%s12977_s13 + $0x60] sm:$0xff] }
 0x8af   :  { %v11910_v27 = vpop.f32.mrb[26].mxu0 }
 0x8b0   :  { %v7135_v35 = vpop.f32.mrb[27].mxu0 }
 0x8df   :  { %v2947_v53 = vpop.f32.mrb[28].mxu0 }
 0x8e0   :  { %v3018_v31 = vadd.f32 %v11721_v13, %v2947_v53  ;;  %v2949_v60 = vpop.f32.mrb[29].mxu0  ;;  %v6811_v13 = vld [vmem:[%s12977_s13 + $0x90] sm:$0xff]  ;;  %v6812_v53 = vld [vmem:[%s12977_s13 + $0x98] sm:$0xff] }
 0x8e1   :  { %v11963_v35 = vpack.c.bf16 %v6812_v53, %v6811_v13  ;;  %v6815_v13 = vld [vmem:[%s12977_s13 + $0xb0] sm:$0xff]  ;;  %v6816_v53 = vld [vmem:[%s12977_s13 + $0xb8] sm:$0xff] }
 0x8e3   :  { %13479 = vst [vmem:[#allocation229_spill] sm:$0xff] %v11963_v35 }
 0x90f   :  { %v3087_v52 = vpop.f32.mrb[30].mxu0 }
 0x910   :  { %v3091_v14 = vadd.f32 %v3087_v52, %v3018_v31  ;;  %v3089_v5 = vpop.f32.mrb[31].mxu0  ;;  %v596_v31 = vld [vmem:[%s12977_s13 + $0x48] sm:$0xff]  ;;  %v6813_v52 = vld [vmem:[%s12977_s13 + $0xa0] sm:$0xff] }
 0x911   :  { %v11929_v5 = vpack.c.bf16 %v6806_v7, %v6805_v12  ;;  %v6809_v7 = vld [vmem:[%s12977_s13 + $0x80] sm:$0xff]  ;;  %v6814_v12 = vld [vmem:[%s12977_s13 + $0xa8] sm:$0xff] }
 0x912   :  { %v3092_v4 = vadd.f32 %v11591_v16, %v3091_v14  ;;  %v6807_v14 = vld [vmem:[%s12977_s13 + $0x70] sm:$0xff]  ;;  %v6808_v16 = vld [vmem:[%s12977_s13 + $0x78] sm:$0xff] }
 0x913   :  { %13476 = vst [vmem:[#allocation226_spill] sm:$0xff] %v11929_v5 }
 0x914   :  { %v3093_v59 = vmax.f32 %v3092_v4, 0.0  ;;  %v595_v4 = vld [vmem:[%s12977_s13 + $0x40] sm:$0xff] }
 0x915   :  { %v11974_v60 = vpack.c.bf16 %v596_v31, %v595_v4  ;;  %v12002_v4 = vpack.c.bf16 %v6816_v53, %v6815_v13  ;;  %v6818_v13 = vld [vmem:[%s12977_s13 + $0xc8] sm:$0xff]  ;;  %v13484_v53 = vmax.f32 %v11907_v1, %v11910_v27  ;;  %v6821_v27 = vld [vmem:[%s12977_s13 + $0xe0] sm:$0xff] }
 0x916   :  { %7137 = vmatpush3.msk.msra.mxu1 %vm855_vm5, %v3093_v59  ;;  %v6822_v1 = vld [vmem:[%s12977_s13 + $0xe8] sm:$0xff] }
 0x917   :  { %7139 = vmatmul.mubr.msk.f32.vlgmr.msra.gmra.mrb[32].mxu1 %vm2730_vm15, %v11597_v25  ;;  %7141 = vmatprep.subr.mxu1 %v13251_v40  ;;  %v6810_v25 = vld [vmem:[%s12977_s13 + $0x88] sm:$0xff]  ;;  %13480 = vst [vmem:[#allocation230_spill] sm:$0xff] %v11974_v60  ;;  %13483 = vst [vmem:[#allocation233_spill] sm:$0xff] %v12002_v4 }
 0x918   :  { %7142 = vmatpush3.msk.msra.mxu1 %vm855_vm5, %v3093_v59  ;;  %7143 = vmatprep.mubr.msk.f32.mxu1 %vm8923_vm14, %v13251_v40  ;;  %v11941_v59 = vpack.c.bf16 %v6808_v16, %v6807_v14  ;;  %v11982_v14 = vpack.c.bf16 %v6814_v12, %v6813_v52  ;;  %v597_v16 = vld [vmem:[%s12977_s13 + $0x50] sm:$0xff] }
 0x919   :  { %8002 = vmatprep.subr.bf16.mxu1 %v13421_v17  ;;  %8034 = vmatpush3.bf16.msra.mxu0 %v11974_v60 }
 0x91a   :  { %13477 = vst [vmem:[#allocation227_spill] sm:$0xff] %v11941_v59  ;;  %13481 = vst [vmem:[#allocation231_spill] sm:$0xff] %v11982_v14  ;;  %8035 = vmatprep.subr.bf16.mxu0 %v13421_v17 }
 0x91b   :  { %7144 = vmatmul.mubr.msk.f32.vlgmr.msra.gmra.mrb[34].mxu1 %vm2730_vm15, %v11615_v18  ;;  %v11953_v18 = vpack.c.bf16 %v6810_v25, %v6809_v7  ;;  %v598_v7 = vld [vmem:[%s12977_s13 + $0x58] sm:$0xff] }
 0x91c   :  { %8004 = vmatpush3.bf16.msra.mxu1 %v11929_v5  ;;  %7170 = vmatprep.mubr.msk.f32.mxu1 %vm8923_vm14, %v13251_v40  ;;  %v11994_v25 = vpack.c.bf16 %v598_v7, %v597_v16 }
 0x91d   :  { %8005 = vmatprep.subr.bf16.mxu1 %v13421_v17  ;;  %13478 = vst [vmem:[#allocation228_spill] sm:$0xff] %v11953_v18 }
 0x91e   :  { %13482 = vst [vmem:[#allocation232_spill] sm:$0xff] %v11994_v25  ;;  %8037 = vmatpush3.bf16.msra.mxu0 %v11994_v25 }
 0x91f   :  { %8056 = vmatprep.subr.bf16.mxu0 %v13421_v17 }
 0x920   :  { %8007 = vmatpush3.bf16.msra.mxu1 %v11941_v59 }
 0x921   :  { %8008 = vmatprep.subr.bf16.mxu1 %v13421_v17 }
 0x924   :  { %8010 = vmatpush3.bf16.msra.mxu1 %v11953_v18 }
 0x925   :  { %8011 = vmatprep.subr.bf16.mxu1 %v13421_v17 }
 0x928   :  { %8013 = vmatpush3.bf16.msra.mxu1 %v11963_v35 }
 0x929   :  { %8014 = vmatprep.subr.bf16.mxu1 %v13421_v17 }
 0x92c   :  { %8016 = vmatpush3.bf16.msra.mxu1 %v11982_v14  ;;  %v12017_v14 = vpack.c.bf16 %v6818_v13, %v6817_v49  ;;  %v6825_v13 = vld [vmem:[%s12977_s13 + $0x100] sm:$0xff] }
 0x92d   :  { %8017 = vmatprep.subr.bf16.mxu1 %v13421_v17 }
 0x92e   :  { %13485 = vst [vmem:[#allocation234_spill] sm:$0xff] %v12017_v14 }
 0x930   :  { %8019 = vmatpush3.bf16.msra.mxu1 %v12002_v4 }
 0x931   :  { %8038 = vmatprep.subr.bf16.mxu1 %v13421_v17 }
 0x9ea   :  { %v3163_v31 = vpop.f32.mrb[32].mxu1 }
 0x9eb   :  { %v7140_v52 = vpop.f32.mrb[33].mxu1 }
 0x9ec   :  { %v6820_v52 = vld [vmem:[%s12977_s13 + $0xd8] sm:$0xff] }
 0x9ee   :  { %v3233_v12 = vpop.f32.mrb[34].mxu1 }
 0x9ef   :  { %v3237_v16 = vmax.f32 %v3163_v31, %v3233_v12  ;;  %v7145_v7 = vpop.f32.mrb[35].mxu1  ;;  %v6819_v31 = vld [vmem:[%s12977_s13 + $0xd0] sm:$0xff] }
 0x9f0   :  { %v12030_v49 = vpack.c.bf16 %v6820_v52, %v6819_v31  ;;  %v6823_v12 = vld [vmem:[%s12977_s13 + $0xf0] sm:$0xff] }
 0x9f1   :  { %v3238_v4 = vmax.f32 %v13484_v53, %v3237_v16  ;;  %v6824_v16 = vld [vmem:[%s12977_s13 + $0xf8] sm:$0xff]  ;;  %v6826_v53 = vld [vmem:[%s12977_s13 + $0x108] sm:$0xff]  ;;  %v6827_v52 = vld [vmem:[%s12977_s13 + $0x110] sm:$0xff] }
 0x9f2   :  { %13486 = vst [vmem:[#allocation235_spill] sm:$0xff] %v12030_v49  ;;  %v12052_v7 = vpack.c.bf16 %v6824_v16, %v6823_v12  ;;  %v12062_v31 = vpack.c.bf16 %v6826_v53, %v6825_v13  ;;  %v626_v16 = vld [vmem:[%s12979_s15] sm:$0xff]  ;;  %v627_v13 = vld [vmem:[%s12979_s15 + $0x8] sm:$0xff] }
 0x9f3   :  { %v3240_v35 = vrot.slane %v3238_v4, 1  ;;  %7198 = vmatmul.mubr.msk.f32.vlgmr.msra.gmra.mrb[32].mxu0 %vm3241_vm0, %v3238_v4  ;;  %v3386_v12 = vrot.slane %v3238_v4, 2  ;;  %v12084_v53 = vpack.c.bf16 %v627_v13, %v626_v16  ;;  %v628_v4 = vld [vmem:[%s12979_s15 + $0x10] sm:$0xff] }
 0x9f4   :  { %7235 = vmatprep.mubr.msk.f32.mxu0 %vm8923_vm14, %v13251_v40  ;;  %13488 = vst [vmem:[#allocation237_spill] sm:$0xff] %v12052_v7  ;;  %13489 = vst [vmem:[#allocation238_spill] sm:$0xff] %v12062_v31 }
 0x9f5   :  { %7171 = vmatmul.mubr.msk.f32.vlgmr.msra.gmra.mrb[36].mxu1 %vm3241_vm0, %v3240_v35  ;;  %v12042_v35 = vpack.c.bf16 %v6822_v1, %v6821_v27  ;;  %v6828_v27 = vld [vmem:[%s12977_s13 + $0x118] sm:$0xff]  ;;  %13491 = vst [vmem:[#allocation240_spill] sm:$0xff] %v12084_v53  ;;  %8058 = vmatpush3.bf16.msra.mxu0 %v12084_v53 }
 0x9f6   :  { %8040 = vmatpush3.bf16.msra.mxu1 %v12017_v14  ;;  %7224 = vmatprep.mubr.msk.f32.mxu1 %vm8923_vm14, %v13251_v40  ;;  %v12072_v1 = vpack.c.bf16 %v6828_v27, %v6827_v52  ;;  %v629_v52 = vld [vmem:[%s12979_s15 + $0x18] sm:$0xff] }
 0x9f7   :  { %8041 = vmatprep.subr.bf16.mxu1 %v13421_v17  ;;  %13487 = vst [vmem:[#allocation236_spill] sm:$0xff] %v12042_v35  ;;  %8059 = vmatprep.subr.bf16.mxu0 %v13421_v17  ;;  %v12094_v27 = vpack.c.bf16 %v629_v52, %v628_v4  ;;  %v12104_v52 = vld [vmem:[%s13236_s29 + $0x20] sm:$0xff] }
 0x9f8   :  { %13490 = vst [vmem:[#allocation239_spill] sm:$0xff] %v12072_v1 }
 0x9f9   :  { %13492 = vst [vmem:[#allocation241_spill] sm:$0xff] %v12094_v27  ;;  %8061 = vmatpush3.bf16.msra.mxu0 %v12094_v27 }
 0x9fa   :  { %8043 = vmatpush3.bf16.msra.mxu1 %v12030_v49  ;;  %8063 = vmatprep.subr.bf16.mxu0 %v9026_v3  ;;  %v12109_v3 = vld [vmem:[%s13236_s29 + $0x28] sm:$0xff] }
 0x9fb   :  { %8044 = vmatprep.subr.bf16.mxu1 %v13421_v17 }
 0x9fe   :  { %8046 = vmatpush3.bf16.msra.mxu1 %v12042_v35 }
 0x9ff   :  { %8047 = vmatprep.subr.bf16.mxu1 %v13421_v17 }
 0xa02   :  { %8049 = vmatpush3.bf16.msra.mxu1 %v12052_v7  ;;  %v625_v7 = vld [vmem:[%s12978_s14] sm:$0x1] }
 0xa03   :  { %8050 = vmatprep.subr.bf16.mxu1 %v13421_v17 }
 0xa06   :  { %8052 = vmatpush3.bf16.msra.mxu1 %v12062_v31 }
 0xa07   :  { %8053 = vmatprep.subr.bf16.mxu1 %v13421_v17 }
 0xa0a   :  { %8055 = vmatpush3.bf16.msra.mxu1 %v12072_v1 }
 0xa0d   :  { %7225 = vmatmul.mubr.msk.f32.vlgmr.msra.gmra.mrb[38].mxu1 %vm3241_vm0, %v3386_v12 }
 0xa0e   :  { %3958 = vmatprep.mubr.f32.mxu1 %v13251_v40 }
 0xac6   :  { %v3382_v12 = vpop.f32.mrb[32].mxu0 }
 0xac7   :  { %v7199_v16 = vpop.f32.mrb[33].mxu0 }
 0xac8   :  { %v3310_v13 = vpop.f32.mrb[36].mxu1 }
 0xac9   :  { %v3383_v1 = vadd.f32 %v3382_v12, %v3310_v13  ;;  %v7172_v31 = vpop.f32.mrb[37].mxu1 }
 0xaca   :  { %v12134_v31 = vld [vmem:[%s13236_s29 + $0x38] sm:$0xf] }
 0xae0   :  { %v3455_v35 = vpop.f32.mrb[38].mxu1 }
 0xae1   :  { %v3459_v49 = vadd.f32 %v3455_v35, %v3383_v1  ;;  %v7226_v14 = vpop.f32.mrb[39].mxu1  ;;  %v12122_v35 = vld [vmem:[%s13236_s29 + $0x30] sm:$0xff]  ;;  %v630_v1 = vld [vmem:[%s12980_s16] sm:$0x1] }
 0xae2   :  { %v3559_v14 = vrot.slane %v12104_v52, 1 }
 0xae3   :  { %v3460_v53 = vadd.f32 %v3459_v49, %v625_v7  ;;  %v3560_v49 = vrot.slane %v12109_v3, 1  ;;  %v3562_v7 = vrot.slane %v12122_v35, 1 }
 0xae5   :  { %v3461_v4 = vmax.f32 %v3460_v53, 0.0 }
 0xae7   :  { %7236 = vmatmul.mubr.msk.f32.vlgmr.msra.gmra.mrb[34].mxu0 %vm3462_vm1, %v3461_v4 }
 0xae8   :  { %8065 = vmatpush1.bf16.msra.mxu0 %v9039_v8  ;;  %3638 = vmatprep.mubr.f32.mxu0 %v13251_v40  ;;  %v12128_v8 = vsel %vm639_vm3, %v3559_v14, %v3560_v49 }
 0xae9   :  { %8068 = vmatprep.subr.msk.bf16.mxu0 %vm9044_vm2, %v9041_v9  ;;  %v12141_v9 = vsel %vm639_vm3, %v3560_v49, %v3562_v7 }
 0xaec   :  { %8071 = vmatpush1.bf16.msk.msra.mxu0 %vm9044_vm2, %v9066_v15  ;;  %v12144_v15 = vrot.slane %v12134_v31, 1 }
 0xaed   :  { %8073 = vmatprep.subr.bf16.mxu0 %v9090_v23 }
 0xaee   :  { %v12155_v23 = vsel %vm639_vm3, %v3562_v7, %v12144_v15 }
 0xaef   :  { %6930 = vmatmul.mubr.msk.f32.vlgmr.msra.gmra.mrb[36].mxu0 %vm647_vm4, %v12128_v8 }
 0xaf0   :  { %3644 = vmatprep.mubr.f32.mxu0 %v13251_v40  ;;  %8075 = vmatpush1.bf16.msra.mxu0 %v9105_v28  ;;  %v3760_v28 = vrot.slane %v12104_v52, 2 }
 0xaf1   :  { %8078 = vmatprep.subr.msk.bf16.mxu0 %vm9044_vm2, %v9113_v30  ;;  %v3761_v30 = vrot.slane %v12109_v3, 2 }
 0xaf3   :  { %6931 = vmatmul.mubr.msk.f32.gmra.mrb[38].mxu0 %vm647_vm4, %v12141_v9 }
 0xaf4   :  { %3650 = vmatprep.mubr.f32.mxu0 %v13251_v40  ;;  %8081 = vmatpush1.bf16.msk.msra.mxu0 %vm9044_vm2, %v9137_v37  ;;  %v12189_v37 = vsel %vm855_vm5, %v3760_v28, %v3761_v30 }
 0xaf5   :  { %8083 = vmatprep.subr.bf16.mxu0 %v9142_v38  ;;  %v3763_v38 = vrot.slane %v12122_v35, 2 }
 0xaf7   :  { %6932 = vmatmul.mubr.msk.f32.gmra.mrb[40].mxu0 %vm647_vm4, %v12155_v23 }
 0xaf8   :  { %3656 = vmatprep.mubr.f32.mxu0 %v13251_v40 }
 0xafb   :  { %6933 = vmatmul.mubr.msk.f32.gmra.mrb[42].mxu0 %vm647_vm4, %v12144_v15 }
 0xafc   :  { %3735 = vmatprep.mubr.f32.mxu0 %v13251_v40 }
 0xaff   :  { %6936 = vmatmul.mubr.msk.f32.vlgmr.msra.gmra.mrb[36].mxu0 %vm647_vm4, %v12104_v52 }
 0xb00   :  { %3741 = vmatprep.mubr.f32.mxu0 %v13251_v40  ;;  %8085 = vmatpush1.bf16.msra.mxu0 %v9173_v44  ;;  %v12196_v44 = vsel %vm855_vm5, %v3761_v30, %v3763_v38 }
 0xb01   :  { %8088 = vmatprep.subr.msk.bf16.mxu0 %vm9044_vm2, %v9175_v45  ;;  %v12199_v45 = vrot.slane %v12134_v31, 2 }
 0xb03   :  { %6937 = vmatmul.mubr.msk.f32.gmra.mrb[38].mxu0 %vm647_vm4, %v12109_v3 }
 0xb04   :  { %3747 = vmatprep.mubr.f32.mxu0 %v13251_v40  ;;  %8091 = vmatpush1.bf16.msk.msra.mxu0 %vm9044_vm2, %v9187_v48  ;;  %v12206_v48 = vsel %vm855_vm5, %v3763_v38, %v12199_v45 }
 0xb07   :  { %6938 = vmatmul.mubr.msk.f32.gmra.mrb[40].mxu0 %vm647_vm4, %v12122_v35 }
 0xb08   :  { %3753 = vmatprep.mubr.f32.mxu0 %v13251_v40 }
 0xb0b   :  { %6939 = vmatmul.mubr.msk.f32.gmra.mrb[42].mxu0 %vm647_vm4, %v12134_v31 }
 0xb0c   :  { %3839 = vmatprep.mubr.f32.mxu0 %v13251_v40 }
 0xb0f   :  { %6942 = vmatmul.mubr.msk.f32.vlgmr.msra.gmra.mrb[36].mxu0 %vm647_vm4, %v12189_v37 }
 0xb10   :  { %3845 = vmatprep.mubr.f32.mxu0 %v13251_v40 }
 0xb13   :  { %6943 = vmatmul.mubr.msk.f32.gmra.mrb[38].mxu0 %vm647_vm4, %v12196_v44 }
 0xb14   :  { %3851 = vmatprep.mubr.f32.mxu0 %v13251_v40 }
 0xb17   :  { %6944 = vmatmul.mubr.msk.f32.gmra.mrb[40].mxu0 %vm647_vm4, %v12206_v48 }
 0xb18   :  { %3857 = vmatprep.mubr.f32.mxu0 %v13251_v40 }
 0xb1b   :  { %6945 = vmatmul.mubr.msk.f32.gmra.mrb[42].mxu0 %vm647_vm4, %v12199_v45 }
 0xb1c   :  { %4413 = vmatprep.mubr.f32.mxu0 %v13251_v40 }
 0xbba   :  { %v3532_v53 = vpop.f32.mrb[34].mxu0 }
 0xbbb   :  { %v12217_v12 = vadd.f32 %v3532_v53, %v630_v1  ;;  %v7237_v16 = vpop.f32.mrb[35].mxu0 }
 0xbbd   :  { %v3537_v13 = vsel %vm3536_vm6, %v12217_v12, -inf }
 0xbbe   :  { %3538 = vmax.xlane.f32.xlu0 %v3537_v13 }
 0xbe2   :  { %v3841_v4 = vpop.f32.mrb[36].mxu0 }
 0xbe3   :  { %v3843_v14 = vpop.f32.mrb[37].mxu0  ;;  %v3872_v49 = vadd.f32 %v3841_v4, %v9241_v61 }
 0xbe4   :  { %v3873_v7 = vadd.f32 %v3843_v14, %v9245_v63 }
 0xbe5   :  { %v3880_v18 = vmax.f32 %v3872_v49, 0.0 }
 0xbe6   :  { %v3847_v28 = vpop.f32.mrb[38].mxu0  ;;  %v3881_v53 = vmax.f32 %v3873_v7, 0.0 }
 0xbe7   :  { %v3874_v30 = vadd.f32 %v3847_v28, %v9241_v61  ;;  %v3849_v38 = vpop.f32.mrb[39].mxu0 }
 0xbe8   :  { %v3875_v27 = vadd.f32 %v3849_v38, %v9245_v63 }
 0xbe9   :  { %v3882_v1 = vmax.f32 %v3874_v30, 0.0 }
 0xbea   :  { %v3883_v16 = vmax.f32 %v3875_v27, 0.0  ;;  %v3853_v59 = vpop.f32.mrb[40].mxu0 }
 0xbeb   :  { %v8094_v5 = vpack.c.bf16 %v3882_v1, %v3880_v18  ;;  %v3855_v25 = vpop.f32.mrb[41].mxu0  ;;  %v3876_v60 = vadd.f32 %v3853_v59, %v9241_v61  ;;  %v12246_v59 = vld [vmem:[%s12971_s7 + $0x8] sm:$0x7f] }
 0xbec   :  { %v8092_v13 = vpack.c.bf16 %v3883_v16, %v3881_v53  ;;  %v3877_v4 = vadd.f32 %v3855_v25, %v9245_v63 }
 0xbed   :  { %v3884_v49 = vmax.f32 %v3876_v60, 0.0 }
 0xbee   :  { %v3859_v50 = vpop.f32.mrb[42].mxu0  ;;  %8093 = vmatprep.subr.bf16.mxu1 %v8092_v13  ;;  %v3885_v7 = vmax.f32 %v3877_v4, 0.0 }
 0xbef   :  { %v3878_v14 = vadd.f32 %v3859_v50, %v9241_v61  ;;  %v3861_v28 = vpop.f32.mrb[43].mxu0  ;;  %8095 = vmatpush1.bf16.msra.mxu1 %v8094_v5  ;;  %v12236_v50 = vld [vmem:[%s12971_s7] sm:$0xff] }
 0xbf0   :  { %v3879_v38 = vadd.f32 %v3861_v28, %v9245_v63 }
 0xbf1   :  { %v3886_v30 = vmax.f32 %v3878_v14, 0.0 }
 0xbf2   :  { %v3887_v27 = vmax.f32 %v3879_v38, 0.0 }
 0xbf3   :  { %v8099_v26 = vpack.c.bf16 %v3886_v30, %v3884_v49 }
 0xbf4   :  { %v8096_v18 = vpack.c.bf16 %v3887_v27, %v3885_v7 }
 0xbf6   :  { %8098 = vmatprep.subr.msk.bf16.mxu1 %vm9256_vm7, %v8096_v18 }
 0xbf7   :  { %8101 = vmatpush1.bf16.msk.msra.mxu1 %vm9256_vm7, %v8099_v26 }
 0xbf8   :  { %8103 = vmatprep.subr.bf16.mxu1 %v8092_v13 }
 0xbfa   :  { %6948 = vmatmul.mubr.msk.f32.vlgmr.msra.gmra.mrb[40].mxu1 %vm1001_vm8, %v12236_v50 }
 0xbfb   :  { %8105 = vmatpush1.bf16.msra.mxu1 %v8094_v5  ;;  %3964 = vmatprep.mubr.f32.mxu1 %v13251_v40  ;;  %v12257_v5 = vld [vmem:[%s12972_s8] sm:$0xff] }
 0xbfc   :  { %8108 = vmatprep.subr.msk.bf16.mxu1 %vm9256_vm7, %v8096_v18 }
 0xbfe   :  { %6949 = vmatmul.mubr.msk.f32.gmra.mrb[42].mxu1 %vm1001_vm8, %v12246_v59 }
 0xbff   :  { %8111 = vmatpush1.bf16.msk.msra.mxu1 %vm9256_vm7, %v8099_v26  ;;  %4035 = vmatprep.mubr.f32.mxu1 %v13251_v40 }
 0xc00   :  { %8113 = vmatprep.subr.bf16.mxu1 %v9285_v62  ;;  %v12269_v62 = vld [vmem:[%s12972_s8 + $0x8] sm:$0x7f] }
 0xc02   :  { %6952 = vmatmul.mubr.msk.f32.vlgmr.msra.gmra.mrb[44].mxu1 %vm1001_vm8, %v12257_v5 }
 0xc03   :  { %8115 = vmatpush1.bf16.msra.mxu1 %v9309_v6  ;;  %4041 = vmatprep.mubr.f32.mxu1 %v13251_v40 }
 0xc04   :  { %8118 = vmatprep.subr.msk.bf16.mxu1 %vm9044_vm2, %v9312_v11 }
 0xc06   :  { %6953 = vmatmul.mubr.msk.f32.gmra.mrb[46].mxu1 %vm1001_vm8, %v12269_v62 }
 0xc07   :  { %8121 = vmatpush1.bf16.msk.msra.mxu1 %vm9044_vm2, %v9335_v21  ;;  %4116 = vmatprep.mubr.f32.mxu1 %v13251_v40 }
 0xc08   :  { %8123 = vmatprep.subr.bf16.mxu1 %v9340_v22 }
 0xc0a   :  { %6956 = vmatmul.mubr.msk.f32.vlgmr.msra.gmra.mrb[48].mxu1 %vm647_vm4, %v12128_v8 }
 0xc0b   :  { %4122 = vmatprep.mubr.f32.mxu1 %v13251_v40  ;;  %8125 = vmatpush1.bf16.msra.mxu1 %v9360_v32 }
 0xc0c   :  { %8128 = vmatprep.subr.msk.bf16.mxu1 %vm9044_vm2, %v9363_v33 }
 0xc0e   :  { %6957 = vmatmul.mubr.msk.f32.gmra.mrb[50].mxu1 %vm647_vm4, %v12141_v9 }
 0xc0f   :  { %4128 = vmatprep.mubr.f32.mxu1 %v13251_v40  ;;  %8131 = vmatpush1.bf16.msk.msra.mxu1 %vm9044_vm2, %v9381_v43 }
 0xc10   :  { %8133 = vmatprep.subr.bf16.mxu1 %v9386_v46 }
 0xc12   :  { %6958 = vmatmul.mubr.msk.f32.gmra.mrb[52].mxu1 %vm647_vm4, %v12155_v23 }
 0xc13   :  { %4134 = vmatprep.mubr.f32.mxu1 %v13251_v40 }
 0xc16   :  { %6959 = vmatmul.mubr.msk.f32.gmra.mrb[54].mxu1 %vm647_vm4, %v12144_v15 }
 0xc17   :  { %4205 = vmatprep.mubr.f32.mxu1 %v13251_v40 }
 0xc1a   :  { %6962 = vmatmul.mubr.msk.f32.vlgmr.msra.gmra.mrb[48].mxu1 %vm647_vm4, %v12104_v52 }
 0xc1b   :  { %4211 = vmatprep.mubr.f32.mxu1 %v13251_v40  ;;  %8135 = vmatpush1.bf16.msra.mxu1 %v9413_v39 }
 0xc1c   :  { %8138 = vmatprep.subr.msk.bf16.mxu1 %vm9044_vm2, %v9415_v56 }
 0xc1e   :  { %6963 = vmatmul.mubr.msk.f32.gmra.mrb[50].mxu1 %vm647_vm4, %v12109_v3 }
 0xc1f   :  { %4217 = vmatprep.mubr.f32.mxu1 %v13251_v40  ;;  %8141 = vmatpush1.bf16.msk.msra.mxu1 %vm9044_vm2, %v9427_v36 }
 0xc22   :  { %6964 = vmatmul.mubr.msk.f32.gmra.mrb[52].mxu1 %vm647_vm4, %v12122_v35 }
 0xc23   :  { %4223 = vmatprep.mubr.f32.mxu1 %v13251_v40 }
 0xc26   :  { %6965 = vmatmul.mubr.msk.f32.gmra.mrb[54].mxu1 %vm647_vm4, %v12134_v31 }
 0xc27   :  { %4294 = vmatprep.mubr.f32.mxu1 %v13251_v40 }
 0xc2a   :  { %6968 = vmatmul.mubr.msk.f32.vlgmr.msra.gmra.mrb[48].mxu1 %vm647_vm4, %v12189_v37 }
 0xc2b   :  { %4300 = vmatprep.mubr.f32.mxu1 %v13251_v40 }
 0xc2e   :  { %6969 = vmatmul.mubr.msk.f32.gmra.mrb[50].mxu1 %vm647_vm4, %v12196_v44 }
 0xc2f   :  { %4306 = vmatprep.mubr.f32.mxu1 %v13251_v40 }
 0xc32   :  { %6970 = vmatmul.mubr.msk.f32.gmra.mrb[52].mxu1 %vm647_vm4, %v12206_v48 }
 0xc33   :  { %4312 = vmatprep.mubr.f32.mxu1 %v13251_v40 }
 0xc36   :  { %6971 = vmatmul.mubr.msk.f32.gmra.mrb[54].mxu1 %vm647_vm4, %v12199_v45 }
 0xc37   :  { %4856 = vmatprep.mubr.f32.mxu1 %v13251_v40 }
 0xc4b   :  { %v3539_v10 = vpop.xlane.xlu0 %3538 }
 0xc4c   :  { %v3540_v6 = vsub.f32 %v12217_v12, %v3539_v10 }
 0xc4e   :  { %v3541_v11 = vmul.f32 1.442695, %v3540_v6 }
 0xc50   :  { %8877 = vpow2.f32 %v3541_v11 }
 0xc5a   :  { %v8878_v21 = vpop.eup %8877 }
 0xc5b   :  { %v3543_v22 = vsel %vm3536_vm6, %v8878_v21, 0.0 }
 0xc5c   :  { %3544 = vadd.xlane.f32.xlu1 %v3543_v22 }
 0xccd   :  { %v12331_v32 = vpop.f32.mrb[40].mxu1 }
 0xcce   :  { %v12333_v33 = vpop.f32.mrb[41].mxu1 }
 0xcd1   :  { %v12335_v43 = vpop.f32.mrb[42].mxu1 }
 0xcd2   :  { %v12337_v46 = vpop.f32.mrb[43].mxu1 }
 0xcd5   :  { %v12339_v39 = vpop.f32.mrb[44].mxu1 }
 0xcd6   :  { %v4048_v56 = vmax.f32 %v12331_v32, %v12339_v39  ;;  %v12343_v36 = vpop.f32.mrb[45].mxu1 }
 0xcd7   :  { %v4049_v26 = vmax.f32 %v12333_v33, %v12343_v36 }
 0xcd9   :  { %v12347_v60 = vpop.f32.mrb[46].mxu1 }
 0xcda   :  { %v4050_v25 = vmax.f32 %v12335_v43, %v12347_v60  ;;  %v12351_v52 = vpop.f32.mrb[47].mxu1  ;;  %v13514_v60 = vld [vmem:[#allocation26_spill] sm:$0xff] }
 0xcdb   :  { %v4051_v3 = vmax.f32 %v12337_v46, %v12351_v52  ;;  %v13516_v52 = vld [vmem:[#allocation28_spill] sm:$0xff] }
 0xce9   :  { %v3545_v35 = vpop.xlane.xlu1 %3544 }
 0xcea   :  { %8879 = vlog2.f32 %v3545_v35 }
 0xcf4   :  { %v8880_v8 = vpop.eup %8879 }
 0xcf5   :  { %v3547_v31 = vmul.f32 0.6931472, %v8880_v8 }
 0xcf7   :  { %v3548_v9 = vsub.f32 %v3540_v6, %v3547_v31 }
 0xcf9   :  { %3549 = vst.msk [vmem:[#allocation2] sm:$0x1] %vm3536_vm6, %v3548_v9  ;;  %v13504_v9 = vld [vmem:[#allocation16_spill] sm:$0xff] }
 0xcfd   :  { %v4296_v15 = vpop.f32.mrb[48].mxu1 }
 0xcfe   :  { %v4298_v23 = vpop.f32.mrb[49].mxu1  ;;  %v4327_v37 = vadd.f32 %v4296_v15, %v9241_v61  ;;  %v13505_v15 = vld [vmem:[#allocation17_spill] sm:$0xff] }
 0xcff   :  { %v4328_v44 = vadd.f32 %v4298_v23, %v9245_v63  ;;  %v13506_v23 = vld [vmem:[#allocation18_spill] sm:$0xff] }
 0xd00   :  { %v4335_v53 = vmax.f32 %v4327_v37, 0.0  ;;  %v13507_v37 = vld [vmem:[#allocation19_spill] sm:$0xff] }
 0xd01   :  { %v4302_v45 = vpop.f32.mrb[50].mxu1  ;;  %v4336_v13 = vmax.f32 %v4328_v44, 0.0  ;;  %v13508_v44 = vld [vmem:[#allocation20_spill] sm:$0xff] }
 0xd02   :  { %v4329_v48 = vadd.f32 %v4302_v45, %v9241_v61  ;;  %v4304_v12 = vpop.f32.mrb[51].mxu1  ;;  %v13509_v45 = vld [vmem:[#allocation21_spill] sm:$0xff] }
 0xd03   :  { %v4330_v1 = vadd.f32 %v4304_v12, %v9245_v63  ;;  %v13511_v12 = vld [vmem:[#allocation23_spill] sm:$0xff] }
 0xd04   :  { %v4337_v16 = vmax.f32 %v4329_v48, 0.0  ;;  %v13510_v48 = vld [vmem:[#allocation22_spill] sm:$0xff] }
 0xd05   :  { %v4338_v4 = vmax.f32 %v4330_v1, 0.0  ;;  %v4308_v14 = vpop.f32.mrb[52].mxu1  ;;  %v13512_v1 = vld [vmem:[#allocation24_spill] sm:$0xff] }
 0xd06   :  { %v8144_v28 = vpack.c.bf16 %v4337_v16, %v4335_v53  ;;  %v4310_v38 = vpop.f32.mrb[53].mxu1  ;;  %v4331_v30 = vadd.f32 %v4308_v14, %v9241_v61 }
 0xd07   :  { %v8142_v49 = vpack.c.bf16 %v4338_v4, %v4336_v13  ;;  %v4332_v7 = vadd.f32 %v4310_v38, %v9245_v63 }
 0xd08   :  { %v4339_v11 = vmax.f32 %v4331_v30, 0.0 }
 0xd09   :  { %v4314_v27 = vpop.f32.mrb[54].mxu1  ;;  %8143 = vmatprep.subr.bf16.mxu0 %v8142_v49  ;;  %v4340_v22 = vmax.f32 %v4332_v7, 0.0 }
 0xd0a   :  { %v4333_v18 = vadd.f32 %v4314_v27, %v9241_v61  ;;  %v4316_v10 = vpop.f32.mrb[55].mxu1  ;;  %8145 = vmatpush1.bf16.msra.mxu0 %v8144_v28  ;;  %v13493_v61 = vld [vmem:[#allocation5_spill] sm:$0xff] }
 0xd0b   :  { %v4334_v6 = vadd.f32 %v4316_v10, %v9245_v63  ;;  %v13494_v63 = vld [vmem:[#allocation6_spill] sm:$0xff] }
 0xd0c   :  { %v4341_v21 = vmax.f32 %v4333_v18, 0.0  ;;  %v13518_v10 = vld [vmem:[#allocation30_spill] sm:$0xff] }
 0xd0d   :  { %v4342_v35 = vmax.f32 %v4334_v6, 0.0  ;;  %v13519_v6 = vld [vmem:[#allocation31_spill] sm:$0xff] }
 0xd0e   :  { %v8149_v8 = vpack.c.bf16 %v4341_v21, %v4339_v11  ;;  %v13520_v11 = vld [vmem:[#allocation32_spill] sm:$0xff]  ;;  %v13521_v21 = vld [vmem:[#allocation33_spill] sm:$0xff] }
 0xd0f   :  { %v8146_v31 = vpack.c.bf16 %v4342_v35, %v4340_v22  ;;  %v13522_v22 = vld [vmem:[#allocation34_spill] sm:$0xff]  ;;  %v13523_v35 = vld [vmem:[#allocation35_spill] sm:$0xff] }
 0xd11   :  { %8148 = vmatprep.subr.msk.bf16.mxu0 %vm9256_vm7, %v8146_v31 }
 0xd12   :  { %8151 = vmatpush1.bf16.msk.msra.mxu0 %vm9256_vm7, %v8149_v8 }
 0xd13   :  { %8153 = vmatprep.subr.bf16.mxu0 %v8142_v49 }
 0xd15   :  { %6974 = vmatmul.mubr.msk.f32.vlgmr.msra.gmra.mrb[44].mxu0 %vm1001_vm8, %v12236_v50  ;;  %v13497_v50 = vld [vmem:[#allocation9_spill] sm:$0xff] }
 0xd16   :  { %8155 = vmatpush1.bf16.msra.mxu0 %v8144_v28  ;;  %4419 = vmatprep.mubr.f32.mxu0 %v13251_v40 }
 0xd17   :  { %8158 = vmatprep.subr.msk.bf16.mxu0 %vm9256_vm7, %v8146_v31  ;;  %v13525_v31 = vld [vmem:[#allocation37_spill] sm:$0xff] }
 0xd19   :  { %6975 = vmatmul.mubr.msk.f32.gmra.mrb[46].mxu0 %vm1001_vm8, %v12246_v59  ;;  %v13498_v59 = vld [vmem:[#allocation10_spill] sm:$0xff] }
 0xd1a   :  { %8161 = vmatpush1.bf16.msk.msra.mxu0 %vm9256_vm7, %v8149_v8  ;;  %4490 = vmatprep.mubr.f32.mxu0 %v13251_v40  ;;  %v13524_v8 = vld [vmem:[#allocation36_spill] sm:$0xff] }
 0xd1b   :  { %8163 = vmatprep.subr.bf16.mxu0 %v9464_v29  ;;  %v13496_v29 = vld [vmem:[#allocation8_spill] sm:$0xff] }
 0xd1d   :  { %6978 = vmatmul.mubr.msk.f32.vlgmr.msra.gmra.mrb[48].mxu0 %vm1001_vm8, %v12257_v5  ;;  %v13501_v5 = vld [vmem:[#allocation13_spill] sm:$0xff] }
 0xd1e   :  { %4496 = vmatprep.mubr.f32.mxu0 %v13251_v40  ;;  %8165 = vmatpush1.bf16.msra.mxu0 %v9475_v55  ;;  %v13499_v55 = vld [vmem:[#allocation11_spill] sm:$0xff] }
 0xd1f   :  { %8167 = vmatprep.subr.bf16.mxu0 %v9477_v2  ;;  %v13500_v2 = vld [vmem:[#allocation12_spill] sm:$0xff] }
 0xd21   :  { %6979 = vmatmul.mubr.msk.f32.gmra.mrb[50].mxu0 %vm1001_vm8, %v12269_v62  ;;  %v13502_v62 = vld [vmem:[#allocation14_spill] sm:$0xff] }
 0xd22   :  { %8169 = vmatpush1.bf16.msra.mxu0 %v9493_v19  ;;  %v13503_v19 = vld [vmem:[#allocation15_spill] sm:$0xff] }
 0xd23   :  { %8171 = vmatprep.subr.bf16.mxu0 %v13493_v61  ;;  %v13526_v61 = vld [vmem:[#allocation38_spill] sm:$0xff] }
 0xd26   :  { %8173 = vmatpush1.bf16.msra.mxu0 %v13494_v63  ;;  %v13527_v63 = vld [vmem:[#allocation39_spill] sm:$0xff] }
 0xd27   :  { %8175 = vmatprep.subr.bf16.mxu0 %v13495_v47  ;;  %v13528_v47 = vld [vmem:[#allocation40_spill] sm:$0xff] }
 0xd2a   :  { %8177 = vmatpush1.bf16.msra.mxu0 %v13496_v29  ;;  %v13529_v29 = vld [vmem:[#allocation41_spill] sm:$0xff] }
 0xd2b   :  { %8179 = vmatprep.subr.bf16.mxu0 %v13497_v50  ;;  %v13530_v50 = vld [vmem:[#allocation42_spill] sm:$0xff] }
 0xd2e   :  { %8181 = vmatpush1.bf16.msra.mxu0 %v13498_v59  ;;  %v13531_v59 = vld [vmem:[#allocation43_spill] sm:$0xff] }
 0xd2f   :  { %8183 = vmatprep.subr.bf16.mxu0 %v13499_v55  ;;  %v13532_v55 = vld [vmem:[#allocation44_spill] sm:$0xff] }
 0xd32   :  { %8185 = vmatpush1.bf16.msra.mxu0 %v13500_v2  ;;  %v13533_v2 = vld [vmem:[#allocation45_spill] sm:$0xff] }
 0xd33   :  { %8187 = vmatprep.subr.bf16.mxu0 %v13501_v5  ;;  %v13534_v5 = vld [vmem:[#allocation46_spill] sm:$0xff] }
 0xd36   :  { %8189 = vmatpush1.bf16.msra.mxu0 %v13502_v62  ;;  %v13535_v62 = vld [vmem:[#allocation47_spill] sm:$0xff] }
 0xd37   :  { %8191 = vmatprep.subr.bf16.mxu0 %v13503_v19  ;;  %v13536_v19 = vld [vmem:[#allocation48_spill] sm:$0xff] }
 0xd3a   :  { %8193 = vmatpush1.bf16.msra.mxu0 %v13504_v9  ;;  %v13537_v9 = vld [vmem:[#allocation49_spill] sm:$0xff] }
 0xd3b   :  { %8195 = vmatprep.subr.bf16.mxu0 %v9657_v24 }
 0xd3e   :  { %8197 = vmatpush1.bf16.msra.mxu0 %v9665_v41 }
 0xd3f   :  { %8199 = vmatprep.subr.bf16.mxu0 %v9675_v51 }
 0xd42   :  { %8201 = vmatpush1.bf16.msra.mxu0 %v13505_v15  ;;  %v13538_v15 = vld [vmem:[#allocation50_spill] sm:$0xff] }
 0xd43   :  { %8203 = vmatprep.subr.bf16.mxu0 %v13506_v23 }
 0xd46   :  { %8205 = vmatpush1.bf16.msra.mxu0 %v13507_v37  ;;  %v13539_v37 = vld [vmem:[#allocation51_spill] sm:$0xff] }
 0xd47   :  { %8207 = vmatprep.subr.bf16.mxu0 %v13508_v44  ;;  %v13540_v44 = vld [vmem:[#allocation52_spill] sm:$0xff] }
 0xd4a   :  { %8209 = vmatpush1.bf16.msra.mxu0 %v13509_v45 }
 0xd4b   :  { %8211 = vmatprep.subr.bf16.mxu0 %v13510_v48 }
 0xd4e   :  { %8213 = vmatpush1.bf16.msra.mxu0 %v13511_v12  ;;  %v13541_v12 = vld [vmem:[#allocation53_spill] sm:$0xff] }
 0xd4f   :  { %8215 = vmatprep.subr.bf16.mxu0 %v13512_v1  ;;  %v13542_v1 = vld [vmem:[#allocation54_spill] sm:$0xff] }
 0xde8   :  { %v4415_v24 = vpop.f32.mrb[44].mxu0 }
 0xde9   :  { %v4417_v41 = vpop.f32.mrb[45].mxu0 }
 0xdec   :  { %v4421_v53 = vpop.f32.mrb[46].mxu0 }
 0xded   :  { %v4423_v51 = vpop.f32.mrb[47].mxu0 }
 0xdf0   :  { %v4492_v16 = vpop.f32.mrb[48].mxu0 }
 0xdf1   :  { %v4503_v13 = vmax.f32 %v4415_v24, %v4492_v16  ;;  %v4494_v4 = vpop.f32.mrb[49].mxu0  ;;  %v13543_v24 = vld [vmem:[#allocation55_spill] sm:$0xff] }
 0xdf2   :  { %v4504_v14 = vmax.f32 %v4417_v41, %v4494_v4  ;;  %v13544_v41 = vld [vmem:[#allocation56_spill] sm:$0xff]  ;;  %v13547_v16 = vld [vmem:[#allocation59_spill] sm:$0xff]  ;;  %v13549_v4 = vld [vmem:[#allocation61_spill] sm:$0xff] }
 0xdf3   :  { %v12413_v28 = vmax.f32 %v4048_v56, %v4503_v13  ;;  %v13548_v13 = vld [vmem:[#allocation60_spill] sm:$0xff] }
 0xdf4   :  { %v12418_v38 = vmax.f32 %v4049_v26, %v4504_v14  ;;  %v4498_v49 = vpop.f32.mrb[50].mxu0  ;;  %v13513_v26 = vld [vmem:[#allocation25_spill] sm:$0xff]  ;;  %v13550_v14 = vld [vmem:[#allocation62_spill] sm:$0xff] }
 0xdf5   :  { %v4505_v30 = vmax.f32 %v4421_v53, %v4498_v49  ;;  %v4500_v7 = vpop.f32.mrb[51].mxu0  ;;  %v4515_v36 = vrot.slane %v12413_v28, 1  ;;  %v13545_v53 = vld [vmem:[#allocation57_spill] sm:$0xff]  ;;  %v13551_v49 = vld [vmem:[#allocation63_spill] sm:$0xff] }
 0xdf6   :  { %v4506_v27 = vmax.f32 %v4423_v51, %v4500_v7  ;;  %v4518_v33 = vrot.slane %v12418_v38, 1  ;;  %v4688_v45 = vrot.slane %v12418_v38, 2  ;;  %v13546_v51 = vld [vmem:[#allocation58_spill] sm:$0xff]  ;;  %v13553_v7 = vld [vmem:[#allocation65_spill] sm:$0xff] }
 0xdf7   :  { %v12423_v18 = vmax.f32 %v4050_v25, %v4505_v30  ;;  %v13515_v25 = vld [vmem:[#allocation27_spill] sm:$0xff]  ;;  %v13552_v30 = vld [vmem:[#allocation64_spill] sm:$0xff] }
 0xdf8   :  { %v12428_v32 = vmax.f32 %v4051_v3, %v4506_v27  ;;  %v13517_v3 = vld [vmem:[#allocation29_spill] sm:$0xff]  ;;  %v13554_v27 = vld [vmem:[#allocation66_spill] sm:$0xff] }
 0xdf9   :  { %v12431_v39 = vrot.slane %v12423_v18, 1 }
 0xdfa   :  { %v12435_v56 = vrot.slane %v12428_v32, 1  ;;  %v12482_v23 = vrot.slane %v12428_v32, 2 }
 0xdfb   :  { %v12446_v46 = vsel %vm639_vm3, %v4515_v36, %v12431_v39  ;;  %v13556_v36 = vld [vmem:[#allocation68_spill] sm:$0xff] }
 0xdfc   :  { %v12440_v43 = vsel %vm639_vm3, %v4518_v33, %v12435_v56  ;;  %v12492_v48 = vsel %vm855_vm5, %v4688_v45, %v12482_v23  ;;  %v13555_v33 = vld [vmem:[#allocation67_spill] sm:$0xff]  ;;  %v13566_v45 = vld [vmem:[#allocation78_spill] sm:$0xff] }
 0xdfd   :  { %6980 = vmatprep.mubr.msk.f32.mxu0 %vm1668_vm9, %v12440_v43 }
 0xdfe   :  { %4592 = vmatmul.mubr.f32.vlgmr.msra.gmra.mrb[52].mxu0 %v12446_v46 }
 0xdff   :  { %8217 = vmatpush1.bf16.msra.mxu0 %v13513_v26  ;;  %6981 = vmatprep.mubr.msk.f32.mxu0 %vm1668_vm9, %v12435_v56  ;;  %v13557_v26 = vld [vmem:[#allocation69_spill] sm:$0xff] }
 0xe00   :  { %8219 = vmatprep.subr.bf16.mxu0 %v13514_v60  ;;  %v13558_v60 = vld [vmem:[#allocation70_spill] sm:$0xff] }
 0xe02   :  { %4598 = vmatmul.mubr.f32.gmra.mrb[54].mxu0 %v12431_v39 }
 0xe03   :  { %8221 = vmatpush1.bf16.msra.mxu0 %v13515_v25  ;;  %6982 = vmatprep.mubr.msk.f32.mxu0 %vm1668_vm9, %v12418_v38  ;;  %v13559_v25 = vld [vmem:[#allocation71_spill] sm:$0xff] }
 0xe04   :  { %8223 = vmatprep.subr.bf16.mxu0 %v13516_v52  ;;  %v13560_v52 = vld [vmem:[#allocation72_spill] sm:$0xff] }
 0xe07   :  { %8225 = vmatpush1.bf16.msra.mxu0 %v13517_v3  ;;  %v13561_v3 = vld [vmem:[#allocation73_spill] sm:$0xff] }
 0xe08   :  { %8227 = vmatprep.subr.bf16.mxu0 %v13518_v10  ;;  %v13562_v10 = vld [vmem:[#allocation74_spill] sm:$0xff] }
 0xe0b   :  { %8229 = vmatpush1.bf16.msra.mxu0 %v13519_v6  ;;  %v12519_v6 = vrot.slane %v12423_v18, 2 }
 0xe0c   :  { %8231 = vmatprep.subr.bf16.mxu0 %v13520_v11  ;;  %v13563_v11 = vld [vmem:[#allocation75_spill] sm:$0xff] }
 0xe0f   :  { %8233 = vmatpush1.bf16.msra.mxu0 %v13521_v21  ;;  %v4685_v21 = vrot.slane %v12413_v28, 2 }
 0xe10   :  { %8235 = vmatprep.subr.bf16.mxu0 %v13522_v22 }
 0xe11   :  { %v12525_v22 = vsel %vm855_vm5, %v4685_v21, %v12519_v6  ;;  %v13598_v21 = vld [vmem:[#allocation110_spill] sm:$0xff] }
 0xe13   :  { %8237 = vmatpush1.bf16.msra.mxu0 %v13523_v35 }
 0xe14   :  { %8239 = vmatprep.subr.bf16.mxu0 %v13524_v8 }
 0xe17   :  { %8241 = vmatpush1.bf16.msra.mxu0 %v13525_v31 }
 0xe18   :  { %8243 = vmatprep.subr.bf16.mxu0 %v13526_v61 }
 0xe1b   :  { %8245 = vmatpush1.bf16.msra.mxu0 %v13527_v63 }
 0xe1c   :  { %8247 = vmatprep.subr.bf16.mxu0 %v13528_v47 }
 0xe1f   :  { %8249 = vmatpush1.bf16.msra.mxu0 %v13529_v29 }
 0xe20   :  { %8251 = vmatprep.subr.bf16.mxu0 %v13530_v50 }
 0xe23   :  { %8253 = vmatpush1.bf16.msra.mxu0 %v13531_v59 }
 0xe24   :  { %8255 = vmatprep.subr.bf16.mxu0 %v13532_v55 }
 0xe27   :  { %8257 = vmatpush1.bf16.msra.mxu0 %v13533_v2 }
 0xe28   :  { %8259 = vmatprep.subr.bf16.mxu0 %v13534_v5 }
 0xe2b   :  { %8261 = vmatpush1.bf16.msra.mxu0 %v13535_v62 }
 0xe2c   :  { %8263 = vmatprep.subr.bf16.mxu0 %v13536_v19 }
 0xe2f   :  { %8265 = vmatpush1.bf16.msra.mxu0 %v13537_v9  ;;  %v12545_v9 = vld [vmem:[%s12973_s9] sm:$0xff] }
 0xe30   :  { %8267 = vmatprep.subr.bf16.mxu0 %v13538_v15  ;;  %v12556_v15 = vld [vmem:[%s12974_s10] sm:$0xff] }
 0xe32   :  { %4673 = vmatmul.mubr.f32.vlgmr.msra.gmra.mrb[52].mxu0 %v12413_v28 }
 0xe33   :  { %6983 = vmatprep.mubr.msk.f32.mxu0 %vm1668_vm9, %v12428_v32  ;;  %8269 = vmatpush1.bf16.msra.mxu0 %v13539_v37  ;;  %v13564_v37 = vld [vmem:[#allocation76_spill] sm:$0xff] }
 0xe34   :  { %8271 = vmatprep.subr.bf16.mxu0 %v13540_v44  ;;  %v13565_v44 = vld [vmem:[#allocation77_spill] sm:$0xff] }
 0xe36   :  { %4679 = vmatmul.mubr.f32.gmra.mrb[54].mxu0 %v12423_v18 }
 0xe37   :  { %8273 = vmatpush1.bf16.msra.mxu0 %v13541_v12  ;;  %6984 = vmatprep.mubr.msk.f32.mxu0 %vm1668_vm9, %v12492_v48  ;;  %v13567_v12 = vld [vmem:[#allocation79_spill] sm:$0xff] }
 0xe38   :  { %8275 = vmatprep.subr.bf16.mxu0 %v13542_v1  ;;  %v13569_v1 = vld [vmem:[#allocation81_spill] sm:$0xff] }
 0xe3b   :  { %8277 = vmatpush1.bf16.msra.mxu0 %v13543_v24  ;;  %v13570_v24 = vld [vmem:[#allocation82_spill] sm:$0xff] }
 0xe3c   :  { %8279 = vmatprep.subr.bf16.mxu0 %v13544_v41  ;;  %v13571_v41 = vld [vmem:[#allocation83_spill] sm:$0xff] }
 0xe3f   :  { %8281 = vmatpush1.bf16.msra.mxu0 %v13545_v53  ;;  %v13572_v53 = vld [vmem:[#allocation84_spill] sm:$0xff] }
 0xe40   :  { %8283 = vmatprep.subr.bf16.mxu0 %v13546_v51  ;;  %v13573_v51 = vld [vmem:[#allocation85_spill] sm:$0xff] }
 0xe43   :  { %8285 = vmatpush1.bf16.msra.mxu0 %v13547_v16  ;;  %v13574_v16 = vld [vmem:[#allocation86_spill] sm:$0xff] }
 0xe44   :  { %8287 = vmatprep.subr.bf16.mxu0 %v13548_v13  ;;  %v13576_v13 = vld [vmem:[#allocation88_spill] sm:$0xff] }
 0xe47   :  { %8289 = vmatpush1.bf16.msra.mxu0 %v13549_v4  ;;  %v13577_v4 = vld [vmem:[#allocation89_spill] sm:$0xff] }
 0xe48   :  { %8291 = vmatprep.subr.bf16.mxu0 %v13550_v14  ;;  %v13578_v14 = vld [vmem:[#allocation90_spill] sm:$0xff] }
 0xe4b   :  { %8293 = vmatpush1.bf16.msra.mxu0 %v13551_v49  ;;  %v13579_v49 = vld [vmem:[#allocation91_spill] sm:$0xff] }
 0xe4c   :  { %8295 = vmatprep.subr.bf16.mxu0 %v13552_v30  ;;  %v13580_v30 = vld [vmem:[#allocation92_spill] sm:$0xff] }
 0xe4f   :  { %8297 = vmatpush1.bf16.msra.mxu0 %v13553_v7  ;;  %v13581_v7 = vld [vmem:[#allocation93_spill] sm:$0xff] }
 0xe50   :  { %8299 = vmatprep.subr.bf16.mxu0 %v13554_v27  ;;  %v13582_v27 = vld [vmem:[#allocation94_spill] sm:$0xff] }
 0xe53   :  { %8301 = vmatpush1.bf16.msra.mxu0 %v13555_v33  ;;  %v13583_v33 = vld [vmem:[#allocation95_spill] sm:$0xff] }
 0xe54   :  { %8303 = vmatprep.subr.bf16.mxu0 %v13556_v36  ;;  %v13584_v36 = vld [vmem:[#allocation96_spill] sm:$0xff] }
 0xe57   :  { %8305 = vmatpush1.bf16.msra.mxu0 %v13557_v26  ;;  %v13585_v26 = vld [vmem:[#allocation97_spill] sm:$0xff] }
 0xe58   :  { %8307 = vmatprep.subr.bf16.mxu0 %v13558_v60  ;;  %v13586_v60 = vld [vmem:[#allocation98_spill] sm:$0xff] }
 0xe5b   :  { %8309 = vmatpush1.bf16.msra.mxu0 %v13559_v25  ;;  %v13587_v25 = vld [vmem:[#allocation99_spill] sm:$0xff] }
 0xe5c   :  { %8311 = vmatprep.subr.bf16.mxu0 %v13560_v52  ;;  %v13588_v52 = vld [vmem:[#allocation100_spill] sm:$0xff] }
 0xe5f   :  { %8313 = vmatpush1.bf16.msra.mxu0 %v13561_v3  ;;  %v13589_v3 = vld [vmem:[#allocation101_spill] sm:$0xff] }
 0xe60   :  { %8315 = vmatprep.subr.bf16.mxu0 %v13562_v10  ;;  %v13590_v10 = vld [vmem:[#allocation102_spill] sm:$0xff] }
 0xe63   :  { %8317 = vmatpush1.bf16.msra.mxu0 %v13563_v11  ;;  %v13592_v11 = vld [vmem:[#allocation104_spill] sm:$0xff] }
 0xe66   :  { %4762 = vmatmul.mubr.f32.vlgmr.msra.gmra.mrb[52].mxu0 %v12525_v22 }
 0xe67   :  { %6985 = vmatprep.mubr.msk.f32.mxu0 %vm1668_vm9, %v12482_v23 }
 0xe6a   :  { %4768 = vmatmul.mubr.f32.gmra.mrb[54].mxu0 %v12519_v6 }
 0xe6b   :  { %5249 = vmatprep.mubr.f32.mxu0 %v13251_v40 }
 0xf39   :  { %v4763_v35 = vpop.f32.mrb[52].mxu0 }
 0xf3a   :  { %v4765_v8 = vpop.f32.mrb[53].mxu0  ;;  %v4778_v31 = vadd.f32 %v4763_v35, %v10285_v54  ;;  %v13599_v35 = vld [vmem:[#allocation111_spill] sm:$0xff] }
 0xf3b   :  { %v4779_v61 = vadd.f32 %v4765_v8, %v10289_v34  ;;  %v13601_v8 = vld [vmem:[#allocation113_spill] sm:$0xff] }
 0xf3c   :  { %v4782_v59 = vmax.f32 %v4778_v31, 0.0  ;;  %v13602_v31 = vld [vmem:[#allocation114_spill] sm:$0xff] }
 0xf3d   :  { %v4769_v63 = vpop.f32.mrb[54].mxu0  ;;  %v4783_v2 = vmax.f32 %v4779_v61, 0.0  ;;  %v13603_v61 = vld [vmem:[#allocation115_spill] sm:$0xff] }
 0xf3e   :  { %v4780_v47 = vadd.f32 %v4769_v63, %v10285_v54  ;;  %v4771_v29 = vpop.f32.mrb[55].mxu0  ;;  %v13604_v63 = vld [vmem:[#allocation116_spill] sm:$0xff] }
 0xf3f   :  { %v4781_v50 = vadd.f32 %v4771_v29, %v10289_v34  ;;  %v13606_v29 = vld [vmem:[#allocation118_spill] sm:$0xff] }
 0xf40   :  { %v4784_v55 = vmax.f32 %v4780_v47, 0.0  ;;  %v13605_v47 = vld [vmem:[#allocation117_spill] sm:$0xff] }
 0xf41   :  { %v4785_v5 = vmax.f32 %v4781_v50, 0.0  ;;  %v13607_v50 = vld [vmem:[#allocation119_spill] sm:$0xff] }
 0xf42   :  { %v8321_v62 = vpack.c.bf16 %v4784_v55, %v4782_v59  ;;  %v13608_v59 = vld [vmem:[#allocation120_spill] sm:$0xff]  ;;  %v13609_v55 = vld [vmem:[#allocation121_spill] sm:$0xff] }
 0xf43   :  { %v8318_v19 = vpack.c.bf16 %v4785_v5, %v4783_v2  ;;  %v13610_v2 = vld [vmem:[#allocation122_spill] sm:$0xff]  ;;  %v13611_v5 = vld [vmem:[#allocation123_spill] sm:$0xff] }
 0xf45   :  { %8320 = vmatprep.subr.msk.bf16.mxu1 %vm10302_vm11, %v8318_v19 }
 0xf46   :  { %8323 = vmatpush1.bf16.msk.msra.mxu1 %vm10302_vm11, %v8321_v62 }
 0xf47   :  { %8326 = vmatprep.subr.msk.bf16.mxu1 %vm10302_vm11, %v8318_v19  ;;  %v13613_v19 = vld [vmem:[#allocation125_spill] sm:$0xff] }
 0xf49   :  { %6988 = vmatmul.mubr.msk.f32.vlgmr.msra.gmra.mrb[56].mxu1 %vm1943_vm12, %v12545_v9 }
 0xf4a   :  { %8329 = vmatpush1.bf16.msk.msra.mxu1 %vm10302_vm11, %v8321_v62  ;;  %4927 = vmatprep.mubr.f32.mxu1 %v13251_v40  ;;  %v13612_v62 = vld [vmem:[#allocation124_spill] sm:$0xff] }
 0xf4b   :  { %8331 = vmatprep.subr.bf16.mxu1 %v10306_v42  ;;  %v13568_v42 = vld [vmem:[#allocation80_spill] sm:$0xff] }
 0xf4d   :  { %6991 = vmatmul.mubr.msk.f32.vlgmr.msra.gmra.mrb[58].mxu1 %vm1943_vm12, %v12556_v15 }
 0xf4e   :  { %8333 = vmatpush1.bf16.msra.mxu1 %v13564_v37  ;;  %6992 = vmatprep.mubr.msk.f32.mxu1 %vm1668_vm9, %v12440_v43  ;;  %v13575_v43 = vld [vmem:[#allocation87_spill] sm:$0xff]  ;;  %v13614_v37 = vld [vmem:[#allocation126_spill] sm:$0xff] }
 0xf4f   :  { %8335 = vmatprep.subr.bf16.mxu1 %v13565_v44  ;;  %v13615_v44 = vld [vmem:[#allocation127_spill] sm:$0xff] }
 0xf52   :  { %8337 = vmatpush1.bf16.msra.mxu1 %v13566_v45  ;;  %v13616_v45 = vld [vmem:[#allocation128_spill] sm:$0xff] }
 0xf53   :  { %8339 = vmatprep.subr.bf16.mxu1 %v13567_v12  ;;  %v13617_v12 = vld [vmem:[#allocation129_spill] sm:$0xff] }
 0xf56   :  { %8341 = vmatpush1.bf16.msra.mxu1 %v13568_v42  ;;  %v13618_v42 = vld [vmem:[#allocation130_spill] sm:$0xff] }
 0xf57   :  { %8343 = vmatprep.subr.bf16.mxu1 %v13569_v1  ;;  %v13621_v1 = vld [vmem:[#allocation133_spill] sm:$0xff] }
 0xf5a   :  { %8345 = vmatpush1.bf16.msra.mxu1 %v13570_v24  ;;  %v13622_v24 = vld [vmem:[#allocation134_spill] sm:$0xff] }
 0xf5b   :  { %8347 = vmatprep.subr.bf16.mxu1 %v13571_v41  ;;  %v13624_v41 = vld [vmem:[#allocation136_spill] sm:$0xff] }
 0xf5e   :  { %8349 = vmatpush1.bf16.msra.mxu1 %v13572_v53  ;;  %v13625_v53 = vld [vmem:[#allocation137_spill] sm:$0xff] }
 0xf5f   :  { %8351 = vmatprep.subr.bf16.mxu1 %v13573_v51  ;;  %v13627_v51 = vld [vmem:[#allocation139_spill] sm:$0xff] }
 0xf62   :  { %8353 = vmatpush1.bf16.msra.mxu1 %v13574_v16  ;;  %v13628_v16 = vld [vmem:[#allocation140_spill] sm:$0xff] }
 0xf63   :  { %8355 = vmatprep.subr.bf16.mxu1 %v13575_v43  ;;  %v13629_v43 = vld [vmem:[#allocation141_spill] sm:$0xff] }
 0xf66   :  { %8357 = vmatpush1.bf16.msra.mxu1 %v13576_v13  ;;  %v13630_v13 = vld [vmem:[#allocation142_spill] sm:$0xff] }
 0xf67   :  { %8359 = vmatprep.subr.bf16.mxu1 %v13577_v4  ;;  %v13631_v4 = vld [vmem:[#allocation143_spill] sm:$0xff] }
 0xf6a   :  { %8361 = vmatpush1.bf16.msra.mxu1 %v13578_v14  ;;  %v13632_v14 = vld [vmem:[#allocation144_spill] sm:$0xff] }
 0xf6b   :  { %8363 = vmatprep.subr.bf16.mxu1 %v13579_v49  ;;  %v13633_v49 = vld [vmem:[#allocation145_spill] sm:$0xff] }
 0xf6e   :  { %8365 = vmatpush1.bf16.msra.mxu1 %v13580_v30  ;;  %v13634_v30 = vld [vmem:[#allocation146_spill] sm:$0xff] }
 0xf6f   :  { %8367 = vmatprep.subr.bf16.mxu1 %v13581_v7  ;;  %v13635_v7 = vld [vmem:[#allocation147_spill] sm:$0xff] }
 0xf72   :  { %8369 = vmatpush1.bf16.msra.mxu1 %v13582_v27  ;;  %v13636_v27 = vld [vmem:[#allocation148_spill] sm:$0xff] }
 0xf73   :  { %8371 = vmatprep.subr.bf16.mxu1 %v13583_v33  ;;  %v13637_v33 = vld [vmem:[#allocation149_spill] sm:$0xff] }
 0xf76   :  { %8373 = vmatpush1.bf16.msra.mxu1 %v13584_v36  ;;  %v13638_v36 = vld [vmem:[#allocation150_spill] sm:$0xff] }
 0xf77   :  { %8375 = vmatprep.subr.bf16.mxu1 %v13585_v26  ;;  %v13639_v26 = vld [vmem:[#allocation151_spill] sm:$0xff] }
 0xf7a   :  { %8377 = vmatpush1.bf16.msra.mxu1 %v13586_v60  ;;  %v13640_v60 = vld [vmem:[#allocation152_spill] sm:$0xff] }
 0xf7b   :  { %8379 = vmatprep.subr.bf16.mxu1 %v13587_v25  ;;  %v13641_v25 = vld [vmem:[#allocation153_spill] sm:$0xff] }
 0xf7e   :  { %8381 = vmatpush1.bf16.msra.mxu1 %v10561_v57  ;;  %v13591_v57 = vld [vmem:[#allocation103_spill] sm:$0xff] }
 0xf7f   :  { %8383 = vmatprep.subr.bf16.mxu1 %v13588_v52  ;;  %v13645_v52 = vld [vmem:[#allocation157_spill] sm:$0xff] }
 0xf81   :  { %5001 = vmatmul.mubr.f32.vlgmr.msra.gmra.mrb[60].mxu1 %v12446_v46  ;;  %v13593_v46 = vld [vmem:[#allocation105_spill] sm:$0xff] }
 0xf82   :  { %6993 = vmatprep.mubr.msk.f32.mxu1 %vm1668_vm9, %v12435_v56  ;;  %8385 = vmatpush1.bf16.msra.mxu1 %v10579_v20  ;;  %v13594_v56 = vld [vmem:[#allocation106_spill] sm:$0xff]  ;;  %v13595_v20 = vld [vmem:[#allocation107_spill] sm:$0xff] }
 0xf83   :  { %8387 = vmatprep.subr.bf16.mxu1 %v10582_v58  ;;  %v13596_v58 = vld [vmem:[#allocation108_spill] sm:$0xff] }
 0xf85   :  { %5007 = vmatmul.mubr.f32.gmra.mrb[62].mxu1 %v12431_v39  ;;  %v13597_v39 = vld [vmem:[#allocation109_spill] sm:$0xff] }
 0xf86   :  { %8389 = vmatpush1.bf16.msra.mxu1 %v13589_v3  ;;  %6994 = vmatprep.mubr.msk.f32.mxu1 %vm1668_vm9, %v12418_v38  ;;  %v13600_v38 = vld [vmem:[#allocation112_spill] sm:$0xff]  ;;  %v13646_v3 = vld [vmem:[#allocation158_spill] sm:$0xff] }
 0xf87   :  { %8391 = vmatprep.subr.bf16.mxu1 %v13590_v10  ;;  %v13647_v10 = vld [vmem:[#allocation168_spill] sm:$0xff] }
 0xf8a   :  { %8393 = vmatpush1.bf16.msra.mxu1 %v13591_v57  ;;  %v13648_v57 = vld [vmem:[#allocation170_spill] sm:$0xff] }
 0xf8b   :  { %8395 = vmatprep.subr.bf16.mxu1 %v13592_v11  ;;  %v13649_v11 = vld [vmem:[#allocation172_spill] sm:$0xff] }
 0xf8e   :  { %8397 = vmatpush1.bf16.msra.mxu1 %v13593_v46 }
 0xf8f   :  { %8399 = vmatprep.subr.bf16.mxu1 %v13594_v56 }
 0xf92   :  { %8401 = vmatpush1.bf16.msra.mxu1 %v13595_v20 }
 0xf93   :  { %8403 = vmatprep.subr.bf16.mxu1 %v13596_v58 }
 0xf96   :  { %8405 = vmatpush1.bf16.msra.mxu1 %v13597_v39 }
 0xf97   :  { %8407 = vmatprep.subr.bf16.mxu1 %v13598_v21 }
 0xf9a   :  { %8409 = vmatpush1.bf16.msra.mxu1 %v13599_v35 }
 0xf9b   :  { %8411 = vmatprep.subr.bf16.mxu1 %v13600_v38 }
 0xf9e   :  { %8413 = vmatpush1.bf16.msra.mxu1 %v13601_v8 }
 0xf9f   :  { %8415 = vmatprep.subr.bf16.mxu1 %v13602_v31 }
 0xfa2   :  { %8417 = vmatpush1.bf16.msra.mxu1 %v13603_v61 }
 0xfa3   :  { %8419 = vmatprep.subr.bf16.mxu1 %v13604_v63 }
 0xfa6   :  { %8421 = vmatpush1.bf16.msra.mxu1 %v13605_v47 }
 0xfa7   :  { %8423 = vmatprep.subr.bf16.mxu1 %v13606_v29 }
 0xfaa   :  { %8425 = vmatpush1.bf16.msra.mxu1 %v13607_v50 }
 0xfab   :  { %8427 = vmatprep.subr.bf16.mxu1 %v13608_v59 }
 0xfae   :  { %8429 = vmatpush1.bf16.msra.mxu1 %v13609_v55 }
 0xfaf   :  { %8431 = vmatprep.subr.bf16.mxu1 %v13610_v2 }
 0xfb2   :  { %8433 = vmatpush1.bf16.msra.mxu1 %v13611_v5 }
 0xfb3   :  { %8435 = vmatprep.subr.bf16.mxu1 %v13612_v62 }
 0xfb5   :  { %5078 = vmatmul.mubr.f32.vlgmr.msra.gmra.mrb[60].mxu1 %v12413_v28  ;;  %v13619_v28 = vld [vmem:[#allocation131_spill] sm:$0xff] }
 0xfb6   :  { %6995 = vmatprep.mubr.msk.f32.mxu1 %vm1668_vm9, %v12428_v32  ;;  %8437 = vmatpush1.bf16.msra.mxu1 %v13613_v19  ;;  %v13620_v32 = vld [vmem:[#allocation132_spill] sm:$0xff]  ;;  %v13652_v19 = vld [vmem:[#allocation161_spill] sm:$0xff] }
 0xfb7   :  { %8439 = vmatprep.subr.bf16.mxu1 %v13614_v37  ;;  %v13656_v37 = vld [vmem:[#allocation165_spill] sm:$0xff] }
 0xfb9   :  { %5084 = vmatmul.mubr.f32.gmra.mrb[62].mxu1 %v12423_v18  ;;  %v13623_v18 = vld [vmem:[#allocation135_spill] sm:$0xff] }
 0xfba   :  { %8441 = vmatpush1.bf16.msra.mxu1 %v13615_v44  ;;  %6996 = vmatprep.mubr.msk.f32.mxu1 %vm1668_vm9, %v12492_v48  ;;  %v13626_v48 = vld [vmem:[#allocation138_spill] sm:$0xff] }
 0xfbb   :  { %8443 = vmatprep.subr.bf16.mxu1 %v13616_v45  ;;  %v13657_v44 = vld [vmem:[#allocation166_spill] sm:$0xff]  ;;  %v13658_v45 = vld [vmem:[#allocation167_spill] sm:$0xff] }
 0xfbe   :  { %8445 = vmatpush1.bf16.msra.mxu1 %v13617_v12  ;;  %v13659_v12 = vld [vmem:[#allocation169_spill] sm:$0xff] }
 0xfbf   :  { %8447 = vmatprep.subr.bf16.mxu1 %v13618_v42  ;;  %v13660_v42 = vld [vmem:[#allocation171_spill] sm:$0xff] }
 0xfc2   :  { %8449 = vmatpush1.bf16.msra.mxu1 %v13619_v28  ;;  %v13661_v28 = vld [vmem:[#allocation173_spill] sm:$0xff] }
 0xfc3   :  { %8451 = vmatprep.subr.bf16.mxu1 %v13620_v32 }
 0xfc6   :  { %8453 = vmatpush1.bf16.msra.mxu1 %v13621_v1 }
 0xfc7   :  { %8455 = vmatprep.subr.bf16.mxu1 %v13622_v24 }
 0xfca   :  { %8457 = vmatpush1.bf16.msra.mxu1 %v13623_v18 }
 0xfcb   :  { %8459 = vmatprep.subr.bf16.mxu1 %v13624_v41 }
 0xfce   :  { %8461 = vmatpush1.bf16.msra.mxu1 %v13625_v53 }
 0xfcf   :  { %8463 = vmatprep.subr.bf16.mxu1 %v13626_v48 }
 0xfd2   :  { %8465 = vmatpush1.bf16.msra.mxu1 %v13627_v51 }
 0xfd3   :  { %8467 = vmatprep.subr.bf16.mxu1 %v13628_v16 }
 0xfd6   :  { %8469 = vmatpush1.bf16.msra.mxu1 %v13629_v43 }
 0xfd7   :  { %8471 = vmatprep.subr.bf16.mxu1 %v13630_v13 }
 0xfda   :  { %8473 = vmatpush1.bf16.msra.mxu1 %v13631_v4  ;;  %v13662_v4 = vld [vmem:[#allocation174_spill] sm:$0xff] }
 0xfdb   :  { %8475 = vmatprep.subr.bf16.mxu1 %v13632_v14  ;;  %v13663_v14 = vld [vmem:[#allocation175_spill] sm:$0xff] }
 0xfde   :  { %8477 = vmatpush1.bf16.msra.mxu1 %v13633_v49  ;;  %v13664_v49 = vld [vmem:[#allocation176_spill] sm:$0xff] }
 0xfdf   :  { %8479 = vmatprep.subr.bf16.mxu1 %v13634_v30  ;;  %v13665_v30 = vld [vmem:[#allocation177_spill] sm:$0xff] }
 0xfe2   :  { %8481 = vmatpush1.bf16.msra.mxu1 %v13635_v7  ;;  %v13666_v7 = vld [vmem:[#allocation178_spill] sm:$0xff] }
 0xfe3   :  { %8483 = vmatprep.subr.bf16.mxu1 %v13636_v27  ;;  %v13667_v27 = vld [vmem:[#allocation179_spill] sm:$0xff] }
 0xfe6   :  { %8485 = vmatpush1.bf16.msra.mxu1 %v13637_v33  ;;  %v13668_v33 = vld [vmem:[#allocation180_spill] sm:$0xff] }
 0xfe7   :  { %8534 = vmatprep.subr.bf16.mxu1 %v13421_v17 }
 0xfe9   :  { %5155 = vmatmul.mubr.f32.vlgmr.msra.gmra.mrb[60].mxu1 %v12525_v22  ;;  %v13642_v22 = vld [vmem:[#allocation154_spill] sm:$0xff] }
 0xfea   :  { %6997 = vmatprep.mubr.msk.f32.mxu1 %vm1668_vm9, %v12482_v23  ;;  %8536 = vmatpush1.bf16.msra.mxu1 %v13638_v36  ;;  %v13643_v23 = vld [vmem:[#allocation155_spill] sm:$0xff]  ;;  %v13669_v36 = vld [vmem:[#allocation181_spill] sm:$0xff] }
 0xfeb   :  { %8537 = vmatprep.subr.bf16.mxu1 %v13421_v17 }
 0xfed   :  { %5161 = vmatmul.mubr.f32.gmra.mrb[62].mxu1 %v12519_v6  ;;  %v13644_v6 = vld [vmem:[#allocation156_spill] sm:$0xff] }
 0xfee   :  { %8539 = vmatpush1.bf16.msra.mxu1 %v13639_v26  ;;  %v13670_v26 = vld [vmem:[#allocation182_spill] sm:$0xff] }
 0xfef   :  { %8540 = vmatprep.subr.bf16.mxu1 %v13421_v17 }
 0xff2   :  { %8542 = vmatpush1.bf16.msra.mxu1 %v13640_v60  ;;  %v13671_v60 = vld [vmem:[#allocation183_spill] sm:$0xff] }
 0xff3   :  { %8543 = vmatprep.subr.bf16.mxu1 %v13421_v17 }
 0xff6   :  { %8545 = vmatpush1.bf16.msra.mxu1 %v13641_v25  ;;  %v13672_v25 = vld [vmem:[#allocation184_spill] sm:$0xff] }
 0xff7   :  { %8546 = vmatprep.subr.bf16.mxu1 %v13421_v17 }
 0xffa   :  { %8548 = vmatpush1.bf16.msra.mxu1 %v13642_v22  ;;  %v13673_v22 = vld [vmem:[#allocation185_spill] sm:$0xff] }
 0xffb   :  { %8549 = vmatprep.subr.bf16.mxu1 %v13421_v17 }
 0xffe   :  { %8551 = vmatpush1.bf16.msra.mxu1 %v13643_v23 }
 0xfff   :  { %8552 = vmatprep.subr.bf16.mxu1 %v13421_v17 }
0x1002   :  { %8554 = vmatpush1.bf16.msra.mxu1 %v13644_v6  ;;  %v13674_v6 = vld [vmem:[#allocation186_spill] sm:$0xff] }
0x1003   :  { %8555 = vmatprep.subr.bf16.mxu1 %v13421_v17 }
0x1006   :  { %8557 = vmatpush1.bf16.msra.mxu1 %v13645_v52  ;;  %v13675_v52 = vld [vmem:[#allocation187_spill] sm:$0xff] }
0x1007   :  { %8558 = vmatprep.subr.bf16.mxu1 %v13421_v17 }
0x100a   :  { %8560 = vmatpush1.bf16.msra.mxu1 %v13646_v3  ;;  %v13676_v3 = vld [vmem:[#allocation188_spill] sm:$0xff] }
0x100b   :  { %8561 = vmatprep.subr.bf16.mxu1 %v13421_v17 }
0x100e   :  { %8563 = vmatpush1.bf16.msra.mxu1 %v13647_v10  ;;  %v13677_v10 = vld [vmem:[#allocation189_spill] sm:$0xff] }
0x100f   :  { %8564 = vmatprep.subr.bf16.mxu1 %v13421_v17 }
0x1012   :  { %8566 = vmatpush1.bf16.msra.mxu1 %v13648_v57  ;;  %v13678_v57 = vld [vmem:[#allocation190_spill] sm:$0xff] }
0x1013   :  { %8567 = vmatprep.subr.bf16.mxu1 %v13421_v17 }
0x1016   :  { %8569 = vmatpush1.bf16.msra.mxu1 %v13649_v11  ;;  %v13679_v11 = vld [vmem:[#allocation191_spill] sm:$0xff] }
0x1017   :  { %7238 = vmatprep.subr.mxu1 %v13251_v40 }
0x101c   :  { %v4858_v46 = vpop.f32.mrb[56].mxu1 }
0x101d   :  { %v4860_v56 = vpop.f32.mrb[57].mxu1 }
0x1020   :  { %v4929_v20 = vpop.f32.mrb[58].mxu1 }
0x1021   :  { %v4934_v58 = vmax.f32 %v4858_v46, %v4929_v20  ;;  %v4931_v39 = vpop.f32.mrb[59].mxu1  ;;  %v13680_v46 = vld [vmem:[#allocation192_spill] sm:$0xff]  ;;  %v13682_v20 = vld [vmem:[#allocation194_spill] sm:$0xff] }
0x1022   :  { %v4935_v21 = vmax.f32 %v4860_v56, %v4931_v39  ;;  %v13681_v56 = vld [vmem:[#allocation193_spill] sm:$0xff]  ;;  %v13684_v39 = vld [vmem:[#allocation196_spill] sm:$0xff] }
0x10bc   :  { %v5156_v35 = vpop.f32.mrb[60].mxu1 }
0x10bd   :  { %v5158_v38 = vpop.f32.mrb[61].mxu1  ;;  %v5171_v8 = vadd.f32 %v5156_v35, %v10285_v54 }
0x10be   :  { %v5172_v31 = vadd.f32 %v5158_v38, %v10289_v34 }
0x10bf   :  { %v5175_v50 = vmax.f32 %v5171_v8, 0.0 }
0x10c0   :  { %v5162_v61 = vpop.f32.mrb[62].mxu1  ;;  %v5176_v55 = vmax.f32 %v5172_v31, 0.0 }
0x10c1   :  { %v5173_v63 = vadd.f32 %v5162_v61, %v10285_v54  ;;  %v5164_v47 = vpop.f32.mrb[63].mxu1  ;;  %v13651_v54 = vld [vmem:[#allocation160_spill] sm:$0xff] }
0x10c2   :  { %v5174_v29 = vadd.f32 %v5164_v47, %v10289_v34  ;;  %v13650_v34 = vld [vmem:[#allocation159_spill] sm:$0xff] }
0x10c3   :  { %v5177_v59 = vmax.f32 %v5173_v63, 0.0 }
0x10c4   :  { %v5178_v2 = vmax.f32 %v5174_v29, 0.0 }
0x10c5   :  { %v8489_v5 = vpack.c.bf16 %v5177_v59, %v5175_v50  ;;  %v12801_v50 = vld [vmem:[%s12970_s6] ss:$0 sm:$0xff] }
0x10c6   :  { %v8486_v62 = vpack.c.bf16 %v5178_v2, %v5176_v55  ;;  %v12808_v2 = vld [vmem:[%s12975_s11] sm:$0x7] }
0x10c8   :  { %8488 = vmatprep.subr.msk.bf16.mxu0 %vm10302_vm11, %v8486_v62 }
0x10c9   :  { %8491 = vmatpush1.bf16.msk.msra.mxu0 %vm10302_vm11, %v8489_v5 }
0x10ca   :  { %8494 = vmatprep.subr.msk.bf16.mxu0 %vm10302_vm11, %v8486_v62  ;;  %v13686_v62 = vld [vmem:[#allocation198_spill] sm:$0xff] }
0x10cc   :  { %7000 = vmatmul.mubr.msk.f32.vlgmr.msra.gmra.mrb[56].mxu0 %vm1943_vm12, %v12545_v9  ;;  %v13654_v9 = vld [vmem:[#allocation163_spill] sm:$0xff] }
0x10cd   :  { %8497 = vmatpush1.bf16.msk.msra.mxu0 %vm10302_vm11, %v8489_v5  ;;  %5320 = vmatprep.mubr.f32.mxu0 %v13251_v40  ;;  %v12820_v5 = vld [vmem:[%s12976_s12] sm:$0x7] }
0x10ce   :  { %8498 = vmatprep.subr.bf16.mxu0 %v13421_v17 }
0x10d0   :  { %7003 = vmatmul.mubr.msk.f32.vlgmr.msra.gmra.mrb[58].mxu0 %vm1943_vm12, %v12556_v15  ;;  %v13655_v15 = vld [vmem:[#allocation164_spill] sm:$0xff] }
0x10d1   :  { %8500 = vmatpush1.bf16.msra.mxu0 %v13650_v34  ;;  %v13687_v34 = vld [vmem:[#allocation199_spill] sm:$0xff] }
0x10d2   :  { %8501 = vmatprep.subr.bf16.mxu0 %v13421_v17 }
0x10d5   :  { %8503 = vmatpush1.bf16.msra.mxu0 %v13651_v54  ;;  %v13688_v54 = vld [vmem:[#allocation200_spill] sm:$0xff] }
0x10d6   :  { %8504 = vmatprep.subr.bf16.mxu0 %v13421_v17 }
0x10d9   :  { %8506 = vmatpush1.bf16.msra.mxu0 %v13652_v19  ;;  %v13689_v19 = vld [vmem:[#allocation201_spill] sm:$0xff] }
0x10da   :  { %8507 = vmatprep.subr.bf16.mxu0 %v13421_v17 }
0x10dd   :  { %8509 = vmatpush1.bf16.msra.mxu0 %v13653_v0  ;;  %v13690_v0 = vld [vmem:[#allocation202_spill] sm:$0xff] }
0x10de   :  { %8510 = vmatprep.subr.bf16.mxu0 %v13421_v17 }
0x10e1   :  { %8512 = vmatpush1.bf16.msra.mxu0 %v13654_v9  ;;  %v13691_v9 = vld [vmem:[#allocation203_spill] sm:$0xff] }
0x10e2   :  { %8513 = vmatprep.subr.bf16.mxu0 %v13421_v17 }
0x10e5   :  { %8515 = vmatpush1.bf16.msra.mxu0 %v13655_v15  ;;  %v13692_v15 = vld [vmem:[#allocation204_spill] sm:$0xff] }
0x10e6   :  { %8516 = vmatprep.subr.bf16.mxu0 %v13421_v17 }
0x10e9   :  { %8518 = vmatpush1.bf16.msra.mxu0 %v13656_v37  ;;  %v13693_v37 = vld [vmem:[#allocation205_spill] sm:$0xff] }
0x10ea   :  { %8519 = vmatprep.subr.bf16.mxu0 %v13421_v17 }
0x10ed   :  { %8521 = vmatpush1.bf16.msra.mxu0 %v13657_v44  ;;  %v13694_v44 = vld [vmem:[#allocation206_spill] sm:$0xff] }
0x10ee   :  { %8522 = vmatprep.subr.bf16.mxu0 %v13421_v17 }
0x10f1   :  { %8524 = vmatpush1.bf16.msra.mxu0 %v13658_v45 }
0x10f2   :  { %8525 = vmatprep.subr.bf16.mxu0 %v13421_v17 }
0x10f5   :  { %8527 = vmatpush1.bf16.msra.mxu0 %v13659_v12  ;;  %v13695_v12 = vld [vmem:[#allocation207_spill] sm:$0xff] }
0x10f6   :  { %8528 = vmatprep.subr.bf16.mxu0 %v13421_v17 }
0x10f9   :  { %8530 = vmatpush1.bf16.msra.mxu0 %v13660_v42 }
0x10fa   :  { %8531 = vmatprep.subr.bf16.mxu0 %v13421_v17 }
0x10fd   :  { %8533 = vmatpush1.bf16.msra.mxu0 %v13661_v28  ;;  %v13696_v28 = vld [vmem:[#allocation208_spill] sm:$0xff] }
0x10fe   :  { %8570 = vmatprep.subr.bf16.mxu0 %v13421_v17 }
0x119f   :  { %v5251_v32 = vpop.f32.mrb[56].mxu0 }
0x11a0   :  { %v5253_v1 = vpop.f32.mrb[57].mxu0 }
0x11a3   :  { %v5322_v24 = vpop.f32.mrb[58].mxu0 }
0x11a4   :  { %v5327_v18 = vmax.f32 %v5251_v32, %v5322_v24  ;;  %v5324_v41 = vpop.f32.mrb[59].mxu0  ;;  %v13697_v32 = vld [vmem:[#allocation209_spill] sm:$0xff]  ;;  %v13699_v24 = vld [vmem:[#allocation211_spill] sm:$0xff] }
0x11a5   :  { %v5328_v53 = vmax.f32 %v5253_v1, %v5324_v41  ;;  %v13698_v1 = vld [vmem:[#allocation210_spill] sm:$0xff]  ;;  %v13701_v41 = vld [vmem:[#allocation213_spill] sm:$0xff] }
0x11a6   :  { %v12722_v48 = vmax.f32 %v4934_v58, %v5327_v18  ;;  %v13683_v58 = vld [vmem:[#allocation195_spill] sm:$0xff]  ;;  %v13700_v18 = vld [vmem:[#allocation212_spill] sm:$0xff] }
0x11a7   :  { %v12724_v51 = vmax.f32 %v4935_v21, %v5328_v53  ;;  %v13685_v21 = vld [vmem:[#allocation197_spill] sm:$0xff]  ;;  %v13702_v53 = vld [vmem:[#allocation214_spill] sm:$0xff] }
0x11a8   :  { %v5333_v43 = vrot.slane %v12722_v48, 1  ;;  %v5480_v23 = vrot.slane %v12722_v48, 2 }
0x11a9   :  { %7005 = vmatprep.mubr.msk.f32.mxu1 %vm2501_vm13, %v12724_v51  ;;  %v5334_v16 = vrot.slane %v12724_v51, 1  ;;  %v5481_v13 = vrot.slane %v12724_v51, 2 }
0x11aa   :  { %5475 = vmatmul.mubr.f32.vlgmr.msra.gmra.mrb[64].mxu1 %v12722_v48 }
0x11ab   :  { %7004 = vmatprep.mubr.msk.f32.mxu0 %vm2501_vm13, %v5334_v16  ;;  %7240 = vmatprep.mubr.msk.f32.mxu1 %vm8923_vm14, %v13251_v40 }
0x11ac   :  { %5403 = vmatmul.mubr.f32.vlgmr.msra.gmra.mrb[60].mxu0 %v5333_v43 }
0x11ad   :  { %8572 = vmatpush1.bf16.msra.mxu0 %v13662_v4  ;;  %7006 = vmatprep.mubr.msk.f32.mxu0 %vm2501_vm13, %v5481_v13  ;;  %v13707_v4 = vld [vmem:[#allocation219_spill] sm:$0xff] }
0x11ae   :  { %8573 = vmatprep.subr.bf16.mxu0 %v13421_v17 }
0x11b1   :  { %8575 = vmatpush1.bf16.msra.mxu0 %v13663_v14  ;;  %v13708_v14 = vld [vmem:[#allocation220_spill] sm:$0xff] }
0x11b2   :  { %8576 = vmatprep.subr.bf16.mxu0 %v13421_v17 }
0x11b5   :  { %8578 = vmatpush1.bf16.msra.mxu0 %v13664_v49  ;;  %v13709_v49 = vld [vmem:[#allocation221_spill] sm:$0xff] }
0x11b6   :  { %8579 = vmatprep.subr.bf16.mxu0 %v13421_v17 }
0x11b9   :  { %8581 = vmatpush1.bf16.msra.mxu0 %v13665_v30  ;;  %v13710_v30 = vld [vmem:[#allocation222_spill] sm:$0xff] }
0x11ba   :  { %8582 = vmatprep.subr.bf16.mxu0 %v13421_v17 }
0x11bd   :  { %8584 = vmatpush1.bf16.msra.mxu0 %v13666_v7  ;;  %v13711_v7 = vld [vmem:[#allocation223_spill] sm:$0xff] }
0x11be   :  { %8585 = vmatprep.subr.bf16.mxu0 %v13421_v17 }
0x11c1   :  { %8587 = vmatpush1.bf16.msra.mxu0 %v13667_v27  ;;  %v13712_v27 = vld [vmem:[#allocation224_spill] sm:$0xff] }
0x11c2   :  { %8588 = vmatprep.subr.bf16.mxu0 %v13421_v17 }
0x11c5   :  { %8590 = vmatpush1.bf16.msra.mxu0 %v13668_v33  ;;  %v13713_v33 = vld [vmem:[#allocation225_spill] sm:$0xff] }
0x11c6   :  { %8591 = vmatprep.subr.bf16.mxu0 %v13421_v17 }
0x11c9   :  { %8593 = vmatpush1.bf16.msra.mxu0 %v13669_v36  ;;  %v13715_v36 = vld [vmem:[#allocation232_spill] sm:$0xff] }
0x11ca   :  { %8594 = vmatprep.subr.bf16.mxu0 %v13421_v17 }
0x11cd   :  { %8596 = vmatpush1.bf16.msra.mxu0 %v13670_v26 }
0x11ce   :  { %8597 = vmatprep.subr.bf16.mxu0 %v13421_v17 }
0x11d1   :  { %8599 = vmatpush1.bf16.msra.mxu0 %v13671_v60 }
0x11d2   :  { %8600 = vmatprep.subr.bf16.mxu0 %v13421_v17 }
0x11d5   :  { %8602 = vmatpush1.bf16.msra.mxu0 %v13672_v25 }
0x11d6   :  { %8603 = vmatprep.subr.bf16.mxu0 %v13421_v17 }
0x11d9   :  { %8605 = vmatpush1.bf16.msra.mxu0 %v13673_v22 }
0x11da   :  { %8642 = vmatprep.subr.bf16.mxu0 %v13421_v17 }
0x11dc   :  { %5550 = vmatmul.mubr.f32.vlgmr.msra.gmra.mrb[62].mxu0 %v5480_v23 }
0x11dd   :  { %8644 = vmatpush1.bf16.msra.mxu0 %v13674_v6  ;;  %7012 = vmatprep.mubr.msk.f32.mxu0 %vm2501_vm13, %v12724_v51  ;;  %v13703_v51 = vld [vmem:[#allocation215_spill] sm:$0xff] }
0x11de   :  { %8645 = vmatprep.subr.bf16.mxu0 %v13421_v17 }
0x11e1   :  { %8647 = vmatpush1.bf16.msra.mxu0 %v13675_v52 }
0x11e2   :  { %8648 = vmatprep.subr.bf16.mxu0 %v13421_v17 }
0x11e5   :  { %8650 = vmatpush1.bf16.msra.mxu0 %v13676_v3 }
0x11e6   :  { %8651 = vmatprep.subr.bf16.mxu0 %v13421_v17 }
0x11e9   :  { %8653 = vmatpush1.bf16.msra.mxu0 %v13677_v10 }
0x11ea   :  { %8654 = vmatprep.subr.bf16.mxu0 %v13421_v17 }
0x11ed   :  { %8656 = vmatpush1.bf16.msra.mxu0 %v13678_v57 }
0x11ee   :  { %8657 = vmatprep.subr.bf16.mxu0 %v13421_v17 }
0x11f1   :  { %8659 = vmatpush1.bf16.msra.mxu0 %v13679_v11 }
0x11f2   :  { %8660 = vmatprep.subr.bf16.mxu0 %v13421_v17 }
0x11f5   :  { %8662 = vmatpush1.bf16.msra.mxu0 %v13680_v46 }
0x11f6   :  { %8663 = vmatprep.subr.bf16.mxu0 %v13421_v17 }
0x11f9   :  { %8665 = vmatpush1.bf16.msra.mxu0 %v13681_v56 }
0x11fa   :  { %8666 = vmatprep.subr.bf16.mxu0 %v13421_v17 }
0x11fd   :  { %8668 = vmatpush1.bf16.msra.mxu0 %v13682_v20  ;;  %v13716_v20 = vld [vmem:[#allocation226_spill] sm:$0xff] }
0x11fe   :  { %8669 = vmatprep.subr.bf16.mxu0 %v13421_v17 }
0x1201   :  { %8671 = vmatpush1.bf16.msra.mxu0 %v13683_v58  ;;  %v13717_v58 = vld [vmem:[#allocation227_spill] sm:$0xff] }
0x1202   :  { %8672 = vmatprep.subr.bf16.mxu0 %v13421_v17 }
0x1205   :  { %8674 = vmatpush1.bf16.msra.mxu0 %v13684_v39  ;;  %v13718_v39 = vld [vmem:[#allocation228_spill] sm:$0xff] }
0x1206   :  { %8675 = vmatprep.subr.bf16.mxu0 %v13421_v17 }
0x1209   :  { %8677 = vmatpush1.bf16.msra.mxu0 %v13685_v21  ;;  %v13719_v21 = vld [vmem:[#allocation229_spill] sm:$0xff] }
0x120a   :  { %7248 = vmatprep.subr.mxu0 %v13251_v40 }
0x120c   :  { %5837 = vmatmul.mubr.f32.vlgmr.msra.gmra.mrb[64].mxu0 %v12722_v48  ;;  %v13714_v48 = vld [vmem:[#allocation230_spill] sm:$0xff] }
0x120d   :  { %7250 = vmatprep.mubr.msk.f32.mxu0 %vm8923_vm14, %v13251_v40 }
0x127d   :  { %v5476_v35 = vpop.f32.mrb[64].mxu1 }
0x127e   :  { %v5478_v38 = vpop.f32.mrb[65].mxu1 }
0x127f   :  { %v5404_v8 = vpop.f32.mrb[60].mxu0  ;;  %v13721_v38 = vld [vmem:[#allocation233_spill] sm:$0xff] }
0x1280   :  { %v5477_v31 = vadd.f32 %v5476_v35, %v5404_v8  ;;  %v5406_v61 = vpop.f32.mrb[61].mxu0  ;;  %v13720_v35 = vld [vmem:[#allocation231_spill] sm:$0xff] }
0x12af   :  { %v5551_v63 = vpop.f32.mrb[62].mxu0 }
0x12b0   :  { %v5555_v47 = vadd.f32 %v5551_v63, %v5477_v31  ;;  %v5553_v29 = vpop.f32.mrb[63].mxu0 }
0x12b2   :  { %v5556_v59 = vadd.f32 %v12801_v50, %v5555_v47 }
0x12b4   :  { %v5557_v55 = vmax.f32 %v5556_v59, 0.0  ;;  %v13722_v59 = vld [vmem:[#allocation240_spill] sm:$0xff] }
0x12b6   :  { %7239 = vmatpush3.msk.msra.mxu1 %vm855_vm5, %v5557_v55 }
0x12b7   :  { %7241 = vmatmul.mubr.msk.f32.vlgmr.msra.gmra.mrb[66].mxu1 %vm2730_vm15, %v12808_v2  ;;  %7243 = vmatprep.subr.mxu1 %v13251_v40 }
0x12b8   :  { %7244 = vmatpush3.msk.msra.mxu1 %vm855_vm5, %v5557_v55  ;;  %7245 = vmatprep.mubr.msk.f32.mxu1 %vm8923_vm14, %v13251_v40  ;;  %v13723_v55 = vld [vmem:[#allocation234_spill] sm:$0xff] }
0x12b9   :  { %8606 = vmatprep.subr.bf16.mxu1 %v13421_v17 }
0x12bb   :  { %7246 = vmatmul.mubr.msk.f32.vlgmr.msra.gmra.mrb[68].mxu1 %vm2730_vm15, %v12820_v5 }
0x12bc   :  { %8608 = vmatpush1.bf16.msra.mxu1 %v13686_v62  ;;  %7011 = vmatprep.mubr.msk.f32.mxu1 %vm2501_vm13, %v5334_v16  ;;  %v13704_v16 = vld [vmem:[#allocation216_spill] sm:$0xff] }
0x12bd   :  { %8609 = vmatprep.subr.bf16.mxu1 %v13421_v17  ;;  %v13726_v62 = vld [vmem:[#allocation236_spill] sm:$0xff] }
0x12c0   :  { %8611 = vmatpush1.bf16.msra.mxu1 %v13687_v34  ;;  %v13727_v34 = vld [vmem:[#allocation237_spill] sm:$0xff] }
0x12c1   :  { %8612 = vmatprep.subr.bf16.mxu1 %v13421_v17 }
0x12c4   :  { %8614 = vmatpush1.bf16.msra.mxu1 %v13688_v54  ;;  %v13728_v54 = vld [vmem:[#allocation238_spill] sm:$0xff] }
0x12c5   :  { %8615 = vmatprep.subr.bf16.mxu1 %v13421_v17 }
0x12c8   :  { %8617 = vmatpush1.bf16.msra.mxu1 %v13689_v19 }
0x12c9   :  { %8618 = vmatprep.subr.bf16.mxu1 %v13421_v17 }
0x12cc   :  { %8620 = vmatpush1.bf16.msra.mxu1 %v13690_v0 }
0x12cd   :  { %8621 = vmatprep.subr.bf16.mxu1 %v13421_v17 }
0x12d0   :  { %8623 = vmatpush1.bf16.msra.mxu1 %v13691_v9 }
0x12d1   :  { %8624 = vmatprep.subr.bf16.mxu1 %v13421_v17 }
0x12d4   :  { %8626 = vmatpush1.bf16.msra.mxu1 %v13692_v15 }
0x12d5   :  { %8627 = vmatprep.subr.bf16.mxu1 %v13421_v17 }
0x12d8   :  { %8629 = vmatpush1.bf16.msra.mxu1 %v13693_v37 }
0x12d9   :  { %8630 = vmatprep.subr.bf16.mxu1 %v13421_v17 }
0x12dc   :  { %8632 = vmatpush1.bf16.msra.mxu1 %v13694_v44 }
0x12dd   :  { %8633 = vmatprep.subr.bf16.mxu1 %v13421_v17 }
0x12df   :  { %v5838_v45 = vpop.f32.mrb[64].mxu0 }
0x12e0   :  { %8635 = vmatpush1.bf16.msra.mxu1 %v13695_v12  ;;  %v5840_v42 = vpop.f32.mrb[65].mxu0 }
0x12e1   :  { %8636 = vmatprep.subr.bf16.mxu1 %v13421_v17 }
0x12e4   :  { %8638 = vmatpush1.bf16.msra.mxu1 %v13696_v28  ;;  %v8894_v28 = vld [vmem:[%s12978_s14] sm:$0x1]  ;;  %s8924_s14 = smov [#allocation2]  }
0x12e5   :  { %8639 = vmatprep.subr.bf16.mxu1 %v13421_v17  ;;  %s6374_s23 = sshll.u32 %s8924_s14, 4  ;;  %s6375_s23 = int_to_ptr.vmem [resolvable:$true] %s6374_s23 }
0x12e6   :  { %p8901_p1 = scmp.lt.s32.totalorder %s6375_s23, %s6375_s23 }
0x12e8   :  { %8641 = vmatpush1.bf16.msra.mxu1 %v13697_v32 }
0x12e9   :  { %8678 = vmatprep.subr.bf16.mxu1 %v13421_v17 }
0x12eb   :  { %5767 = vmatmul.mubr.f32.vlgmr.msra.gmra.mrb[70].mxu1 %v5333_v43  ;;  %v13705_v43 = vld [vmem:[#allocation217_spill] sm:$0xff] }
0x12ec   :  { %8680 = vmatpush1.bf16.msra.mxu1 %v13698_v1  ;;  %7013 = vmatprep.mubr.msk.f32.mxu1 %vm2501_vm13, %v5481_v13  ;;  %v13706_v13 = vld [vmem:[#allocation218_spill] sm:$0xff] }
0x12ed   :  { %8681 = vmatprep.subr.bf16.mxu1 %v13421_v17 }
0x12f0   :  { %8683 = vmatpush1.bf16.msra.mxu1 %v13699_v24  ;;  %v8895_v24 = vld [vmem:[%s12980_s16] sm:$0x1]  ;;  %s8896_s16 = scalar_lea.vmem %s6375_s23, 32 }
0x12f1   :  { %8684 = vmatprep.subr.bf16.mxu1 %v13421_v17  ;;  %p8897_p0 = scmp.ne.s32.totalorder %s6375_s23, %s8896_s16  ;;  %p8902_p2 = scmp.lt.s32.totalorder %s8896_s16, %s8896_s16 }
0x12f3   :  { %p8903_p3 = por %p8902_p2, %p8901_p1 }
0x12f4   :  { %8686 = vmatpush1.bf16.msra.mxu1 %v13700_v18 }
0x12f5   :  { %8687 = vmatprep.subr.bf16.mxu1 %v13421_v17  ;;  %p8904_p4 = pnand %p8903_p3, %p8897_p0 }
0x12f8   :  { %8689 = vmatpush1.bf16.msra.mxu1 %v13701_v41 }
0x12f9   :  { %8690 = vmatprep.subr.bf16.mxu1 %v13421_v17 }
0x12fc   :  { %8692 = vmatpush1.bf16.msra.mxu1 %v13702_v53 }
0x12fd   :  { %8693 = vmatprep.subr.bf16.mxu1 %v13421_v17 }
0x1300   :  { %8695 = vmatpush1.bf16.msra.mxu1 %v13703_v51 }
0x1301   :  { %8696 = vmatprep.subr.bf16.mxu1 %v13421_v17 }
0x1304   :  { %8698 = vmatpush1.bf16.msra.mxu1 %v13704_v16 }
0x1305   :  { %8699 = vmatprep.subr.bf16.mxu1 %v13421_v17 }
0x1308   :  { %8701 = vmatpush1.bf16.msra.mxu1 %v13705_v43 }
0x1309   :  { %8702 = vmatprep.subr.bf16.mxu1 %v13421_v17 }
0x130c   :  { %8704 = vmatpush1.bf16.msra.mxu1 %v13706_v13 }
0x130d   :  { %8705 = vmatprep.subr.bf16.mxu1 %v13421_v17 }
0x1310   :  { %8707 = vmatpush1.bf16.msra.mxu1 %v13707_v4 }
0x1311   :  { %8708 = vmatprep.subr.bf16.mxu1 %v13421_v17 }
0x1314   :  { %8710 = vmatpush1.bf16.msra.mxu1 %v13708_v14 }
0x1315   :  { %8711 = vmatprep.subr.bf16.mxu1 %v13421_v17 }
0x1318   :  { %8713 = vmatpush1.bf16.msra.mxu1 %v13709_v49 }
0x1319   :  { %8732 = vmatprep.subr.bf16.mxu1 %v13421_v17 }
0x131b   :  { %5907 = vmatmul.mubr.f32.vlgmr.msra.gmra.mrb[72].mxu1 %v5480_v23 }
0x131c   :  { %8734 = vmatpush3.bf16.msra.mxu1 %v13710_v30  ;;  %7309 = vmatprep.mubr.msk.f32.mxu1 %vm8923_vm14, %v13251_v40 }
0x131d   :  { %8735 = vmatprep.subr.bf16.mxu1 %v13421_v17 }
0x1320   :  { %8737 = vmatpush3.bf16.msra.mxu1 %v13711_v7 }
0x1321   :  { %8738 = vmatprep.subr.bf16.mxu1 %v13421_v17 }
0x1324   :  { %8740 = vmatpush3.bf16.msra.mxu1 %v13712_v27 }
0x1325   :  { %8741 = vmatprep.subr.bf16.mxu1 %v13421_v17 }
0x1328   :  { %8743 = vmatpush3.bf16.msra.mxu1 %v13713_v33 }
0x1329   :  { %8744 = vmatprep.subr.bf16.mxu1 %v13421_v17 }
0x132c   :  { %8746 = vmatpush3.bf16.msra.mxu1 %v13714_v48 }
0x132d   :  { %8747 = vmatprep.subr.bf16.mxu1 %v13421_v17 }
0x1330   :  { %8749 = vmatpush3.bf16.msra.mxu1 %v13715_v36 }
0x1331   :  { %8768 = vmatprep.subr.bf16.mxu1 %v13421_v17 }
0x138a   :  { %v5627_v26 = vpop.f32.mrb[66].mxu1 }
0x138b   :  { %v7242_v60 = vpop.f32.mrb[67].mxu1 }
0x138e   :  { %v5697_v25 = vpop.f32.mrb[68].mxu1 }
0x138f   :  { %v5701_v22 = vmax.f32 %v5627_v26, %v5697_v25  ;;  %v7247_v23 = vpop.f32.mrb[69].mxu1 }
0x13be   :  { %v5768_v6 = vpop.f32.mrb[70].mxu1 }
0x13bf   :  { %v5839_v52 = vadd.f32 %v5838_v45, %v5768_v6  ;;  %v5770_v3 = vpop.f32.mrb[71].mxu1 }
0x13ee   :  { %v5908_v10 = vpop.f32.mrb[72].mxu1 }
0x13ef   :  { %v5912_v57 = vadd.f32 %v5908_v10, %v5839_v52  ;;  %v5910_v11 = vpop.f32.mrb[73].mxu1 }
0x13f1   :  { %v5913_v46 = vadd.f32 %v12801_v50, %v5912_v57 }
0x13f3   :  { %v5914_v56 = vmax.f32 %v5913_v46, 0.0 }
0x13f5   :  { %7249 = vmatpush3.msk.msra.mxu0 %vm855_vm5, %v5914_v56 }
0x13f6   :  { %7251 = vmatmul.mubr.msk.f32.vlgmr.msra.gmra.mrb[66].mxu0 %vm2730_vm15, %v12808_v2  ;;  %7253 = vmatprep.subr.mxu0 %v13251_v40  ;;  %v13724_v2 = vld [vmem:[#allocation241_spill] sm:$0xff] }
0x13f7   :  { %7254 = vmatpush3.msk.msra.mxu0 %vm855_vm5, %v5914_v56  ;;  %7255 = vmatprep.mubr.msk.f32.mxu0 %vm8923_vm14, %v13251_v40 }
0x13f8   :  { %8714 = vmatprep.subr.bf16.mxu0 %v13421_v17 }
0x13fa   :  { %7256 = vmatmul.mubr.msk.f32.vlgmr.msra.gmra.mrb[68].mxu0 %vm2730_vm15, %v12820_v5  ;;  %v13725_v5 = vld [vmem:[#allocation235_spill] sm:$0xff] }
0x13fb   :  { %8716 = vmatpush3.bf16.msra.mxu0 %v13716_v20  ;;  %7282 = vmatprep.mubr.msk.f32.mxu0 %vm8923_vm14, %v13251_v40 }
0x13fc   :  { %8717 = vmatprep.subr.bf16.mxu0 %v13421_v17 }
0x13ff   :  { %8719 = vmatpush3.bf16.msra.mxu0 %v13717_v58 }
0x1400   :  { %8720 = vmatprep.subr.bf16.mxu0 %v13421_v17 }
0x1403   :  { %8722 = vmatpush3.bf16.msra.mxu0 %v13718_v39 }
0x1404   :  { %8723 = vmatprep.subr.bf16.mxu0 %v13421_v17 }
0x1407   :  { %8725 = vmatpush3.bf16.msra.mxu0 %v13719_v21 }
0x1408   :  { %8726 = vmatprep.subr.bf16.mxu0 %v13421_v17 }
0x140b   :  { %8728 = vmatpush3.bf16.msra.mxu0 %v13720_v35 }
0x140c   :  { %8729 = vmatprep.subr.bf16.mxu0 %v13421_v17 }
0x140f   :  { %8731 = vmatpush3.bf16.msra.mxu0 %v13721_v38 }
0x1410   :  { %8750 = vmatprep.subr.bf16.mxu0 %v13421_v17 }
0x14c9   :  { %v5984_v8 = vpop.f32.mrb[66].mxu0 }
0x14ca   :  { %v7252_v31 = vpop.f32.mrb[67].mxu0 }
0x14cd   :  { %v6054_v61 = vpop.f32.mrb[68].mxu0 }
0x14ce   :  { %v6058_v63 = vmax.f32 %v5984_v8, %v6054_v61  ;;  %v7257_v47 = vpop.f32.mrb[69].mxu0 }
0x14d0   :  { %v6059_v29 = vmax.f32 %v5701_v22, %v6058_v63 }
0x14d2   :  { %v6061_v50 = vrot.slane %v6059_v29, 1  ;;  %7310 = vmatmul.mubr.msk.f32.vlgmr.msra.gmra.mrb[74].mxu1 %vm3241_vm0, %v6059_v29  ;;  %v6206_v19 = vrot.slane %v6059_v29, 2 }
0x14d3   :  { %8770 = vmatpush3.bf16.msra.mxu1 %v13722_v59  ;;  %7347 = vmatprep.mubr.msk.f32.mxu1 %vm8923_vm14, %v13251_v40 }
0x14d4   :  { %7283 = vmatmul.mubr.msk.f32.vlgmr.msra.gmra.mrb[70].mxu0 %vm3241_vm0, %v6061_v50  ;;  %8771 = vmatprep.subr.bf16.mxu1 %v13421_v17 }
0x14d5   :  { %8752 = vmatpush3.bf16.msra.mxu0 %v13723_v55  ;;  %7336 = vmatprep.mubr.msk.f32.mxu0 %vm8923_vm14, %v13251_v40  ;;  %v13729_v40 = vld [vmem:[#allocation239_spill] sm:$0xff] }
0x14d6   :  { %8753 = vmatprep.subr.bf16.mxu0 %v13421_v17 }
0x14d7   :  { %8773 = vmatpush3.bf16.msra.mxu1 %v13724_v2 }
0x14d9   :  { %8755 = vmatpush3.bf16.msra.mxu0 %v13725_v5 }
0x14da   :  { %8756 = vmatprep.subr.bf16.mxu0 %v13421_v17 }
0x14dd   :  { %8758 = vmatpush3.bf16.msra.mxu0 %v13726_v62 }
0x14de   :  { %8759 = vmatprep.subr.bf16.mxu0 %v13421_v17 }
0x14e1   :  { %8761 = vmatpush3.bf16.msra.mxu0 %v13727_v34 }
0x14e2   :  { %8762 = vmatprep.subr.bf16.mxu0 %v13421_v17 }
0x14e5   :  { %8764 = vmatpush3.bf16.msra.mxu0 %v13728_v54 }
0x14e6   :  { %8765 = vmatprep.subr.bf16.mxu0 %v13421_v17 }
0x14e9   :  { %8767 = vmatpush3.bf16.msra.mxu0 %v13729_v40 }
0x14ec   :  { %7337 = vmatmul.mubr.msk.f32.vlgmr.msra.gmra.mrb[72].mxu0 %vm3241_vm0, %v6206_v19 }
0x15a5   :  { %v6202_v0 = vpop.f32.mrb[74].mxu1 }
0x15a6   :  { %v7311_v9 = vpop.f32.mrb[75].mxu1 }
0x15a7   :  { %v6130_v15 = vpop.f32.mrb[70].mxu0 }
0x15a8   :  { %v6203_v37 = vadd.f32 %v6202_v0, %v6130_v15  ;;  %v7284_v44 = vpop.f32.mrb[71].mxu0 }
0x15bf   :  { %v6275_v45 = vpop.f32.mrb[72].mxu0 }
0x15c0   :  { %v6279_v12 = vadd.f32 %v6275_v45, %v6203_v37  ;;  %v7338_v42 = vpop.f32.mrb[73].mxu0 }
0x15c2   :  { %v6280_v32 = vadd.f32 %v8894_v28, %v6279_v12 }
0x15c4   :  { %v6281_v1 = vmax.f32 %v6280_v32, 0.0 }
0x15c6   :  { %7348 = vmatmul.mubr.msk.f32.vlgmr.msra.gmra.mrb[76].mxu1 %vm3462_vm1, %v6281_v1 }
0x1699   :  { %v6351_v17 = vpop.f32.mrb[76].mxu1 }
0x169a   :  { %v6352_v18 = vadd.f32 %v8895_v24, %v6351_v17  ;;  %v7349_v41 = vpop.f32.mrb[77].mxu1 }
0x169c   :  { %v6355_v53 = vsel %vm3536_vm6, %v6352_v18, -inf }
0x169d   :  { %6356 = vmax.xlane.f32.xlu0 %v6355_v53 }
0x172a   :  { %v6357_v51 = vpop.xlane.xlu0 %6356 }
0x172b   :  { %v6358_v16 = vsub.f32 %v6352_v18, %v6357_v51 }
0x172d   :  { %v6359_v43 = vmul.f32 1.442695, %v6358_v16 }
0x172f   :  { %8881 = vpow2.f32 %v6359_v43 }
0x1739   :  { %v8882_v13 = vpop.eup %8881 }
0x173a   :  { %v6361_v4 = vsel %vm3536_vm6, %v8882_v13, 0.0 }
0x173b   :  { %6362 = vadd.xlane.f32.xlu1 %v6361_v4 }
0x17c8   :  { %v6363_v14 = vpop.xlane.xlu1 %6362 }
0x17c9   :  { %8883 = vlog2.f32 %v6363_v14 }
0x17d3   :  { %v8884_v49 = vpop.eup %8883 }
0x17d4   :  { %v6365_v30 = vmul.f32 0.6931472, %v8884_v49 }
0x17d6   :  { %v6366_v7 = vsub.f32 %v6358_v16, %v6365_v30 }
0x17d8   :  { %6368 = vst.msk [vmem:[#allocation2 + $0x1] sm:$0x1] %vm3536_vm6, %v6366_v7 }
0x17d9   :  { %8907 = shalt.err (!%p8904_p4)
}
0x17da   :  { %s8908_s25 = scalar_lea.hbm %s12981_s17, 32 }
0x17db   :  { %p8909_p5 = scmp.ne.s32.totalorder %s12981_s17, %s8908_s25  ;;  %p8912_p6 = scmp.lt.u32.totalorder %s8908_s25, %s12981_s17 }
0x17dd   :  { %p8914_p7 = pnand %p8912_p6, %p8909_p5 }
0x17df   :  { %8917 = shalt.err (!%p8914_p7)
}
0x17e0   :  { %s8925_s0 = smov 16   ;;  %s8926_s5 = smov 1  }
0x17e1   :  { %6380 = dma.vmem_to_hbm [thread:$0]  %s6375_s23, 32, %s12981_s17, [#allocation3], %s8925_s0, %s8925_s0, %s8926_s5  }
0x17e2   :  { %8918 = dma.done.wait [#allocation3], 32  }
0x17e3   :  { %8919 = vsyncadd [#allocation3], 4294967264 }
0x17e4   :  { %6384 = vsyncpa [#allocation3], 1 }

</bundles_post_ra>
